<compile_context>
chip_gen: v7x
topology: tpu7x:2x2x1
jax: 0.10.0
libtpu: 0.0.40
codegen_flags: <defaults>
</compile_context>

<pallas_src>
import functools

import jax
import jax.numpy as jnp
from jax.experimental import pallas as pl
from jax.experimental.pallas import tpu as pltpu


_VMEM_LIMIT = 32 << 20  # 32 MiB: plenty for these tiles, leaves v7x headroom.


# ----------------------------------------------------------------------------
# Tile-size helper: pick a multiple-of-8 divisor of M (no padding, grid >= 2
# when possible).
# ----------------------------------------------------------------------------

def _pick_tm(m, target=128):
    best = None
    for cand in range(8, min(m, target) + 1, 8):
        if m % cand == 0 and m // cand >= 2:
            best = cand
    return best if best is not None else m


# ----------------------------------------------------------------------------
# Pallas kernels
# ----------------------------------------------------------------------------

def _mm_kernel(x_ref, w_ref, *rest, in_act, out_act, has_bias):
    """Y = out_act( in_act(X) @ W [+ b] ) for one (tm, K) row-tile of X."""
    if has_bias:
        b_ref, o_ref = rest
    else:
        (o_ref,) = rest
    x = x_ref[...]
    if in_act == "leaky":
        x = jnp.where(x >= 0, x, 0.01 * x)
    y = jnp.dot(x, w_ref[...], preferred_element_type=jnp.float32)
    if has_bias:
        y = y + b_ref[...]
    if out_act == "leaky":
        y = jnp.where(y >= 0, y, 0.01 * y)
    o_ref[...] = y


def matmul_pallas(x, w, b=None, in_act="none", out_act="none", tm_target=128):
    """x: (M, K) f32, w: (K, N) f32, optional b: (N,) -> (M, N) f32."""
    x = x.astype(jnp.float32)
    w = w.astype(jnp.float32)
    M, K = x.shape
    _, N = w.shape
    tm = _pick_tm(M, tm_target)
    grid = (M // tm,)
    has_bias = b is not None

    in_specs = [
        pl.BlockSpec((tm, K), lambda i: (i, 0)),
        pl.BlockSpec((K, N), lambda i: (0, 0)),
    ]
    args = [x, w]
    if has_bias:
        in_specs.append(pl.BlockSpec((1, N), lambda i: (0, 0)))
        args.append(b.astype(jnp.float32).reshape(1, N))

    return pl.pallas_call(
        functools.partial(_mm_kernel, in_act=in_act, out_act=out_act,
                          has_bias=has_bias),
        out_shape=jax.ShapeDtypeStruct((M, N), jnp.float32),
        grid=grid,
        in_specs=in_specs,
        out_specs=pl.BlockSpec((tm, N), lambda i: (i, 0)),
        compiler_params=pltpu.CompilerParams(
            dimension_semantics=("parallel",),
            vmem_limit_bytes=_VMEM_LIMIT,
        ),
    )(*args)


def _latent_kernel(flat_ref, wzm_ref, bzm_ref, wzl_ref, bzl_ref, eps_ref,
                   wd_ref, bd_ref, zm_out, zl_out, z_out, h_out):
    """Fused: z_mean / z_log_var linears, reparameterize, decoder linear."""
    flat = flat_ref[...]
    zm = jnp.dot(flat, wzm_ref[...], preferred_element_type=jnp.float32) + bzm_ref[...]
    zl = jnp.dot(flat, wzl_ref[...], preferred_element_type=jnp.float32) + bzl_ref[...]
    z = zm + eps_ref[...] * jnp.exp(zl * 0.5)
    h = jnp.dot(z, wd_ref[...], preferred_element_type=jnp.float32) + bd_ref[...]
    zm_out[...] = zm
    zl_out[...] = zl
    z_out[...] = z
    h_out[...] = h


def latent_block(flat, wzm, bzm, wzl, bzl, eps, wd, bd):
    B, K = flat.shape
    L = wzm.shape[1]
    H = wd.shape[1]

    def full(shp):
        return pl.BlockSpec(shp, lambda: (0,) * len(shp))

    return pl.pallas_call(
        _latent_kernel,
        out_shape=(jax.ShapeDtypeStruct((B, L), jnp.float32),
                   jax.ShapeDtypeStruct((B, L), jnp.float32),
                   jax.ShapeDtypeStruct((B, L), jnp.float32),
                   jax.ShapeDtypeStruct((B, H), jnp.float32)),
        in_specs=[full((B, K)), full((K, L)), full((1, L)),
                  full((K, L)), full((1, L)), full((B, L)),
                  full((L, H)), full((1, H))],
        out_specs=(full((B, L)), full((B, L)), full((B, L)), full((B, H))),
        compiler_params=pltpu.CompilerParams(vmem_limit_bytes=_VMEM_LIMIT),
    )(flat.astype(jnp.float32), wzm, bzm.reshape(1, L), wzl, bzl.reshape(1, L),
      eps.astype(jnp.float32), wd, bd.reshape(1, H))


def _act_kernel(x_ref, o_ref, *, act):
    y = x_ref[...]
    if act in ("leaky", "leaky_sigmoid"):
        y = jnp.where(y >= 0, y, 0.01 * y)
    if act == "leaky_sigmoid":
        y = jax.nn.sigmoid(y)
    o_ref[...] = y


def apply_act_lane_dense(x, act):
    """Elementwise activation on a lane-dense (rows, 128) reshape of x."""
    shape = x.shape
    total = x.size
    if total % 128 == 0:
        flat = x.reshape(total // 128, 128)
    else:
        flat = x.reshape(1, total)
    rows, cols = flat.shape
    tm = _pick_tm(rows, target=256)
    out = pl.pallas_call(
        functools.partial(_act_kernel, act=act),
        out_shape=jax.ShapeDtypeStruct((rows, cols), jnp.float32),
        grid=(rows // tm,),
        in_specs=[pl.BlockSpec((tm, cols), lambda i: (i, 0))],
        out_specs=pl.BlockSpec((tm, cols), lambda i: (i, 0)),
        compiler_params=pltpu.CompilerParams(
            dimension_semantics=("parallel",),
            vmem_limit_bytes=_VMEM_LIMIT,
        ),
    )(flat.astype(jnp.float32))
    return out.reshape(shape)


# ----------------------------------------------------------------------------
# Conv / deconv lowered to Pallas matmuls (im2col / col2im glue in plain JAX)
# ----------------------------------------------------------------------------

def _im2col(x, kh, kw, stride):
    """x: (B, H, W, C) -> (B*Ho*Wo, kh*kw*C), column order (i, j, c)."""
    B, H, W, C = x.shape
    Ho = (H - kh) // stride + 1
    Wo = (W - kw) // stride + 1
    cols = []
    for i in range(kh):
        for j in range(kw):
            cols.append(x[:, i:i + stride * Ho:stride, j:j + stride * Wo:stride, :])
    cols = jnp.stack(cols, axis=3)            # (B, Ho, Wo, kh*kw, C)
    return cols.reshape(B * Ho * Wo, kh * kw * C), (B, Ho, Wo)


def conv2d(x_nhwc, w_mat, b, kh, kw, stride, act):
    """Valid-padding conv. w_mat: (kh*kw*C_in, C_out), pre-reshaped at init."""
    cols, (B, Ho, Wo) = _im2col(x_nhwc, kh, kw, stride)
    O = w_mat.shape[1]
    y = matmul_pallas(cols, w_mat, b, out_act=act)
    return y.reshape(B, Ho, Wo, O)


def conv_transpose2d(x_nhwc, w_mat, b, kh, kw, c_out, stride, in_act, out_act):
    """ConvTranspose2d (padding=0) without zero-dilation:
    dense matmul X(B*H*W, Cin) @ w_mat(Cin, kh*kw*Cout), then col2im
    overlap-add; bias added exactly once via accumulator init."""
    B, H, W, C = x_nhwc.shape
    Ho = (H - 1) * stride + kh
    Wo = (W - 1) * stride + kw
    x2d = x_nhwc.reshape(B * H * W, C)
    y = matmul_pallas(x2d, w_mat, b=None, in_act=in_act)     # (B*H*W, kh*kw*Cout)
    y = y.reshape(B, H, W, kh, kw, c_out)

    out = jnp.zeros((B, Ho, Wo, c_out), jnp.float32) + b.reshape(1, 1, 1, c_out)
    for i in range(kh):
        for j in range(kw):
            out = out.at[:, i:i + stride * H:stride,
                         j:j + stride * W:stride, :].add(y[:, :, :, i, j, :])
    if out_act is not None:
        out = apply_act_lane_dense(out, out_act)
    return out


# ----------------------------------------------------------------------------
# Parameters (deterministic init in PyTorch layout, pre-transposed once)
# ----------------------------------------------------------------------------

def init_params(key, num_latent):
    def uni(k, shape, fan_in):
        bound = 1.0 / (fan_in ** 0.5)
        return jax.random.uniform(k, shape, jnp.float32, -bound, bound)

    ks = jax.random.split(key, 18)
    raw = {}
    # encoder convs (O, I, kh, kw)
    raw["enc1_w"] = uni(ks[0], (16, 3, 6, 6), 3 * 6 * 6)
    raw["enc1_b"] = uni(ks[1], (16,), 3 * 6 * 6)
    raw["enc2_w"] = uni(ks[2], (32, 16, 4, 4), 16 * 4 * 4)
    raw["enc2_b"] = uni(ks[3], (32,), 16 * 4 * 4)
    raw["enc3_w"] = uni(ks[4], (64, 32, 4, 4), 32 * 4 * 4)
    raw["enc3_b"] = uni(ks[5], (64,), 32 * 4 * 4)
    # latent linears (out, in)
    raw["zm_w"] = uni(ks[6], (num_latent, 1024), 1024)
    raw["zm_b"] = uni(ks[7], (num_latent,), 1024)
    raw["zl_w"] = uni(ks[8], (num_latent, 1024), 1024)
    raw["zl_b"] = uni(ks[9], (num_latent,), 1024)
    # decoder linear (out, in)
    raw["dec_lin_w"] = uni(ks[10], (1024, num_latent), num_latent)
    raw["dec_lin_b"] = uni(ks[11], (1024,), num_latent)
    # decoder deconvs (I, O, kh, kw)
    raw["dec1_w"] = uni(ks[12], (64, 32, 4, 4), 64 * 4 * 4)
    raw["dec1_b"] = uni(ks[13], (32,), 64 * 4 * 4)
    raw["dec2_w"] = uni(ks[14], (32, 16, 4, 4), 32 * 4 * 4)
    raw["dec2_b"] = uni(ks[15], (16,), 32 * 4 * 4)
    raw["dec3_w"] = uni(ks[16], (16, 3, 6, 6), 16 * 6 * 6)
    raw["dec3_b"] = uni(ks[17], (3,), 16 * 6 * 6)
    return raw


def prepare_params(raw):
    """One-time layout conversion (outside jit): conv (O,I,kh,kw) -> im2col
    matrix (kh*kw*I, O); deconv (I,O,kh,kw) -> (I, kh*kw*O); linears -> (in, out)."""
    p = {}

    def conv_mat(w):      # (O, I, kh, kw) -> (kh*kw*I, O)
        O, I, kh, kw = w.shape
        return jnp.transpose(w, (2, 3, 1, 0)).reshape(kh * kw * I, O)

    def deconv_mat(w):    # (I, O, kh, kw) -> (I, kh*kw*O)
        I, O, kh, kw = w.shape
        return jnp.transpose(w, (0, 2, 3, 1)).reshape(I, kh * kw * O)

    p["enc1_w"] = conv_mat(raw["enc1_w"]); p["enc1_b"] = raw["enc1_b"]
    p["enc2_w"] = conv_mat(raw["enc2_w"]); p["enc2_b"] = raw["enc2_b"]
    p["enc3_w"] = conv_mat(raw["enc3_w"]); p["enc3_b"] = raw["enc3_b"]
    p["zm_w"] = raw["zm_w"].T;             p["zm_b"] = raw["zm_b"]
    p["zl_w"] = raw["zl_w"].T;             p["zl_b"] = raw["zl_b"]
    p["dec_lin_w"] = raw["dec_lin_w"].T;   p["dec_lin_b"] = raw["dec_lin_b"]
    p["dec1_w"] = deconv_mat(raw["dec1_w"]); p["dec1_b"] = raw["dec1_b"]
    p["dec2_w"] = deconv_mat(raw["dec2_w"]); p["dec2_b"] = raw["dec2_b"]
    p["dec3_w"] = deconv_mat(raw["dec3_w"]); p["dec3_b"] = raw["dec3_b"]
    return p


# ----------------------------------------------------------------------------
# Forward pass (matches ConditionalVariationalAutoencoder.forward)
# ----------------------------------------------------------------------------

def cvae_forward(params, x_nchw, eps):
    # ---- encoder ----
    x = jnp.transpose(x_nchw, (0, 2, 3, 1))                                 # NHWC
    x = conv2d(x, params["enc1_w"], params["enc1_b"], 6, 6, 2, "leaky")     # (B,22,22,16)
    x = conv2d(x, params["enc2_w"], params["enc2_b"], 4, 4, 2, "leaky")     # (B,10,10,32)
    x = conv2d(x, params["enc3_w"], params["enc3_b"], 4, 4, 2, "leaky")     # (B, 4, 4,64)
    B = x.shape[0]
    # torch: x.view(-1, 64*4*4) flattens in NCHW order (C, H, W)
    flat = jnp.transpose(x, (0, 3, 1, 2)).reshape(B, 64 * 4 * 4)

    # ---- fused latent path: z_mean, z_log_var, reparameterize, dec_linear ----
    z_mean, z_log_var, encoded, h = latent_block(
        flat, params["zm_w"], params["zm_b"], params["zl_w"], params["zl_b"],
        eps, params["dec_lin_w"], params["dec_lin_b"])

    # ---- decoder ----
    h = h.reshape(-1, 64, 2, 2)            # torch view quirk: batch expands x4
    h = jnp.transpose(h, (0, 2, 3, 1))     # NHWC
    # activations of deconv1/deconv2 are folded into the next matmul's input.
    h = conv_transpose2d(h, params["dec1_w"], params["dec1_b"], 4, 4, 32, 2,
                         in_act="none", out_act=None)            # (4B, 6, 6,32)
    h = conv_transpose2d(h, params["dec2_w"], params["dec2_b"], 4, 4, 16, 2,
                         in_act="leaky", out_act=None)           # (4B,14,14,16)
    h = conv_transpose2d(h, params["dec3_w"], params["dec3_b"], 6, 6, 3, 2,
                         in_act="leaky", out_act="leaky_sigmoid")  # (4B,32,32,3)
    decoded = jnp.transpose(h, (0, 3, 1, 2))                      # back to NCHW
    return decoded, z_mean, z_log_var, encoded


# ----------------------------------------------------------------------------
# Main
# ----------------------------------------------------------------------------

if __name__ == "__main__":
    num_latent = 16
    batch = 2

    key = jax.random.PRNGKey(0)
    k_param, k_x, k_eps = jax.random.split(key, 3)

    params = prepare_params(init_params(k_param, num_latent))
    # Input spatial size 48 -> 22 -> 10 -> 4, so the 64*4*4 flatten is exact.
    x = jax.random.uniform(k_x, (batch, 3, 48, 48), jnp.float32)
    eps = jax.random.normal(k_eps, (batch, num_latent), jnp.float32)

    fwd = jax.jit(cvae_forward)
    decoded, z_mean, z_log_var, encoded = fwd(params, x, eps)
    jax.block_until_ready((decoded, z_mean, z_log_var, encoded))

    assert decoded.shape == (4 * batch, 3, 32, 32), decoded.shape
    assert z_mean.shape == (batch, num_latent)
    assert z_log_var.shape == (batch, num_latent)
    assert encoded.shape == (batch, num_latent)
    assert bool(jnp.all(jnp.isfinite(decoded)))
    print("KERNEL_OK")
</pallas_src>

<mosaic_0001>
module attributes {stable_mosaic.version = 11 : i64} {
  func.func @_mm_kernel(%arg0: i32, %arg1: memref<88x108xf32, #tpu.memory_space<vmem>>, %arg2: memref<108x16xf32, #tpu.memory_space<vmem>>, %arg3: memref<1x16xf32, #tpu.memory_space<vmem>>, %arg4: memref<88x16xf32, #tpu.memory_space<vmem>>) attributes {dimension_semantics = [#tpu.dimension_semantics<parallel>], iteration_bounds = array<i64: 11>, scalar_prefetch = 0 : i64, scratch_operands = 0 : i64, tpu.core_type = #tpu.core_type<tc>, window_params = [{transform_indices = @transform_0, window_bounds = array<i64: 88, 108>}, {pipeline_mode = #tpu.pipeline_mode<synchronous>, transform_indices = @transform_1, window_bounds = array<i64: 108, 16>}, {pipeline_mode = #tpu.pipeline_mode<synchronous>, transform_indices = @transform_2, window_bounds = array<i64: 1, 16>}, {transform_indices = @transform_3, window_bounds = array<i64: 88, 16>}]} {
    %c0 = arith.constant 0 : index
    %c0_0 = arith.constant 0 : index
    %0 = vector.load %arg1[%c0, %c0_0] : memref<88x108xf32, #tpu.memory_space<vmem>>, vector<88x108xf32>
    %c0_1 = arith.constant 0 : index
    %c0_2 = arith.constant 0 : index
    %1 = vector.load %arg2[%c0_1, %c0_2] : memref<108x16xf32, #tpu.memory_space<vmem>>, vector<108x16xf32>
    %cst = arith.constant dense<0.000000e+00> : vector<88x16xf32>
    %2 = tpu.matmul %0, %1, %cst {dimension_numbers = #tpu.dot_dimension_numbers<[1], [0], [0], [1], [0, 0, 1, 1], [], []>} : vector<88x108xf32>, vector<108x16xf32>, vector<88x16xf32> -> vector<88x16xf32>
    %c0_3 = arith.constant 0 : index
    %c0_4 = arith.constant 0 : index
    %3 = vector.load %arg3[%c0_3, %c0_4] : memref<1x16xf32, #tpu.memory_space<vmem>>, vector<1x16xf32>
    %4 = vector.broadcast %3 : vector<1x16xf32> to vector<88x16xf32>
    %5 = arith.addf %2, %4 : vector<88x16xf32>
    %cst_5 = arith.constant 0.000000e+00 : f32
    %6 = vector.broadcast %cst_5 : f32 to vector<88x16xf32>
    %7 = arith.cmpf oge, %5, %6 : vector<88x16xf32>
    %cst_6 = arith.constant 0.00999999977 : f32
    %8 = vector.broadcast %cst_6 : f32 to vector<88x16xf32>
    %9 = arith.mulf %8, %5 : vector<88x16xf32>
    %10 = arith.select %7, %5, %9 : vector<88x16xi1>, vector<88x16xf32>
    %c0_7 = arith.constant 0 : index
    %c0_8 = arith.constant 0 : index
    %11 = vector.load %arg4[%c0_7, %c0_8] : memref<88x16xf32, #tpu.memory_space<vmem>>, vector<88x16xf32>
    tpu.vector_store %arg4[%c0_7, %c0_8], %10 {strides = array<i32>} : memref<88x16xf32, #tpu.memory_space<vmem>>, vector<88x16xf32>,
    return
  }
  func.func @transform_0(%arg0: i32) -> (i32, i32) {
    %c0_i32 = arith.constant 0 : i32
    %c0_i32_0 = arith.constant 0 : i32
    return %arg0, %c0_i32 : i32, i32
  }
  func.func @transform_1(%arg0: i32) -> (i32, i32) {
    %c0_i32 = arith.constant 0 : i32
    %c0_i32_0 = arith.constant 0 : i32
    %c0_i32_1 = arith.constant 0 : i32
    return %c0_i32, %c0_i32_0 : i32, i32
  }
  func.func @transform_2(%arg0: i32) -> (i32, i32) {
    %c0_i32 = arith.constant 0 : i32
    %c0_i32_0 = arith.constant 0 : i32
    %c0_i32_1 = arith.constant 0 : i32
    return %c0_i32, %c0_i32_0 : i32, i32
  }
  func.func @transform_3(%arg0: i32) -> (i32, i32) {
    %c0_i32 = arith.constant 0 : i32
    %c0_i32_0 = arith.constant 0 : i32
    return %arg0, %c0_i32 : i32, i32
  }
}

module attributes {stable_mosaic.version = 11 : i64} {
  func.func @_mm_kernel(%arg0: i32, %arg1: memref<40x256xf32, #tpu.memory_space<vmem>>, %arg2: memref<256x32xf32, #tpu.memory_space<vmem>>, %arg3: memref<1x32xf32, #tpu.memory_space<vmem>>, %arg4: memref<40x32xf32, #tpu.memory_space<vmem>>) attributes {dimension_semantics = [#tpu.dimension_semantics<parallel>], iteration_bounds = array<i64: 5>, scalar_prefetch = 0 : i64, scratch_operands = 0 : i64, tpu.core_type = #tpu.core_type<tc>, window_params = [{transform_indices = @transform_0, window_bounds = array<i64: 40, 256>}, {pipeline_mode = #tpu.pipeline_mode<synchronous>, transform_indices = @transform_1, window_bounds = array<i64: 256, 32>}, {pipeline_mode = #tpu.pipeline_mode<synchronous>, transform_indices = @transform_2, window_bounds = array<i64: 1, 32>}, {transform_indices = @transform_3, window_bounds = array<i64: 40, 32>}]} {
    %c0 = arith.constant 0 : index
    %c0_0 = arith.constant 0 : index
    %0 = vector.load %arg1[%c0, %c0_0] : memref<40x256xf32, #tpu.memory_space<vmem>>, vector<40x256xf32>
    %c0_1 = arith.constant 0 : index
    %c0_2 = arith.constant 0 : index
    %1 = vector.load %arg2[%c0_1, %c0_2] : memref<256x32xf32, #tpu.memory_space<vmem>>, vector<256x32xf32>
    %cst = arith.constant dense<0.000000e+00> : vector<40x32xf32>
    %2 = tpu.matmul %0, %1, %cst {dimension_numbers = #tpu.dot_dimension_numbers<[1], [0], [0], [1], [0, 0, 1, 1], [], []>} : vector<40x256xf32>, vector<256x32xf32>, vector<40x32xf32> -> vector<40x32xf32>
    %c0_3 = arith.constant 0 : index
    %c0_4 = arith.constant 0 : index
    %3 = vector.load %arg3[%c0_3, %c0_4] : memref<1x32xf32, #tpu.memory_space<vmem>>, vector<1x32xf32>
    %4 = vector.broadcast %3 : vector<1x32xf32> to vector<40x32xf32>
    %5 = arith.addf %2, %4 : vector<40x32xf32>
    %cst_5 = arith.constant 0.000000e+00 : f32
    %6 = vector.broadcast %cst_5 : f32 to vector<40x32xf32>
    %7 = arith.cmpf oge, %5, %6 : vector<40x32xf32>
    %cst_6 = arith.constant 0.00999999977 : f32
    %8 = vector.broadcast %cst_6 : f32 to vector<40x32xf32>
    %9 = arith.mulf %8, %5 : vector<40x32xf32>
    %10 = arith.select %7, %5, %9 : vector<40x32xi1>, vector<40x32xf32>
    %c0_7 = arith.constant 0 : index
    %c0_8 = arith.constant 0 : index
    %11 = vector.load %arg4[%c0_7, %c0_8] : memref<40x32xf32, #tpu.memory_space<vmem>>, vector<40x32xf32>
    tpu.vector_store %arg4[%c0_7, %c0_8], %10 {strides = array<i32>} : memref<40x32xf32, #tpu.memory_space<vmem>>, vector<40x32xf32>,
    return
  }
  func.func @transform_0(%arg0: i32) -> (i32, i32) {
    %c0_i32 = arith.constant 0 : i32
    %c0_i32_0 = arith.constant 0 : i32
    return %arg0, %c0_i32 : i32, i32
  }
  func.func @transform_1(%arg0: i32) -> (i32, i32) {
    %c0_i32 = arith.constant 0 : i32
    %c0_i32_0 = arith.constant 0 : i32
    %c0_i32_1 = arith.constant 0 : i32
    return %c0_i32, %c0_i32_0 : i32, i32
  }
  func.func @transform_2(%arg0: i32) -> (i32, i32) {
    %c0_i32 = arith.constant 0 : i32
    %c0_i32_0 = arith.constant 0 : i32
    %c0_i32_1 = arith.constant 0 : i32
    return %c0_i32, %c0_i32_0 : i32, i32
  }
  func.func @transform_3(%arg0: i32) -> (i32, i32) {
    %c0_i32 = arith.constant 0 : i32
    %c0_i32_0 = arith.constant 0 : i32
    return %arg0, %c0_i32 : i32, i32
  }
}

module attributes {stable_mosaic.version = 11 : i64} {
  func.func @_mm_kernel(%arg0: i32, %arg1: memref<16x512xf32, #tpu.memory_space<vmem>>, %arg2: memref<512x64xf32, #tpu.memory_space<vmem>>, %arg3: memref<1x64xf32, #tpu.memory_space<vmem>>, %arg4: memref<16x64xf32, #tpu.memory_space<vmem>>) attributes {dimension_semantics = [#tpu.dimension_semantics<parallel>], iteration_bounds = array<i64: 2>, scalar_prefetch = 0 : i64, scratch_operands = 0 : i64, tpu.core_type = #tpu.core_type<tc>, window_params = [{transform_indices = @transform_0, window_bounds = array<i64: 16, 512>}, {pipeline_mode = #tpu.pipeline_mode<synchronous>, transform_indices = @transform_1, window_bounds = array<i64: 512, 64>}, {pipeline_mode = #tpu.pipeline_mode<synchronous>, transform_indices = @transform_2, window_bounds = array<i64: 1, 64>}, {transform_indices = @transform_3, window_bounds = array<i64: 16, 64>}]} {
    %c0 = arith.constant 0 : index
    %c0_0 = arith.constant 0 : index
    %0 = vector.load %arg1[%c0, %c0_0] : memref<16x512xf32, #tpu.memory_space<vmem>>, vector<16x512xf32>
    %c0_1 = arith.constant 0 : index
    %c0_2 = arith.constant 0 : index
    %1 = vector.load %arg2[%c0_1, %c0_2] : memref<512x64xf32, #tpu.memory_space<vmem>>, vector<512x64xf32>
    %cst = arith.constant dense<0.000000e+00> : vector<16x64xf32>
    %2 = tpu.matmul %0, %1, %cst {dimension_numbers = #tpu.dot_dimension_numbers<[1], [0], [0], [1], [0, 0, 1, 1], [], []>} : vector<16x512xf32>, vector<512x64xf32>, vector<16x64xf32> -> vector<16x64xf32>
    %c0_3 = arith.constant 0 : index
    %c0_4 = arith.constant 0 : index
    %3 = vector.load %arg3[%c0_3, %c0_4] : memref<1x64xf32, #tpu.memory_space<vmem>>, vector<1x64xf32>
    %4 = vector.broadcast %3 : vector<1x64xf32> to vector<16x64xf32>
    %5 = arith.addf %2, %4 : vector<16x64xf32>
    %cst_5 = arith.constant 0.000000e+00 : f32
    %6 = vector.broadcast %cst_5 : f32 to vector<16x64xf32>
    %7 = arith.cmpf oge, %5, %6 : vector<16x64xf32>
    %cst_6 = arith.constant 0.00999999977 : f32
    %8 = vector.broadcast %cst_6 : f32 to vector<16x64xf32>
    %9 = arith.mulf %8, %5 : vector<16x64xf32>
    %10 = arith.select %7, %5, %9 : vector<16x64xi1>, vector<16x64xf32>
    %c0_7 = arith.constant 0 : index
    %c0_8 = arith.constant 0 : index
    %11 = vector.load %arg4[%c0_7, %c0_8] : memref<16x64xf32, #tpu.memory_space<vmem>>, vector<16x64xf32>
    tpu.vector_store %arg4[%c0_7, %c0_8], %10 {strides = array<i32>} : memref<16x64xf32, #tpu.memory_space<vmem>>, vector<16x64xf32>,
    return
  }
  func.func @transform_0(%arg0: i32) -> (i32, i32) {
    %c0_i32 = arith.constant 0 : i32
    %c0_i32_0 = arith.constant 0 : i32
    return %arg0, %c0_i32 : i32, i32
  }
  func.func @transform_1(%arg0: i32) -> (i32, i32) {
    %c0_i32 = arith.constant 0 : i32
    %c0_i32_0 = arith.constant 0 : i32
    %c0_i32_1 = arith.constant 0 : i32
    return %c0_i32, %c0_i32_0 : i32, i32
  }
  func.func @transform_2(%arg0: i32) -> (i32, i32) {
    %c0_i32 = arith.constant 0 : i32
    %c0_i32_0 = arith.constant 0 : i32
    %c0_i32_1 = arith.constant 0 : i32
    return %c0_i32, %c0_i32_0 : i32, i32
  }
  func.func @transform_3(%arg0: i32) -> (i32, i32) {
    %c0_i32 = arith.constant 0 : i32
    %c0_i32_0 = arith.constant 0 : i32
    return %arg0, %c0_i32 : i32, i32
  }
}

module attributes {stable_mosaic.version = 11 : i64} {
  func.func @_latent_kernel(%arg0: memref<2x1024xf32, #tpu.memory_space<vmem>>, %arg1: memref<1024x16xf32, #tpu.memory_space<vmem>>, %arg2: memref<1x16xf32, #tpu.memory_space<vmem>>, %arg3: memref<1024x16xf32, #tpu.memory_space<vmem>>, %arg4: memref<1x16xf32, #tpu.memory_space<vmem>>, %arg5: memref<2x16xf32, #tpu.memory_space<vmem>>, %arg6: memref<16x1024xf32, #tpu.memory_space<vmem>>, %arg7: memref<1x1024xf32, #tpu.memory_space<vmem>>, %arg8: memref<2x16xf32, #tpu.memory_space<vmem>>, %arg9: memref<2x16xf32, #tpu.memory_space<vmem>>, %arg10: memref<2x16xf32, #tpu.memory_space<vmem>>, %arg11: memref<2x1024xf32, #tpu.memory_space<vmem>>) attributes {dimension_semantics = [], scalar_prefetch = 0 : i64, scratch_operands = 0 : i64, tpu.core_type = #tpu.core_type<tc>} {
    %c0 = arith.constant 0 : index
    %c0_0 = arith.constant 0 : index
    %0 = vector.load %arg0[%c0, %c0_0] : memref<2x1024xf32, #tpu.memory_space<vmem>>, vector<2x1024xf32>
    %c0_1 = arith.constant 0 : index
    %c0_2 = arith.constant 0 : index
    %1 = vector.load %arg1[%c0_1, %c0_2] : memref<1024x16xf32, #tpu.memory_space<vmem>>, vector<1024x16xf32>
    %cst = arith.constant dense<0.000000e+00> : vector<2x16xf32>
    %2 = tpu.matmul %0, %1, %cst {dimension_numbers = #tpu.dot_dimension_numbers<[1], [0], [0], [1], [0, 0, 1, 1], [], []>} : vector<2x1024xf32>, vector<1024x16xf32>, vector<2x16xf32> -> vector<2x16xf32>
    %c0_3 = arith.constant 0 : index
    %c0_4 = arith.constant 0 : index
    %3 = vector.load %arg2[%c0_3, %c0_4] : memref<1x16xf32, #tpu.memory_space<vmem>>, vector<1x16xf32>
    %4 = vector.broadcast %3 : vector<1x16xf32> to vector<2x16xf32>
    %5 = arith.addf %2, %4 : vector<2x16xf32>
    %c0_5 = arith.constant 0 : index
    %c0_6 = arith.constant 0 : index
    %6 = vector.load %arg3[%c0_5, %c0_6] : memref<1024x16xf32, #tpu.memory_space<vmem>>, vector<1024x16xf32>
    %cst_7 = arith.constant dense<0.000000e+00> : vector<2x16xf32>
    %7 = tpu.matmul %0, %6, %cst_7 {dimension_numbers = #tpu.dot_dimension_numbers<[1], [0], [0], [1], [0, 0, 1, 1], [], []>} : vector<2x1024xf32>, vector<1024x16xf32>, vector<2x16xf32> -> vector<2x16xf32>
    %c0_8 = arith.constant 0 : index
    %c0_9 = arith.constant 0 : index
    %8 = vector.load %arg4[%c0_8, %c0_9] : memref<1x16xf32, #tpu.memory_space<vmem>>, vector<1x16xf32>
    %9 = vector.broadcast %8 : vector<1x16xf32> to vector<2x16xf32>
    %10 = arith.addf %7, %9 : vector<2x16xf32>
    %c0_10 = arith.constant 0 : index
    %c0_11 = arith.constant 0 : index
    %11 = vector.load %arg5[%c0_10, %c0_11] : memref<2x16xf32, #tpu.memory_space<vmem>>, vector<2x16xf32>
    %cst_12 = arith.constant 5.000000e-01 : f32
    %12 = vector.broadcast %cst_12 : f32 to vector<2x16xf32>
    %13 = arith.mulf %10, %12 : vector<2x16xf32>
    %14 = math.exp %13 : vector<2x16xf32>
    %15 = arith.mulf %11, %14 : vector<2x16xf32>
    %16 = arith.addf %5, %15 : vector<2x16xf32>
    %c0_13 = arith.constant 0 : index
    %c0_14 = arith.constant 0 : index
    %17 = vector.load %arg6[%c0_13, %c0_14] : memref<16x1024xf32, #tpu.memory_space<vmem>>, vector<16x1024xf32>
    %cst_15 = arith.constant dense<0.000000e+00> : vector<2x1024xf32>
    %18 = tpu.matmul %16, %17, %cst_15 {dimension_numbers = #tpu.dot_dimension_numbers<[1], [0], [0], [1], [0, 0, 1, 1], [], []>} : vector<2x16xf32>, vector<16x1024xf32>, vector<2x1024xf32> -> vector<2x1024xf32>
    %c0_16 = arith.constant 0 : index
    %c0_17 = arith.constant 0 : index
    %19 = vector.load %arg7[%c0_16, %c0_17] : memref<1x1024xf32, #tpu.memory_space<vmem>>, vector<1x1024xf32>
    %20 = vector.broadcast %19 : vector<1x1024xf32> to vector<2x1024xf32>
    %21 = arith.addf %18, %20 : vector<2x1024xf32>
    %c0_18 = arith.constant 0 : index
    %c0_19 = arith.constant 0 : index
    %22 = vector.load %arg8[%c0_18, %c0_19] : memref<2x16xf32, #tpu.memory_space<vmem>>, vector<2x16xf32>
    tpu.vector_store %arg8[%c0_18, %c0_19], %5 {strides = array<i32>} : memref<2x16xf32, #tpu.memory_space<vmem>>, vector<2x16xf32>,
    %c0_20 = arith.constant 0 : index
    %c0_21 = arith.constant 0 : index
    %23 = vector.load %arg9[%c0_20, %c0_21] : memref<2x16xf32, #tpu.memory_space<vmem>>, vector<2x16xf32>
    tpu.vector_store %arg9[%c0_20, %c0_21], %10 {strides = array<i32>} : memref<2x16xf32, #tpu.memory_space<vmem>>, vector<2x16xf32>,
    %c0_22 = arith.constant 0 : index
    %c0_23 = arith.constant 0 : index
    %24 = vector.load %arg10[%c0_22, %c0_23] : memref<2x16xf32, #tpu.memory_space<vmem>>, vector<2x16xf32>
    tpu.vector_store %arg10[%c0_22, %c0_23], %16 {strides = array<i32>} : memref<2x16xf32, #tpu.memory_space<vmem>>, vector<2x16xf32>,
    %c0_24 = arith.constant 0 : index
    %c0_25 = arith.constant 0 : index
    %25 = vector.load %arg11[%c0_24, %c0_25] : memref<2x1024xf32, #tpu.memory_space<vmem>>, vector<2x1024xf32>
    tpu.vector_store %arg11[%c0_24, %c0_25], %21 {strides = array<i32>} : memref<2x1024xf32, #tpu.memory_space<vmem>>, vector<2x1024xf32>,
    return
  }
}

module attributes {stable_mosaic.version = 11 : i64} {
  func.func @_mm_kernel(%arg0: i32, %arg1: memref<16x64xf32, #tpu.memory_space<vmem>>, %arg2: memref<64x512xf32, #tpu.memory_space<vmem>>, %arg3: memref<16x512xf32, #tpu.memory_space<vmem>>) attributes {dimension_semantics = [#tpu.dimension_semantics<parallel>], iteration_bounds = array<i64: 2>, scalar_prefetch = 0 : i64, scratch_operands = 0 : i64, tpu.core_type = #tpu.core_type<tc>, window_params = [{transform_indices = @transform_0, window_bounds = array<i64: 16, 64>}, {pipeline_mode = #tpu.pipeline_mode<synchronous>, transform_indices = @transform_1, window_bounds = array<i64: 64, 512>}, {transform_indices = @transform_2, window_bounds = array<i64: 16, 512>}]} {
    %c0 = arith.constant 0 : index
    %c0_0 = arith.constant 0 : index
    %0 = vector.load %arg1[%c0, %c0_0] : memref<16x64xf32, #tpu.memory_space<vmem>>, vector<16x64xf32>
    %c0_1 = arith.constant 0 : index
    %c0_2 = arith.constant 0 : index
    %1 = vector.load %arg2[%c0_1, %c0_2] : memref<64x512xf32, #tpu.memory_space<vmem>>, vector<64x512xf32>
    %cst = arith.constant dense<0.000000e+00> : vector<16x512xf32>
    %2 = tpu.matmul %0, %1, %cst {dimension_numbers = #tpu.dot_dimension_numbers<[1], [0], [0], [1], [0, 0, 1, 1], [], []>} : vector<16x64xf32>, vector<64x512xf32>, vector<16x512xf32> -> vector<16x512xf32>
    %c0_3 = arith.constant 0 : index
    %c0_4 = arith.constant 0 : index
    %3 = vector.load %arg3[%c0_3, %c0_4] : memref<16x512xf32, #tpu.memory_space<vmem>>, vector<16x512xf32>
    tpu.vector_store %arg3[%c0_3, %c0_4], %2 {strides = array<i32>} : memref<16x512xf32, #tpu.memory_space<vmem>>, vector<16x512xf32>,
    return
  }
  func.func @transform_0(%arg0: i32) -> (i32, i32) {
    %c0_i32 = arith.constant 0 : i32
    %c0_i32_0 = arith.constant 0 : i32
    return %arg0, %c0_i32 : i32, i32
  }
  func.func @transform_1(%arg0: i32) -> (i32, i32) {
    %c0_i32 = arith.constant 0 : i32
    %c0_i32_0 = arith.constant 0 : i32
    %c0_i32_1 = arith.constant 0 : i32
    return %c0_i32, %c0_i32_0 : i32, i32
  }
  func.func @transform_2(%arg0: i32) -> (i32, i32) {
    %c0_i32 = arith.constant 0 : i32
    %c0_i32_0 = arith.constant 0 : i32
    return %arg0, %c0_i32 : i32, i32
  }
}

module attributes {stable_mosaic.version = 11 : i64} {
  func.func @_mm_kernel(%arg0: i32, %arg1: memref<96x32xf32, #tpu.memory_space<vmem>>, %arg2: memref<32x256xf32, #tpu.memory_space<vmem>>, %arg3: memref<96x256xf32, #tpu.memory_space<vmem>>) attributes {dimension_semantics = [#tpu.dimension_semantics<parallel>], iteration_bounds = array<i64: 3>, scalar_prefetch = 0 : i64, scratch_operands = 0 : i64, tpu.core_type = #tpu.core_type<tc>, window_params = [{transform_indices = @transform_0, window_bounds = array<i64: 96, 32>}, {pipeline_mode = #tpu.pipeline_mode<synchronous>, transform_indices = @transform_1, window_bounds = array<i64: 32, 256>}, {transform_indices = @transform_2, window_bounds = array<i64: 96, 256>}]} {
    %c0 = arith.constant 0 : index
    %c0_0 = arith.constant 0 : index
    %0 = vector.load %arg1[%c0, %c0_0] : memref<96x32xf32, #tpu.memory_space<vmem>>, vector<96x32xf32>
    %cst = arith.constant 0.000000e+00 : f32
    %1 = vector.broadcast %cst : f32 to vector<96x32xf32>
    %2 = arith.cmpf oge, %0, %1 : vector<96x32xf32>
    %cst_1 = arith.constant 0.00999999977 : f32
    %3 = vector.broadcast %cst_1 : f32 to vector<96x32xf32>
    %4 = arith.mulf %3, %0 : vector<96x32xf32>
    %5 = arith.select %2, %0, %4 : vector<96x32xi1>, vector<96x32xf32>
    %c0_2 = arith.constant 0 : index
    %c0_3 = arith.constant 0 : index
    %6 = vector.load %arg2[%c0_2, %c0_3] : memref<32x256xf32, #tpu.memory_space<vmem>>, vector<32x256xf32>
    %cst_4 = arith.constant dense<0.000000e+00> : vector<96x256xf32>
    %7 = tpu.matmul %5, %6, %cst_4 {dimension_numbers = #tpu.dot_dimension_numbers<[1], [0], [0], [1], [0, 0, 1, 1], [], []>} : vector<96x32xf32>, vector<32x256xf32>, vector<96x256xf32> -> vector<96x256xf32>
    %c0_5 = arith.constant 0 : index
    %c0_6 = arith.constant 0 : index
    %8 = vector.load %arg3[%c0_5, %c0_6] : memref<96x256xf32, #tpu.memory_space<vmem>>, vector<96x256xf32>
    tpu.vector_store %arg3[%c0_5, %c0_6], %7 {strides = array<i32>} : memref<96x256xf32, #tpu.memory_space<vmem>>, vector<96x256xf32>,
    return
  }
  func.func @transform_0(%arg0: i32) -> (i32, i32) {
    %c0_i32 = arith.constant 0 : i32
    %c0_i32_0 = arith.constant 0 : i32
    return %arg0, %c0_i32 : i32, i32
  }
  func.func @transform_1(%arg0: i32) -> (i32, i32) {
    %c0_i32 = arith.constant 0 : i32
    %c0_i32_0 = arith.constant 0 : i32
    %c0_i32_1 = arith.constant 0 : i32
    return %c0_i32, %c0_i32_0 : i32, i32
  }
  func.func @transform_2(%arg0: i32) -> (i32, i32) {
    %c0_i32 = arith.constant 0 : i32
    %c0_i32_0 = arith.constant 0 : i32
    return %arg0, %c0_i32 : i32, i32
  }
}

module attributes {stable_mosaic.version = 11 : i64} {
  func.func @_mm_kernel(%arg0: i32, %arg1: memref<112x16xf32, #tpu.memory_space<vmem>>, %arg2: memref<16x108xf32, #tpu.memory_space<vmem>>, %arg3: memref<112x108xf32, #tpu.memory_space<vmem>>) attributes {dimension_semantics = [#tpu.dimension_semantics<parallel>], iteration_bounds = array<i64: 14>, scalar_prefetch = 0 : i64, scratch_operands = 0 : i64, tpu.core_type = #tpu.core_type<tc>, window_params = [{transform_indices = @transform_0, window_bounds = array<i64: 112, 16>}, {pipeline_mode = #tpu.pipeline_mode<synchronous>, transform_indices = @transform_1, window_bounds = array<i64: 16, 108>}, {transform_indices = @transform_2, window_bounds = array<i64: 112, 108>}]} {
    %c0 = arith.constant 0 : index
    %c0_0 = arith.constant 0 : index
    %0 = vector.load %arg1[%c0, %c0_0] : memref<112x16xf32, #tpu.memory_space<vmem>>, vector<112x16xf32>
    %cst = arith.constant 0.000000e+00 : f32
    %1 = vector.broadcast %cst : f32 to vector<112x16xf32>
    %2 = arith.cmpf oge, %0, %1 : vector<112x16xf32>
    %cst_1 = arith.constant 0.00999999977 : f32
    %3 = vector.broadcast %cst_1 : f32 to vector<112x16xf32>
    %4 = arith.mulf %3, %0 : vector<112x16xf32>
    %5 = arith.select %2, %0, %4 : vector<112x16xi1>, vector<112x16xf32>
    %c0_2 = arith.constant 0 : index
    %c0_3 = arith.constant 0 : index
    %6 = vector.load %arg2[%c0_2, %c0_3] : memref<16x108xf32, #tpu.memory_space<vmem>>, vector<16x108xf32>
    %cst_4 = arith.constant dense<0.000000e+00> : vector<112x108xf32>
    %7 = tpu.matmul %5, %6, %cst_4 {dimension_numbers = #tpu.dot_dimension_numbers<[1], [0], [0], [1], [0, 0, 1, 1], [], []>} : vector<112x16xf32>, vector<16x108xf32>, vector<112x108xf32> -> vector<112x108xf32>
    %c0_5 = arith.constant 0 : index
    %c0_6 = arith.constant 0 : index
    %8 = vector.load %arg3[%c0_5, %c0_6] : memref<112x108xf32, #tpu.memory_space<vmem>>, vector<112x108xf32>
    tpu.vector_store %arg3[%c0_5, %c0_6], %7 {strides = array<i32>} : memref<112x108xf32, #tpu.memory_space<vmem>>, vector<112x108xf32>,
    return
  }
  func.func @transform_0(%arg0: i32) -> (i32, i32) {
    %c0_i32 = arith.constant 0 : i32
    %c0_i32_0 = arith.constant 0 : i32
    return %arg0, %c0_i32 : i32, i32
  }
  func.func @transform_1(%arg0: i32) -> (i32, i32) {
    %c0_i32 = arith.constant 0 : i32
    %c0_i32_0 = arith.constant 0 : i32
    %c0_i32_1 = arith.constant 0 : i32
    return %c0_i32, %c0_i32_0 : i32, i32
  }
  func.func @transform_2(%arg0: i32) -> (i32, i32) {
    %c0_i32 = arith.constant 0 : i32
    %c0_i32_0 = arith.constant 0 : i32
    return %arg0, %c0_i32 : i32, i32
  }
}

module attributes {stable_mosaic.version = 11 : i64} {
  func.func @_act_kernel(%arg0: i32, %arg1: memref<96x128xf32, #tpu.memory_space<vmem>>, %arg2: memref<96x128xf32, #tpu.memory_space<vmem>>) attributes {dimension_semantics = [#tpu.dimension_semantics<parallel>], iteration_bounds = array<i64: 2>, scalar_prefetch = 0 : i64, scratch_operands = 0 : i64, tpu.core_type = #tpu.core_type<tc>, window_params = [{transform_indices = @transform_0, window_bounds = array<i64: 96, 128>}, {transform_indices = @transform_1, window_bounds = array<i64: 96, 128>}]} {
    %c0 = arith.constant 0 : index
    %c0_0 = arith.constant 0 : index
    %0 = vector.load %arg1[%c0, %c0_0] : memref<96x128xf32, #tpu.memory_space<vmem>>, vector<96x128xf32>
    %cst = arith.constant 0.000000e+00 : f32
    %1 = vector.broadcast %cst : f32 to vector<96x128xf32>
    %2 = arith.cmpf oge, %0, %1 : vector<96x128xf32>
    %cst_1 = arith.constant 0.00999999977 : f32
    %3 = vector.broadcast %cst_1 : f32 to vector<96x128xf32>
    %4 = arith.mulf %3, %0 : vector<96x128xf32>
    %5 = arith.select %2, %0, %4 : vector<96x128xi1>, vector<96x128xf32>
    %6 = arith.negf %5 : vector<96x128xf32>
    %7 = math.exp %6 : vector<96x128xf32>
    %cst_2 = arith.constant 1.000000e+00 : f32
    %8 = vector.broadcast %cst_2 : f32 to vector<96x128xf32>
    %9 = arith.addf %8, %7 : vector<96x128xf32>
    %10 = arith.divf %8, %9 : vector<96x128xf32>
    %c0_3 = arith.constant 0 : index
    %c0_4 = arith.constant 0 : index
    %11 = vector.load %arg2[%c0_3, %c0_4] : memref<96x128xf32, #tpu.memory_space<vmem>>, vector<96x128xf32>
    tpu.vector_store %arg2[%c0_3, %c0_4], %10 {strides = array<i32>} : memref<96x128xf32, #tpu.memory_space<vmem>>, vector<96x128xf32>,
    return
  }
  func.func @transform_0(%arg0: i32) -> (i32, i32) {
    %c0_i32 = arith.constant 0 : i32
    %c0_i32_0 = arith.constant 0 : i32
    return %arg0, %c0_i32 : i32, i32
  }
  func.func @transform_1(%arg0: i32) -> (i32, i32) {
    %c0_i32 = arith.constant 0 : i32
    %c0_i32_0 = arith.constant 0 : i32
    return %arg0, %c0_i32 : i32, i32
  }
}

</mosaic_0001>

<bundles_post_ra>
// kernel: cvae_forward.8
= control target key start
LH: loop header
LB: loop body
LE: loop exit
PB: predicated region body
PF: predicated region fallthrough
CT: control target
= control target key end

     0   :  { %s653_s12 = smov 0   ;;  %s807_s0 = inlined_call_operand.vmem [shape: f32[968,108], index: 0, kind: input, shape index: {}]   ;;  %s808_s1 = inlined_call_operand.vmem [shape: f32[108,16], index: 1, kind: input, shape index: {}]   ;;  %s809_s2 = inlined_call_operand.vmem [shape: f32[1,16], index: 2, kind: input, shape index: {}]   ;;  %s810_s3 = inlined_call_operand.vmem [shape: f32[968,16], index: 3, kind: output, shape index: {}]  }
   0x1 LB: > { %s465_s13 = sadd.s32 4294967295, %s627_s12   ;;  %p469_p0 = scmp.ge.s32.totalorder %s627_s12, 1  ;;  %s627_s12 = sphi %s653_s12, %s13_s12  }
   0x2   : > { %p138_p1 = scmp.lt.s32.totalorder %s627_s12, 12 }
   0x4   : > { %p139_p2 = pnand %p469_p0, %p138_p1 }
   0x5   : > { %v185_v0 = vld [vmem:[%s808_s1] sm:$0xff] (!%p139_p2)  ;;  %v186_v1 = vld [vmem:[%s808_s1 + $0x8] sm:$0xff] (!%p139_p2)  ;;  %v187_v2 = vld [vmem:[%s808_s1 + $0x10] sm:$0xff] (!%p139_p2)  ;;  %v629_v3 = vmov (!%p139_p2), 0.0|0.0   ;;  %vm630_vm0 = vmmov (!%p139_p2), 0   ;;  %v631_v6 = vmov (!%p139_p2), 0.0  }
   0x6   : > { %142 = sbr.rel (%p139_p2) target bundleno = 273 (0x111), region = 32  ;;  %573 = vmatprep.subr.bf16.mxu0 (!%p139_p2), %v629_v3  ;;  %v574_v4 = vpack.c.bf16 (!%p139_p2), %v186_v1, %v185_v0  ;;  %595 = vmatprep.subr.bf16.mxu1 (!%p139_p2), %v629_v3  ;;  %v188_v5 = vld [vmem:[%s808_s1 + $0x18] sm:$0xff] (!%p139_p2)  ;;  %v189_v8 = vld [vmem:[%s808_s1 + $0x20] sm:$0xff] (!%p139_p2)  ;;  %v190_v9 = vld [vmem:[%s808_s1 + $0x28] sm:$0xff] (!%p139_p2)  ;;  %vm240_vm1 = vcmask (!%p139_p2), 1043456   ;;  %vm632_vm2 = vmmov (!%p139_p2), 1  }
   0x7   : > { %540 = vmatprep.mubr.msk.f32.mxu0 (!%p139_p2), %vm630_vm0, %v631_v6  ;;  %558 = vmatprep.mubr.msk.f32.mxu1 (!%p139_p2), %vm630_vm0, %v631_v6  ;;  %v577_v7 = vpack.c.bf16 (!%p139_p2), %v188_v5, %v187_v2  ;;  %v580_v10 = vpack.c.bf16 (!%p139_p2), %v190_v9, %v189_v8  ;;  %v191_v11 = vld [vmem:[%s808_s1 + $0x30] sm:$0xff] (!%p139_p2)  ;;  %v192_v12 = vld [vmem:[%s808_s1 + $0x38] sm:$0xff] (!%p139_p2)  ;;  %s162_s30 = smul.u32 (!%p139_p2), 11, %s465_s13  ;;  %v193_v14 = vld [vmem:[%s808_s1 + $0x40] sm:$0xff] (!%p139_p2)  ;;  %vm206_vm4 = vcmask (!%p139_p2), 883712   ;;  %vm397_vm5 = vcmask (!%p139_p2), 130048  }
   0x8   : > { %575 = vmatpush3.bf16.msra.mxu0 (!%p139_p2), %v574_v4  ;;  %602 = vmatpush3.bf16.msra.mxu1 (!%p139_p2), %v574_v4  ;;  %v583_v13 = vpack.c.bf16 (!%p139_p2), %v192_v12, %v191_v11  ;;  %v194_v15 = vld [vmem:[%s808_s1 + $0x48] sm:$0xff] (!%p139_p2)  ;;  %v195_v17 = vld [vmem:[%s808_s1 + $0x50] sm:$0xff] (!%p139_p2)  ;;  %v196_v18 = vld [vmem:[%s808_s1 + $0x58] sm:$0xff] (!%p139_p2) }
   0x9   : > { %576 = vmatprep.subr.bf16.mxu0 (!%p139_p2), %v629_v3  ;;  %596 = vmatprep.subr.bf16.mxu1 (!%p139_p2), %v629_v3  ;;  %p163_p3 = scmp.lt.s32.totalorder (!%p139_p2), %s162_s30, 120  ;;  %v586_v16 = vpack.c.bf16 (!%p139_p2), %v194_v15, %v193_v14  ;;  %v589_v19 = vpack.c.bf16 (!%p139_p2), %v196_v18, %v195_v17  ;;  %v197_v20 = vld [vmem:[%s808_s1 + $0x60] sm:$0xff] (!%p139_p2)  ;;  %v198_v21 = vld [vmem:[%s808_s1 + $0x68] sm:$0xf] (!%p139_p2)  ;;  %vm593_vm3 = vmpackc.low (!%p139_p2), %vm240_vm1, %vm632_vm2 }
   0xa   : > { %v592_v22 = vpack.c.bf16 (!%p139_p2), %v198_v21, %v197_v20  ;;  %v762_v34 = vld [vmem:[%s809_s2] ss:$0 sm:$0xff] (!%p139_p2) }
   0xc   : > { %578 = vmatpush3.bf16.msra.mxu0 (!%p139_p2), %v577_v7  ;;  %603 = vmatpush3.bf16.msra.mxu1 (!%p139_p2), %v577_v7 }
   0xd   : > { %579 = vmatprep.subr.bf16.mxu0 %v629_v3  ;;  %597 = vmatprep.subr.bf16.mxu1 %v629_v3  ;;  %s812_s30 = smov (!%p163_p3, %s162_s30), 120 }
   0xe   : > { %s470_s17 = sshll.u32 %s812_s30, 3 }
   0xf   : > { %s717_s20 = scalar_lea.vmem %s807_s0, %s470_s17  ;;  %s771_s25 = scalar_lea.vmem %s810_s3, %s470_s17 }
  0x10   : > { %581 = vmatpush3.bf16.msra.mxu0 %v580_v10  ;;  %604 = vmatpush3.bf16.msra.mxu1 %v580_v10  ;;  %v174_v23 = vld [vmem:[%s717_s20] sm:$0xff]  ;;  %v180_v24 = vld [vmem:[%s717_s20 + $0x30] sm:$0xff]  ;;  %v175_v25 = vld [vmem:[%s717_s20 + $0x8] sm:$0xff] }
  0x11   : > { %582 = vmatprep.subr.bf16.mxu0 %v629_v3  ;;  %598 = vmatprep.subr.bf16.mxu1 %v629_v3  ;;  %v181_v26 = vld [vmem:[%s717_s20 + $0x38] sm:$0xff]  ;;  %v176_v27 = vld [vmem:[%s717_s20 + $0x10] sm:$0xff]  ;;  %v182_v28 = vld [vmem:[%s717_s20 + $0x40] sm:$0xff] }
  0x12   : > { %v177_v29 = vld [vmem:[%s717_s20 + $0x18] sm:$0xff]  ;;  %v183_v30 = vld [vmem:[%s717_s20 + $0x48] sm:$0xff]  ;;  %v178_v31 = vld [vmem:[%s717_s20 + $0x20] sm:$0xff] }
  0x13   : > { %v184_v32 = vld [vmem:[%s717_s20 + $0x50] sm:$0xff]  ;;  %v179_v33 = vld [vmem:[%s717_s20 + $0x28] sm:$0xff] }
  0x14   : > { %584 = vmatpush3.bf16.msra.mxu0 %v583_v13  ;;  %605 = vmatpush3.bf16.msra.mxu1 %v583_v13 }
  0x15   : > { %585 = vmatprep.subr.bf16.mxu0 %v629_v3  ;;  %599 = vmatprep.subr.bf16.mxu1 %v629_v3 }
  0x18   : > { %587 = vmatpush3.bf16.msra.mxu0 %v586_v16  ;;  %606 = vmatpush3.bf16.msra.mxu1 %v586_v16 }
  0x19   : > { %588 = vmatprep.subr.bf16.mxu0 %v629_v3  ;;  %600 = vmatprep.subr.bf16.mxu1 %v629_v3 }
  0x1c   : > { %590 = vmatpush3.bf16.msra.mxu0 %v589_v19  ;;  %607 = vmatpush3.bf16.msra.mxu1 %v589_v19 }
  0x1d   : > { %591 = vmatprep.subr.bf16.mxu0 %v629_v3  ;;  %601 = vmatprep.subr.bf16.mxu1 %v629_v3 }
  0x20   : > { %594 = vmatpush3.bf16.msk.msra.mxu0 %vm593_vm3, %v592_v22  ;;  %608 = vmatpush3.bf16.msk.msra.mxu1 %vm593_vm3, %v592_v22 }
  0x23   : > { %541 = vmatmul.mubr.msk.f32.vlgmr.msra.gmra.mrb[0].mxu0 %vm206_vm4, %v174_v23  ;;  %559 = vmatmul.mubr.msk.f32.vlgmr.msra.gmra.mrb[0].mxu1 %vm206_vm4, %v180_v24 }
  0x24   : > { %543 = vmatprep.mubr.msk.f32.mxu0 %vm630_vm0, %v631_v6  ;;  %561 = vmatprep.mubr.msk.f32.mxu1 %vm630_vm0, %v631_v6 }
  0x27   : > { %544 = vmatmul.mubr.msk.f32.gmra.mrb[2].mxu0 %vm206_vm4, %v175_v25  ;;  %562 = vmatmul.mubr.msk.f32.gmra.mrb[2].mxu1 %vm206_vm4, %v181_v26 }
  0x28   : > { %546 = vmatprep.mubr.msk.f32.mxu0 %vm630_vm0, %v631_v6  ;;  %564 = vmatprep.mubr.msk.f32.mxu1 %vm630_vm0, %v631_v6 }
  0x2b   : > { %547 = vmatmul.mubr.msk.f32.gmra.mrb[4].mxu0 %vm206_vm4, %v176_v27  ;;  %565 = vmatmul.mubr.msk.f32.gmra.mrb[4].mxu1 %vm206_vm4, %v182_v28 }
  0x2c   : > { %549 = vmatprep.mubr.msk.f32.mxu0 %vm630_vm0, %v631_v6  ;;  %567 = vmatprep.mubr.msk.f32.mxu1 %vm630_vm0, %v631_v6 }
  0x2f   : > { %550 = vmatmul.mubr.msk.f32.gmra.mrb[6].mxu0 %vm206_vm4, %v177_v29  ;;  %568 = vmatmul.mubr.msk.f32.gmra.mrb[6].mxu1 %vm206_vm4, %v183_v30 }
  0x30   : > { %552 = vmatprep.mubr.msk.f32.mxu0 %vm630_vm0, %v631_v6  ;;  %570 = vmatprep.mubr.msk.f32.mxu1 %vm630_vm0, %v631_v6 }
  0x33   : > { %553 = vmatmul.mubr.msk.f32.gmra.mrb[8].mxu0 %vm206_vm4, %v178_v31  ;;  %571 = vmatmul.mubr.msk.f32.gmra.mrb[8].mxu1 %vm206_vm4, %v184_v32 }
  0x34   : > { %555 = vmatprep.mubr.msk.f32.mxu0 %vm630_vm0, %v631_v6 }
  0x37   : > { %556 = vmatmul.mubr.msk.f32.gmra.mrb[10].mxu0 %vm206_vm4, %v179_v33 }
  0xf6   : > { %v310_v35 = vpop.f32.mrb[0].mxu0  ;;  %v340_v36 = vpop.f32.mrb[0].mxu1 }
  0xf7   : > { %v311_v37 = vadd.f32 %v762_v34, %v310_v35  ;;  %v542_v38 = vpop.f32.mrb[1].mxu0  ;;  %v341_v39 = vadd.f32 %v762_v34, %v340_v36  ;;  %v560_v40 = vpop.f32.mrb[1].mxu1 }
  0xf9   : > { %vm364_vm6 = vcmp.ge.f32.partialorder %v311_v37, 0.0  ;;  %v375_v41 = vmul.f32 0.01, %v311_v37  ;;  %vm370_vm7 = vcmp.ge.f32.partialorder %v341_v39, 0.0  ;;  %v381_v42 = vmul.f32 0.01, %v341_v39 }
  0xfa   : > { %v315_v43 = vpop.f32.mrb[2].mxu0  ;;  %v345_v44 = vpop.f32.mrb[2].mxu1 }
  0xfb   : > { %v386_v45 = vsel %vm364_vm6, %v311_v37, %v375_v41  ;;  %v392_v46 = vsel %vm370_vm7, %v341_v39, %v381_v42  ;;  %v316_v47 = vadd.f32 %v762_v34, %v315_v43  ;;  %v545_v48 = vpop.f32.mrb[3].mxu0  ;;  %v346_v49 = vadd.f32 %v762_v34, %v345_v44  ;;  %v563_v50 = vpop.f32.mrb[3].mxu1 }
  0xfc   : > { %398 = vst.msk [vmem:[%s771_s25] sm:$0xff] %vm397_vm5, %v386_v45  ;;  %404 = vst.msk [vmem:[%s771_s25 + $0x30] sm:$0xff] %vm397_vm5, %v392_v46 }
  0xfd   : > { %vm365_vm8 = vcmp.ge.f32.partialorder %v316_v47, 0.0  ;;  %v376_v51 = vmul.f32 0.01, %v316_v47  ;;  %vm371_vm9 = vcmp.ge.f32.partialorder %v346_v49, 0.0  ;;  %v382_v52 = vmul.f32 0.01, %v346_v49 }
  0xfe   : > { %v320_v53 = vpop.f32.mrb[4].mxu0  ;;  %v350_v54 = vpop.f32.mrb[4].mxu1 }
  0xff   : > { %v387_v55 = vsel %vm365_vm8, %v316_v47, %v376_v51  ;;  %v393_v56 = vsel %vm371_vm9, %v346_v49, %v382_v52  ;;  %v321_v57 = vadd.f32 %v762_v34, %v320_v53  ;;  %v548_v58 = vpop.f32.mrb[5].mxu0  ;;  %v351_v59 = vadd.f32 %v762_v34, %v350_v54  ;;  %v566_v60 = vpop.f32.mrb[5].mxu1 }
 0x100   : > { %399 = vst.msk [vmem:[%s771_s25 + $0x8] sm:$0xff] %vm397_vm5, %v387_v55  ;;  %405 = vst.msk [vmem:[%s771_s25 + $0x38] sm:$0xff] %vm397_vm5, %v393_v56 }
 0x101   : > { %vm366_vm10 = vcmp.ge.f32.partialorder %v321_v57, 0.0  ;;  %v377_v61 = vmul.f32 0.01, %v321_v57  ;;  %vm372_vm11 = vcmp.ge.f32.partialorder %v351_v59, 0.0  ;;  %v383_v62 = vmul.f32 0.01, %v351_v59 }
 0x102   : > { %v325_v63 = vpop.f32.mrb[6].mxu0  ;;  %v355_v0 = vpop.f32.mrb[6].mxu1 }
 0x103   : > { %v388_v1 = vsel %vm366_vm10, %v321_v57, %v377_v61  ;;  %v394_v2 = vsel %vm372_vm11, %v351_v59, %v383_v62  ;;  %v326_v3 = vadd.f32 %v762_v34, %v325_v63  ;;  %v551_v4 = vpop.f32.mrb[7].mxu0  ;;  %v356_v5 = vadd.f32 %v762_v34, %v355_v0  ;;  %v569_v6 = vpop.f32.mrb[7].mxu1 }
 0x104   : > { %400 = vst.msk [vmem:[%s771_s25 + $0x10] sm:$0xff] %vm397_vm5, %v388_v1  ;;  %406 = vst.msk [vmem:[%s771_s25 + $0x40] sm:$0xff] %vm397_vm5, %v394_v2 }
 0x105   : > { %vm367_vm12 = vcmp.ge.f32.partialorder %v326_v3, 0.0  ;;  %v378_v7 = vmul.f32 0.01, %v326_v3  ;;  %vm373_vm13 = vcmp.ge.f32.partialorder %v356_v5, 0.0  ;;  %v384_v8 = vmul.f32 0.01, %v356_v5 }
 0x106   : > { %v330_v9 = vpop.f32.mrb[8].mxu0  ;;  %v360_v10 = vpop.f32.mrb[8].mxu1 }
 0x107   : > { %v389_v11 = vsel %vm367_vm12, %v326_v3, %v378_v7  ;;  %v395_v12 = vsel %vm373_vm13, %v356_v5, %v384_v8  ;;  %v331_v13 = vadd.f32 %v762_v34, %v330_v9  ;;  %v554_v14 = vpop.f32.mrb[9].mxu0  ;;  %v361_v15 = vadd.f32 %v762_v34, %v360_v10  ;;  %v572_v16 = vpop.f32.mrb[9].mxu1 }
 0x108   : > { %401 = vst.msk [vmem:[%s771_s25 + $0x18] sm:$0xff] %vm397_vm5, %v389_v11  ;;  %407 = vst.msk [vmem:[%s771_s25 + $0x48] sm:$0xff] %vm397_vm5, %v395_v12 }
 0x109   : > { %vm368_vm14 = vcmp.ge.f32.partialorder %v331_v13, 0.0  ;;  %v379_v17 = vmul.f32 0.01, %v331_v13  ;;  %vm374_vm15 = vcmp.ge.f32.partialorder %v361_v15, 0.0  ;;  %v385_v18 = vmul.f32 0.01, %v361_v15 }
 0x10a   : > { %v335_v19 = vpop.f32.mrb[10].mxu0 }
 0x10b   : > { %v390_v20 = vsel %vm368_vm14, %v331_v13, %v379_v17  ;;  %v396_v21 = vsel %vm374_vm15, %v361_v15, %v385_v18  ;;  %v336_v22 = vadd.f32 %v762_v34, %v335_v19  ;;  %v557_v23 = vpop.f32.mrb[11].mxu0 }
 0x10c   : > { %402 = vst.msk [vmem:[%s771_s25 + $0x20] sm:$0xff] %vm397_vm5, %v390_v20  ;;  %408 = vst.msk [vmem:[%s771_s25 + $0x50] sm:$0xff] %vm397_vm5, %v396_v21 }
 0x10d   : > { %vm369_vm0 = vcmp.ge.f32.partialorder %v336_v22, 0.0  ;;  %v380_v24 = vmul.f32 0.01, %v336_v22 }
 0x10f   : > { %v391_v25 = vsel %vm369_vm0, %v336_v22, %v380_v24 }
 0x110   : > { %403 = vst.msk [vmem:[%s771_s25 + $0x28] sm:$0xff] %vm397_vm5, %v391_v25 }
 0x111 PF: > { %s13_s12 = sadd.s32 1, %s627_s12  }
 0x112   : > { %p10_p4 = scmp.ge.s32.totalorder %s13_s12, 13  }
 0x114   :  { %12 = sbr.rel (!%p10_p4) target bundleno = 1 (0x1), region = 62 }

// kernel: cvae_forward.9
= control target key start
LH: loop header
LB: loop body
LE: loop exit
PB: predicated region body
PF: predicated region fallthrough
CT: control target
= control target key end

     0   :  { %s536_s12 = smov 0   ;;  %s673_s0 = inlined_call_operand.vmem [shape: f32[200,256], index: 0, kind: input, shape index: {}]   ;;  %s674_s1 = inlined_call_operand.vmem [shape: f32[256,32], index: 1, kind: input, shape index: {}]   ;;  %s675_s2 = inlined_call_operand.vmem [shape: f32[1,32], index: 2, kind: input, shape index: {}]   ;;  %s676_s3 = inlined_call_operand.vmem [shape: f32[200,32], index: 3, kind: output, shape index: {}]  }
   0x1 LB: > { %s393_s13 = sadd.s32 4294967295, %s514_s12   ;;  %p397_p0 = scmp.ge.s32.totalorder %s514_s12, 1  ;;  %s514_s12 = sphi %s536_s12, %s13_s12  }
   0x2   : > { %p139_p1 = scmp.lt.s32.totalorder %s514_s12, 6 }
   0x4   : > { %p140_p2 = pnand %p397_p0, %p139_p1 }
   0x5   : > { %v203_v0 = vld [vmem:[%s674_s1 + $0x80] sm:$0xff] (!%p140_p2)  ;;  %v204_v1 = vld [vmem:[%s674_s1 + $0x88] sm:$0xff] (!%p140_p2)  ;;  %s164_s20 = smul.u32 (!%p140_p2), 5, %s393_s13  ;;  %v205_v5 = vld [vmem:[%s674_s1 + $0x90] sm:$0xff] (!%p140_p2)  ;;  %vm331_vm0 = vcmask (!%p140_p2), 261120  }
   0x6   : > { %143 = sbr.rel (%p140_p2) target bundleno = 269 (0x10d), region = 32  ;;  %v187_v2 = vld [vmem:[%s674_s1] sm:$0xff] (!%p140_p2)  ;;  %v452_v3 = vpack.c.bf16 (!%p140_p2), %v204_v1, %v203_v0  ;;  %v188_v4 = vld [vmem:[%s674_s1 + $0x8] sm:$0xff] (!%p140_p2)  ;;  %v206_v6 = vld [vmem:[%s674_s1 + $0x98] sm:$0xff] (!%p140_p2) }
   0x7   : > { %v454_v7 = vpack.c.bf16 (!%p140_p2), %v188_v4, %v187_v2  ;;  %v456_v8 = vpack.c.bf16 (!%p140_p2), %v206_v6, %v205_v5  ;;  %v189_v9 = vld [vmem:[%s674_s1 + $0x10] sm:$0xff] (!%p140_p2)  ;;  %v190_v10 = vld [vmem:[%s674_s1 + $0x18] sm:$0xff] (!%p140_p2)  ;;  %v207_v11 = vld [vmem:[%s674_s1 + $0xa0] sm:$0xff] (!%p140_p2)  ;;  %p165_p3 = scmp.lt.s32.totalorder (!%p140_p2), %s164_s20, 24 }
   0x8   : > { %453 = vmatprep.subr.bf16.mxu0 (!%p140_p2), %v452_v3  ;;  %484 = vmatprep.subr.bf16.mxu1 (!%p140_p2), %v452_v3  ;;  %v208_v12 = vld [vmem:[%s674_s1 + $0xa8] sm:$0xff] (!%p140_p2)  ;;  %v458_v13 = vpack.c.bf16 (!%p140_p2), %v190_v10, %v189_v9  ;;  %v191_v15 = vld [vmem:[%s674_s1 + $0x20] sm:$0xff] (!%p140_p2)  ;;  %v209_v17 = vld [vmem:[%s674_s1 + $0xb0] sm:$0xff] (!%p140_p2) }
   0x9   : > { %455 = vmatpush3.bf16.msra.mxu0 (!%p140_p2), %v454_v7  ;;  %492 = vmatpush3.bf16.msra.mxu1 (!%p140_p2), %v454_v7  ;;  %v460_v14 = vpack.c.bf16 (!%p140_p2), %v208_v12, %v207_v11  ;;  %v192_v16 = vld [vmem:[%s674_s1 + $0x28] sm:$0xff] (!%p140_p2)  ;;  %v210_v18 = vld [vmem:[%s674_s1 + $0xb8] sm:$0xff] (!%p140_p2)  ;;  %v193_v21 = vld [vmem:[%s674_s1 + $0x30] sm:$0xff] (!%p140_p2) }
   0xa   : > { %457 = vmatprep.subr.bf16.mxu0 (!%p140_p2), %v456_v8  ;;  %485 = vmatprep.subr.bf16.mxu1 (!%p140_p2), %v456_v8  ;;  %v462_v19 = vpack.c.bf16 (!%p140_p2), %v192_v16, %v191_v15  ;;  %v464_v20 = vpack.c.bf16 (!%p140_p2), %v210_v18, %v209_v17  ;;  %v194_v22 = vld [vmem:[%s674_s1 + $0x38] sm:$0xff] (!%p140_p2)  ;;  %v211_v23 = vld [vmem:[%s674_s1 + $0xc0] sm:$0xff] (!%p140_p2)  ;;  %v212_v24 = vld [vmem:[%s674_s1 + $0xc8] sm:$0xff] (!%p140_p2) }
   0xb   : > { %v466_v27 = vpack.c.bf16 (!%p140_p2), %v194_v22, %v193_v21  ;;  %v468_v28 = vpack.c.bf16 (!%p140_p2), %v212_v24, %v211_v23  ;;  %v195_v29 = vld [vmem:[%s674_s1 + $0x40] sm:$0xff] (!%p140_p2)  ;;  %v196_v30 = vld [vmem:[%s674_s1 + $0x48] sm:$0xff] (!%p140_p2)  ;;  %v213_v31 = vld [vmem:[%s674_s1 + $0xd0] sm:$0xff] (!%p140_p2) }
   0xc   : > { %v214_v32 = vld [vmem:[%s674_s1 + $0xd8] sm:$0xff] (!%p140_p2)  ;;  %v470_v33 = vpack.c.bf16 (!%p140_p2), %v196_v30, %v195_v29  ;;  %v197_v35 = vld [vmem:[%s674_s1 + $0x50] sm:$0xff] (!%p140_p2)  ;;  %v215_v37 = vld [vmem:[%s674_s1 + $0xe0] sm:$0xff] (!%p140_p2) }
   0xd   : > { %s678_s20 = smov (!%p165_p3, %s164_s20), 24  ;;  %459 = vmatpush3.bf16.msra.mxu0 %v458_v13  ;;  %493 = vmatpush3.bf16.msra.mxu1 %v458_v13  ;;  %v472_v34 = vpack.c.bf16 %v214_v32, %v213_v31  ;;  %v198_v36 = vld [vmem:[%s674_s1 + $0x58] sm:$0xff]  ;;  %v216_v38 = vld [vmem:[%s674_s1 + $0xe8] sm:$0xff]  ;;  %v199_v41 = vld [vmem:[%s674_s1 + $0x60] sm:$0xff] }
   0xe   : > { %s404_s17 = sshll.u32 %s678_s20, 4  ;;  %461 = vmatprep.subr.bf16.mxu0 %v460_v14  ;;  %486 = vmatprep.subr.bf16.mxu1 %v460_v14  ;;  %v474_v39 = vpack.c.bf16 %v198_v36, %v197_v35  ;;  %v476_v40 = vpack.c.bf16 %v216_v38, %v215_v37  ;;  %v200_v42 = vld [vmem:[%s674_s1 + $0x68] sm:$0xff]  ;;  %v217_v43 = vld [vmem:[%s674_s1 + $0xf0] sm:$0xff]  ;;  %v218_v44 = vld [vmem:[%s674_s1 + $0xf8] sm:$0xff]  ;;  %s400_s9 = sshll.u32 %s678_s20, 3 }
   0xf   : > { %s592_s21 = scalar_lea.vmem %s673_s0, %s404_s17  ;;  %v478_v45 = vpack.c.bf16 %v200_v42, %v199_v41  ;;  %v480_v46 = vpack.c.bf16 %v218_v44, %v217_v43  ;;  %v201_v47 = vld [vmem:[%s674_s1 + $0x70] sm:$0xff]  ;;  %v202_v48 = vld [vmem:[%s674_s1 + $0x78] sm:$0xff]  ;;  %v401_v60 = vld [vmem:[%s675_s2] ss:$0 sm:$0xff]  ;;  %s175_s11 = scalar_lea.vmem %s676_s3, %s400_s9 }
  0x10   : > { %v178_v25 = vld [vmem:[%s592_s21 + $0x8] sm:$0xff]  ;;  %v184_v26 = vld [vmem:[%s592_s21 + $0x38] sm:$0xff]  ;;  %v482_v49 = vpack.c.bf16 %v202_v48, %v201_v47  ;;  %v177_v50 = vld [vmem:[%s592_s21] sm:$0xff] }
  0x11   : > { %290 = vmatprep.mubr.f32.mxu0 %v178_v25  ;;  %463 = vmatpush3.bf16.msra.mxu0 %v462_v19  ;;  %v183_v51 = vld [vmem:[%s592_s21 + $0x30] sm:$0xff]  ;;  %v180_v52 = vld [vmem:[%s592_s21 + $0x18] sm:$0xff]  ;;  %v186_v53 = vld [vmem:[%s592_s21 + $0x48] sm:$0xff] }
  0x12   : > { %494 = vmatpush3.bf16.msra.mxu1 %v462_v19  ;;  %465 = vmatprep.subr.bf16.mxu0 %v464_v20  ;;  %v179_v54 = vld [vmem:[%s592_s21 + $0x10] sm:$0xff]  ;;  %v185_v55 = vld [vmem:[%s592_s21 + $0x40] sm:$0xff]  ;;  %v182_v56 = vld [vmem:[%s592_s21 + $0x28] sm:$0xff] }
  0x13   : > { %487 = vmatprep.subr.bf16.mxu1 %v464_v20  ;;  %305 = vmatprep.mubr.f32.mxu1 %v184_v26  ;;  %v181_v57 = vld [vmem:[%s592_s21 + $0x20] sm:$0xff] }
  0x15   : > { %467 = vmatpush3.bf16.msra.mxu0 %v466_v27 }
  0x16   : > { %495 = vmatpush3.bf16.msra.mxu1 %v466_v27  ;;  %469 = vmatprep.subr.bf16.mxu0 %v468_v28 }
  0x17   : > { %488 = vmatprep.subr.bf16.mxu1 %v468_v28 }
  0x19   : > { %471 = vmatpush3.bf16.msra.mxu0 %v470_v33 }
  0x1a   : > { %496 = vmatpush3.bf16.msra.mxu1 %v470_v33  ;;  %473 = vmatprep.subr.bf16.mxu0 %v472_v34 }
  0x1b   : > { %489 = vmatprep.subr.bf16.mxu1 %v472_v34 }
  0x1d   : > { %475 = vmatpush3.bf16.msra.mxu0 %v474_v39 }
  0x1e   : > { %497 = vmatpush3.bf16.msra.mxu1 %v474_v39  ;;  %477 = vmatprep.subr.bf16.mxu0 %v476_v40 }
  0x1f   : > { %490 = vmatprep.subr.bf16.mxu1 %v476_v40 }
  0x21   : > { %479 = vmatpush3.bf16.msra.mxu0 %v478_v45 }
  0x22   : > { %498 = vmatpush3.bf16.msra.mxu1 %v478_v45  ;;  %481 = vmatprep.subr.bf16.mxu0 %v480_v46 }
  0x23   : > { %491 = vmatprep.subr.bf16.mxu1 %v480_v46 }
  0x25   : > { %483 = vmatpush3.bf16.msra.mxu0 %v482_v49 }
  0x26   : > { %499 = vmatpush3.bf16.msra.mxu1 %v482_v49 }
  0x28   : > { %291 = vmatmul.mubr.f32.vlgmr.msra.gmra.mrb[0].mxu0 %v177_v50 }
  0x29   : > { %306 = vmatmul.mubr.f32.vlgmr.msra.gmra.mrb[0].mxu1 %v183_v51  ;;  %295 = vmatprep.mubr.f32.mxu0 %v180_v52 }
  0x2a   : > { %310 = vmatprep.mubr.f32.mxu1 %v186_v53 }
  0x2c   : > { %296 = vmatmul.mubr.f32.gmra.mrb[2].mxu0 %v179_v54 }
  0x2d   : > { %311 = vmatmul.mubr.f32.gmra.mrb[2].mxu1 %v185_v55  ;;  %300 = vmatprep.mubr.f32.mxu0 %v182_v56 }
  0x30   : > { %301 = vmatmul.mubr.f32.gmra.mrb[4].mxu0 %v181_v57 }
  0xfb   : > { %v437_v58 = vpop.f32.mrb[0].mxu0 }
  0xfc   : > { %v446_v59 = vpop.f32.mrb[0].mxu1  ;;  %v438_v61 = vpop.f32.mrb[1].mxu0 }
  0xfd   : > { %v447_v62 = vpop.f32.mrb[1].mxu1  ;;  %v439_v63 = vadd.f32 %v438_v61, %v437_v58 }
  0xfe   : > { %v448_v0 = vadd.f32 %v447_v62, %v446_v59 }
  0xff   : > { %v293_v1 = vadd.f32 %v439_v63, %v401_v60  ;;  %v440_v3 = vpop.f32.mrb[2].mxu0 }
 0x100   : > { %v308_v2 = vadd.f32 %v448_v0, %v401_v60  ;;  %v449_v4 = vpop.f32.mrb[2].mxu1  ;;  %v441_v5 = vpop.f32.mrb[3].mxu0 }
 0x101   : > { %v450_v6 = vpop.f32.mrb[3].mxu1  ;;  %vm316_vm1 = vcmp.ge.f32.partialorder %v293_v1, 0.0  ;;  %v321_v7 = vmul.f32 0.01, %v293_v1  ;;  %v442_v9 = vadd.f32 %v441_v5, %v440_v3 }
 0x102   : > { %vm319_vm2 = vcmp.ge.f32.partialorder %v308_v2, 0.0  ;;  %v324_v8 = vmul.f32 0.01, %v308_v2  ;;  %v451_v10 = vadd.f32 %v450_v6, %v449_v4 }
 0x103   : > { %v326_v11 = vsel %vm316_vm1, %v293_v1, %v321_v7  ;;  %v443_v13 = vpop.f32.mrb[4].mxu0  ;;  %v298_v14 = vadd.f32 %v442_v9, %v401_v60 }
 0x104   : > { %v329_v12 = vsel %vm319_vm2, %v308_v2, %v324_v8  ;;  %332 = vst.msk [vmem:[%s175_s11] sm:$0xff] %vm331_vm0, %v326_v11  ;;  %v313_v15 = vadd.f32 %v451_v10, %v401_v60  ;;  %v444_v16 = vpop.f32.mrb[5].mxu0 }
 0x105   : > { %335 = vst.msk [vmem:[%s175_s11 + $0x18] sm:$0xff] %vm331_vm0, %v329_v12  ;;  %v445_v17 = vadd.f32 %v444_v16, %v443_v13  ;;  %vm317_vm3 = vcmp.ge.f32.partialorder %v298_v14, 0.0  ;;  %v322_v18 = vmul.f32 0.01, %v298_v14 }
 0x106   : > { %vm320_vm4 = vcmp.ge.f32.partialorder %v313_v15, 0.0  ;;  %v325_v19 = vmul.f32 0.01, %v313_v15 }
 0x107   : > { %v303_v20 = vadd.f32 %v445_v17, %v401_v60  ;;  %v327_v21 = vsel %vm317_vm3, %v298_v14, %v322_v18 }
 0x108   : > { %v330_v22 = vsel %vm320_vm4, %v313_v15, %v325_v19  ;;  %333 = vst.msk [vmem:[%s175_s11 + $0x8] sm:$0xff] %vm331_vm0, %v327_v21 }
 0x109   : > { %336 = vst.msk [vmem:[%s175_s11 + $0x20] sm:$0xff] %vm331_vm0, %v330_v22  ;;  %vm318_vm5 = vcmp.ge.f32.partialorder %v303_v20, 0.0  ;;  %v323_v23 = vmul.f32 0.01, %v303_v20 }
 0x10b   : > { %v328_v24 = vsel %vm318_vm5, %v303_v20, %v323_v23 }
 0x10c   : > { %334 = vst.msk [vmem:[%s175_s11 + $0x10] sm:$0xff] %vm331_vm0, %v328_v24 }
 0x10d PF: > { %s13_s12 = sadd.s32 1, %s514_s12  }
 0x10e   : > { %p10_p4 = scmp.ge.s32.totalorder %s13_s12, 7  }
 0x110   :  { %12 = sbr.rel (!%p10_p4) target bundleno = 1 (0x1), region = 62 }

// kernel: cvae_forward.10
= control target key start
LH: loop header
LB: loop body
LE: loop exit
PB: predicated region body
PF: predicated region fallthrough
CT: control target
= control target key end

     0   :  { %s661_s12 = smov 0   ;;  %s893_s0 = inlined_call_operand.vmem [shape: f32[32,512], index: 0, kind: input, shape index: {}]   ;;  %s894_s1 = inlined_call_operand.vmem [shape: f32[512,64], index: 1, kind: input, shape index: {}]   ;;  %s895_s2 = inlined_call_operand.vmem [shape: f32[1,64], index: 2, kind: input, shape index: {}]   ;;  %s896_s3 = inlined_call_operand.vmem [shape: f32[32,64], index: 3, kind: output, shape index: {}]  }
   0x1 LB: > { %s471_s13 = sadd.s32 4294967295, %s639_s12   ;;  %p475_p0 = scmp.ge.s32.totalorder %s639_s12, 1  ;;  %s639_s12 = sphi %s661_s12, %s13_s12  }
   0x2   : > { %p139_p1 = scmp.lt.s32.totalorder %s639_s12, 3 }
   0x4   : > { %p140_p2 = pnand %p475_p0, %p139_p1 }
   0x5   : > { %v201_v0 = vld [vmem:[%s894_s1 + $0x80] sm:$0xff] (!%p140_p2)  ;;  %v202_v1 = vld [vmem:[%s894_s1 + $0x88] sm:$0xff] (!%p140_p2)  ;;  %v203_v11 = vld [vmem:[%s894_s1 + $0x90] sm:$0xff] (!%p140_p2)  ;;  %s714_s19 = sshll.u32 (!%p140_p2), %s471_s13, 1  ;;  %vm412_vm1 = vcmask (!%p140_p2), 523264  }
   0x6   : > { %143 = sbr.rel (%p140_p2) target bundleno = 267 (0x10b), region = 32  ;;  %v185_v2 = vld [vmem:[%s894_s1] sm:$0xff] (!%p140_p2)  ;;  %v561_v3 = vpack.c.bf16 (!%p140_p2), %v202_v1, %v201_v0  ;;  %v186_v4 = vld [vmem:[%s894_s1 + $0x8] sm:$0xff] (!%p140_p2)  ;;  %v204_v13 = vld [vmem:[%s894_s1 + $0x98] sm:$0xff] (!%p140_p2)  ;;  %p165_p3 = scmp.lt.s32.totalorder (!%p140_p2), %s714_s19, 3 }
   0x7   : > { %v233_v5 = vld [vmem:[%s894_s1 + $0x180] sm:$0xff] (!%p140_p2)  ;;  %v234_v6 = vld [vmem:[%s894_s1 + $0x188] sm:$0xff] (!%p140_p2)  ;;  %v563_v7 = vpack.c.bf16 (!%p140_p2), %v186_v4, %v185_v2  ;;  %v187_v14 = vld [vmem:[%s894_s1 + $0x10] sm:$0xff] (!%p140_p2)  ;;  %v565_v16 = vpack.c.bf16 (!%p140_p2), %v204_v13, %v203_v11 }
   0x8   : > { %v593_v8 = vpack.c.bf16 (!%p140_p2), %v234_v6, %v233_v5  ;;  %v217_v9 = vld [vmem:[%s894_s1 + $0x100] sm:$0xff] (!%p140_p2)  ;;  %v218_v10 = vld [vmem:[%s894_s1 + $0x108] sm:$0xff] (!%p140_p2)  ;;  %562 = vmatprep.subr.bf16.mxu0 (!%p140_p2), %v561_v3  ;;  %v188_v15 = vld [vmem:[%s894_s1 + $0x18] sm:$0xff] (!%p140_p2) }
   0x9   : > { %v595_v12 = vpack.c.bf16 (!%p140_p2), %v218_v10, %v217_v9  ;;  %564 = vmatpush3.bf16.msra.mxu0 (!%p140_p2), %v563_v7  ;;  %v567_v17 = vpack.c.bf16 (!%p140_p2), %v188_v15, %v187_v14  ;;  %v235_v18 = vld [vmem:[%s894_s1 + $0x190] sm:$0xff] (!%p140_p2)  ;;  %v236_v19 = vld [vmem:[%s894_s1 + $0x198] sm:$0xff] (!%p140_p2)  ;;  %v205_v23 = vld [vmem:[%s894_s1 + $0xa0] sm:$0xff] (!%p140_p2) }
   0xa   : > { %594 = vmatprep.subr.bf16.mxu1 (!%p140_p2), %v593_v8  ;;  %v219_v20 = vld [vmem:[%s894_s1 + $0x110] sm:$0xff] (!%p140_p2)  ;;  %v597_v21 = vpack.c.bf16 (!%p140_p2), %v236_v19, %v235_v18  ;;  %v220_v22 = vld [vmem:[%s894_s1 + $0x118] sm:$0xff] (!%p140_p2)  ;;  %v206_v24 = vld [vmem:[%s894_s1 + $0xa8] sm:$0xff] (!%p140_p2)  ;;  %566 = vmatprep.subr.bf16.mxu0 (!%p140_p2), %v565_v16 }
   0xb   : > { %596 = vmatpush3.bf16.msra.mxu1 (!%p140_p2), %v595_v12  ;;  %v599_v25 = vpack.c.bf16 (!%p140_p2), %v220_v22, %v219_v20  ;;  %v569_v26 = vpack.c.bf16 (!%p140_p2), %v206_v24, %v205_v23  ;;  %v189_v27 = vld [vmem:[%s894_s1 + $0x20] sm:$0xff] (!%p140_p2)  ;;  %v190_v28 = vld [vmem:[%s894_s1 + $0x28] sm:$0xff] (!%p140_p2)  ;;  %v207_v35 = vld [vmem:[%s894_s1 + $0xb0] sm:$0xff] (!%p140_p2) }
   0xc   : > { %v237_v29 = vld [vmem:[%s894_s1 + $0x1a0] sm:$0xff] (!%p140_p2)  ;;  %598 = vmatprep.subr.bf16.mxu1 (!%p140_p2), %v597_v21  ;;  %v238_v30 = vld [vmem:[%s894_s1 + $0x1a8] sm:$0xff] (!%p140_p2)  ;;  %v571_v33 = vpack.c.bf16 (!%p140_p2), %v190_v28, %v189_v27  ;;  %v208_v36 = vld [vmem:[%s894_s1 + $0xb8] sm:$0xff] (!%p140_p2) }
   0xd   : > { %v221_v31 = vld [vmem:[%s894_s1 + $0x120] sm:$0xff]  ;;  %v222_v32 = vld [vmem:[%s894_s1 + $0x128] sm:$0xff]  ;;  %568 = vmatpush3.bf16.msra.mxu0 %v567_v17  ;;  %v601_v34 = vpack.c.bf16 %v238_v30, %v237_v29  ;;  %v191_v37 = vld [vmem:[%s894_s1 + $0x30] sm:$0xff]  ;;  %v573_v39 = vpack.c.bf16 %v208_v36, %v207_v35  ;;  %s898_s19 = smov (!%p165_p3, %s714_s19), 3 }
   0xe   : > { %570 = vmatprep.subr.bf16.mxu0 %v569_v26  ;;  %v603_v38 = vpack.c.bf16 %v222_v32, %v221_v31  ;;  %v192_v40 = vld [vmem:[%s894_s1 + $0x38] sm:$0xff]  ;;  %v239_v41 = vld [vmem:[%s894_s1 + $0x1b0] sm:$0xff]  ;;  %v209_v46 = vld [vmem:[%s894_s1 + $0xc0] sm:$0xff]  ;;  %s484_s27 = sshll.u32 %s898_s19, 5  ;;  %s480_s25 = sshll.u32 %s898_s19, 3 }
   0xf   : > { %600 = vmatpush3.bf16.msra.mxu1 %v599_v25  ;;  %v240_v42 = vld [vmem:[%s894_s1 + $0x1b8] sm:$0xff]  ;;  %v223_v44 = vld [vmem:[%s894_s1 + $0x130] sm:$0xff]  ;;  %v210_v47 = vld [vmem:[%s894_s1 + $0xc8] sm:$0xff]  ;;  %v575_v48 = vpack.c.bf16 %v192_v40, %v191_v37  ;;  %s831_s17 = scalar_lea.vmem %s893_s0, %s484_s27  ;;  %s175_s26 = scalar_lea.vmem %s896_s3, %s480_s25 }
  0x10   : > { %602 = vmatprep.subr.bf16.mxu1 %v601_v34  ;;  %v605_v43 = vpack.c.bf16 %v240_v42, %v239_v41  ;;  %v224_v45 = vld [vmem:[%s894_s1 + $0x138] sm:$0xff]  ;;  %v241_v49 = vld [vmem:[%s894_s1 + $0x1c0] sm:$0xff]  ;;  %v242_v50 = vld [vmem:[%s894_s1 + $0x1c8] sm:$0xff]  ;;  %v577_v52 = vpack.c.bf16 %v210_v47, %v209_v46 }
  0x11   : > { %572 = vmatpush3.bf16.msra.mxu0 %v571_v33  ;;  %v607_v51 = vpack.c.bf16 %v224_v45, %v223_v44  ;;  %v193_v53 = vld [vmem:[%s894_s1 + $0x40] sm:$0xff]  ;;  %v194_v54 = vld [vmem:[%s894_s1 + $0x48] sm:$0xff]  ;;  %v609_v56 = vpack.c.bf16 %v242_v50, %v241_v49  ;;  %v211_v58 = vld [vmem:[%s894_s1 + $0xd0] sm:$0xff] }
  0x12   : > { %574 = vmatprep.subr.bf16.mxu0 %v573_v39  ;;  %v225_v55 = vld [vmem:[%s894_s1 + $0x140] sm:$0xff]  ;;  %v226_v57 = vld [vmem:[%s894_s1 + $0x148] sm:$0xff]  ;;  %v212_v59 = vld [vmem:[%s894_s1 + $0xd8] sm:$0xff]  ;;  %v579_v62 = vpack.c.bf16 %v194_v54, %v193_v53 }
  0x13   : > { %604 = vmatpush3.bf16.msra.mxu1 %v603_v38  ;;  %v243_v60 = vld [vmem:[%s894_s1 + $0x1d0] sm:$0xff]  ;;  %v244_v61 = vld [vmem:[%s894_s1 + $0x1d8] sm:$0xff]  ;;  %v611_v63 = vpack.c.bf16 %v226_v57, %v225_v55  ;;  %v581_v0 = vpack.c.bf16 %v212_v59, %v211_v58  ;;  %v213_v6 = vld [vmem:[%s894_s1 + $0xe0] sm:$0xff] }
  0x14   : > { %606 = vmatprep.subr.bf16.mxu1 %v605_v43  ;;  %v195_v1 = vld [vmem:[%s894_s1 + $0x50] sm:$0xff]  ;;  %v196_v2 = vld [vmem:[%s894_s1 + $0x58] sm:$0xff]  ;;  %v613_v4 = vpack.c.bf16 %v244_v61, %v243_v60  ;;  %v214_v7 = vld [vmem:[%s894_s1 + $0xe8] sm:$0xff] }
  0x15   : > { %576 = vmatpush3.bf16.msra.mxu0 %v575_v48  ;;  %v227_v3 = vld [vmem:[%s894_s1 + $0x150] sm:$0xff]  ;;  %v228_v5 = vld [vmem:[%s894_s1 + $0x158] sm:$0xff]  ;;  %v245_v8 = vld [vmem:[%s894_s1 + $0x1e0] sm:$0xff]  ;;  %v583_v10 = vpack.c.bf16 %v196_v2, %v195_v1  ;;  %v585_v14 = vpack.c.bf16 %v214_v7, %v213_v6 }
  0x16   : > { %578 = vmatprep.subr.bf16.mxu0 %v577_v52  ;;  %v246_v9 = vld [vmem:[%s894_s1 + $0x1e8] sm:$0xff]  ;;  %v197_v11 = vld [vmem:[%s894_s1 + $0x60] sm:$0xff]  ;;  %v615_v13 = vpack.c.bf16 %v228_v5, %v227_v3  ;;  %v215_v19 = vld [vmem:[%s894_s1 + $0xf0] sm:$0xff] }
  0x17   : > { %608 = vmatpush3.bf16.msra.mxu1 %v607_v51  ;;  %v198_v12 = vld [vmem:[%s894_s1 + $0x68] sm:$0xff]  ;;  %v229_v15 = vld [vmem:[%s894_s1 + $0x160] sm:$0xff]  ;;  %v617_v18 = vpack.c.bf16 %v246_v9, %v245_v8  ;;  %v216_v20 = vld [vmem:[%s894_s1 + $0xf8] sm:$0xff] }
  0x18   : > { %610 = vmatprep.subr.bf16.mxu1 %v609_v56  ;;  %v230_v16 = vld [vmem:[%s894_s1 + $0x168] sm:$0xff]  ;;  %v180_v21 = vld [vmem:[%s831_s17 + $0x18] sm:$0xff]  ;;  %v247_v22 = vld [vmem:[%s894_s1 + $0x1f0] sm:$0xff]  ;;  %v587_v24 = vpack.c.bf16 %v198_v12, %v197_v11  ;;  %v589_v26 = vpack.c.bf16 %v216_v20, %v215_v19 }
  0x19   : > { %580 = vmatpush3.bf16.msra.mxu0 %v579_v62  ;;  %v178_v17 = vld [vmem:[%s831_s17 + $0x8] sm:$0xff]  ;;  %v248_v23 = vld [vmem:[%s894_s1 + $0x1f8] sm:$0xff]  ;;  %395 = vmatprep.mubr.f32.mxu1 %v180_v21  ;;  %v619_v25 = vpack.c.bf16 %v230_v16, %v229_v15  ;;  %v199_v27 = vld [vmem:[%s894_s1 + $0x70] sm:$0xff] }
  0x1a   : > { %582 = vmatprep.subr.bf16.mxu0 %v581_v0  ;;  %320 = vmatprep.mubr.f32.mxu0 %v178_v17  ;;  %v200_v28 = vld [vmem:[%s894_s1 + $0x78] sm:$0xff]  ;;  %v621_v29 = vpack.c.bf16 %v248_v23, %v247_v22  ;;  %v231_v30 = vld [vmem:[%s894_s1 + $0x170] sm:$0xff]  ;;  %v177_v34 = vld [vmem:[%s831_s17] sm:$0xff] }
  0x1b   : > { %612 = vmatpush3.bf16.msra.mxu1 %v611_v63  ;;  %v232_v31 = vld [vmem:[%s894_s1 + $0x178] sm:$0xff]  ;;  %v591_v32 = vpack.c.bf16 %v200_v28, %v199_v27  ;;  %v179_v35 = vld [vmem:[%s831_s17 + $0x10] sm:$0xff]  ;;  %v182_v36 = vld [vmem:[%s831_s17 + $0x28] sm:$0xff] }
  0x1c   : > { %614 = vmatprep.subr.bf16.mxu1 %v613_v4  ;;  %v623_v33 = vpack.c.bf16 %v232_v31, %v231_v30  ;;  %v184_v37 = vld [vmem:[%s831_s17 + $0x38] sm:$0xff]  ;;  %v181_v38 = vld [vmem:[%s831_s17 + $0x20] sm:$0xff]  ;;  %v183_v39 = vld [vmem:[%s831_s17 + $0x30] sm:$0xff] }
  0x1d   : > { %584 = vmatpush3.bf16.msra.mxu0 %v583_v10  ;;  %v481_v41 = vld [vmem:[%s895_s2] ss:$0 sm:$0xff] }
  0x1e   : > { %586 = vmatprep.subr.bf16.mxu0 %v585_v14 }
  0x1f   : > { %616 = vmatpush3.bf16.msra.mxu1 %v615_v13 }
  0x20   : > { %618 = vmatprep.subr.bf16.mxu1 %v617_v18 }
  0x21   : > { %588 = vmatpush3.bf16.msra.mxu0 %v587_v24 }
  0x22   : > { %590 = vmatprep.subr.bf16.mxu0 %v589_v26 }
  0x23   : > { %620 = vmatpush3.bf16.msra.mxu1 %v619_v25 }
  0x24   : > { %622 = vmatprep.subr.bf16.mxu1 %v621_v29 }
  0x25   : > { %592 = vmatpush3.bf16.msra.mxu0 %v591_v32 }
  0x27   : > { %624 = vmatpush3.bf16.msra.mxu1 %v623_v33 }
  0x28   : > { %321 = vmatmul.mubr.f32.vlgmr.msra.gmra.mrb[0].mxu0 %v177_v34 }
  0x29   : > { %325 = vmatprep.mubr.f32.mxu0 %v182_v36 }
  0x2a   : > { %396 = vmatmul.mubr.f32.vlgmr.msra.gmra.mrb[0].mxu1 %v179_v35 }
  0x2b   : > { %400 = vmatprep.mubr.f32.mxu1 %v184_v37 }
  0x2c   : > { %326 = vmatmul.mubr.f32.gmra.mrb[2].mxu0 %v181_v38 }
  0x2e   : > { %401 = vmatmul.mubr.f32.gmra.mrb[2].mxu1 %v183_v39 }
  0xfb   : > { %v517_v40 = vpop.f32.mrb[0].mxu0 }
  0xfc   : > { %v518_v42 = vpop.f32.mrb[1].mxu0 }
  0xfd   : > { %v555_v43 = vpop.f32.mrb[0].mxu1  ;;  %v519_v44 = vadd.f32 %v518_v42, %v517_v40 }
  0xfe   : > { %v556_v45 = vpop.f32.mrb[1].mxu1 }
  0xff   : > { %v557_v46 = vadd.f32 %v556_v45, %v555_v43  ;;  %v323_v47 = vadd.f32 %v519_v44, %v481_v41  ;;  %v520_v48 = vpop.f32.mrb[2].mxu0 }
 0x100   : > { %v521_v49 = vpop.f32.mrb[3].mxu0 }
 0x101   : > { %v558_v50 = vpop.f32.mrb[2].mxu1  ;;  %v398_v51 = vadd.f32 %v557_v46, %v323_v47  ;;  %v522_v52 = vadd.f32 %v521_v49, %v520_v48 }
 0x102   : > { %v559_v53 = vpop.f32.mrb[3].mxu1 }
 0x103   : > { %v560_v54 = vadd.f32 %v559_v53, %v558_v50  ;;  %vm406_vm0 = vcmp.ge.f32.partialorder %v398_v51, 0.0  ;;  %v408_v55 = vmul.f32 0.01, %v398_v51  ;;  %v328_v56 = vadd.f32 %v522_v52, %v481_v41 }
 0x105   : > { %v410_v57 = vsel %vm406_vm0, %v398_v51, %v408_v55  ;;  %v403_v58 = vadd.f32 %v560_v54, %v328_v56 }
 0x106   : > { %413 = vst.msk [vmem:[%s175_s26] sm:$0xff] %vm412_vm1, %v410_v57 }
 0x107   : > { %vm407_vm2 = vcmp.ge.f32.partialorder %v403_v58, 0.0  ;;  %v409_v59 = vmul.f32 0.01, %v403_v58 }
 0x109   : > { %v411_v60 = vsel %vm407_vm2, %v403_v58, %v409_v59 }
 0x10a   : > { %414 = vst.msk [vmem:[%s175_s26 + $0x8] sm:$0xff] %vm412_vm1, %v411_v60 }
 0x10b PF: > { %s13_s12 = sadd.s32 1, %s639_s12  }
 0x10c   : > { %p10_p4 = scmp.ge.s32.totalorder %s13_s12, 4  }
 0x10e   :  { %12 = sbr.rel (!%p10_p4) target bundleno = 1 (0x1), region = 62 }

// kernel: cvae_forward.11
= control target key start
LH: loop header
LB: loop body
LE: loop exit
PB: predicated region body
PF: predicated region fallthrough
CT: control target
= control target key end

     0   :  { %17 = vsyncpa [#allocation3], 0  ;;  %v1995_v47 = vmov 1983009808   ;;  %v178_v49 = vlaneseq  ;;  %s3004_s0 = inlined_call_operand.vmem [shape: f32[2,1024], index: 0, kind: input, shape index: {}]   ;;  %s3005_s1 = inlined_call_operand.vmem [shape: f32[1024,16], index: 1, kind: input, shape index: {}]   ;;  %s3006_s2 = inlined_call_operand.vmem [shape: f32[1,16], index: 2, kind: input, shape index: {}]   ;;  %s3007_s3 = inlined_call_operand.vmem [shape: f32[1024,16], index: 3, kind: input, shape index: {}]   ;;  %s3008_s4 = inlined_call_operand.vmem [shape: f32[1,16], index: 4, kind: input, shape index: {}]   ;;  %s3009_s5 = inlined_call_operand.vmem [shape: f32[2,16], index: 5, kind: input, shape index: {}]   ;;  %s3010_s6 = inlined_call_operand.vmem [shape: f32[16,1024], index: 6, kind: input, shape index: {}]   ;;  %s3011_s7 = inlined_call_operand.vmem [shape: f32[1,1024], index: 7, kind: input, shape index: {}]   ;;  %s3012_s8 = inlined_call_operand.hbm [shape: f32[2,16], index: 8, kind: output, shape index: {0}]   ;;  %s3013_s9 = inlined_call_operand.hbm [shape: f32[2,16], index: 9, kind: output, shape index: {1}]   ;;  %s3014_s10 = inlined_call_operand.hbm [shape: f32[2,16], index: 10, kind: output, shape index: {2}]   ;;  %s3015_s11 = inlined_call_operand.vmem [shape: f32[2,1024], index: 11, kind: output, shape index: {3}]  }
   0x1   :  { %v53_v0 = vld [vmem:[%s3005_s1 + $0x80] sm:$0xff]  ;;  %v54_v1 = vld [vmem:[%s3005_s1 + $0x88] sm:$0xff]  ;;  %v55_v11 = vld [vmem:[%s3005_s1 + $0x90] sm:$0xff]  ;;  %v176_v48 = vunpack.c.l.s4 %v1995_v47 }
   0x2   :  { %v37_v2 = vld [vmem:[%s3005_s1] sm:$0xff]  ;;  %v1644_v3 = vpack.c.bf16 %v54_v1, %v53_v0  ;;  %v38_v4 = vld [vmem:[%s3005_s1 + $0x8] sm:$0xff]  ;;  %v56_v13 = vld [vmem:[%s3005_s1 + $0x98] sm:$0xff]  ;;  %v2186_v0 = vshrl.u32 %v178_v49, 7 }
   0x3   :  { %v85_v5 = vld [vmem:[%s3005_s1 + $0x180] sm:$0xff]  ;;  %v86_v6 = vld [vmem:[%s3005_s1 + $0x188] sm:$0xff]  ;;  %v1646_v7 = vpack.c.bf16 %v38_v4, %v37_v2  ;;  %v39_v14 = vld [vmem:[%s3005_s1 + $0x10] sm:$0xff]  ;;  %v1648_v16 = vpack.c.bf16 %v56_v13, %v55_v11  ;;  %v177_v63 = vunpack.c.0.s8 %v176_v48 }
   0x4   :  { %v1676_v8 = vpack.c.bf16 %v86_v6, %v85_v5  ;;  %v69_v9 = vld [vmem:[%s3005_s1 + $0x100] sm:$0xff]  ;;  %v70_v10 = vld [vmem:[%s3005_s1 + $0x108] sm:$0xff]  ;;  %1645 = vmatprep.subr.bf16.mxu0 %v1644_v3  ;;  %v40_v15 = vld [vmem:[%s3005_s1 + $0x18] sm:$0xff] }
   0x5   :  { %v1678_v12 = vpack.c.bf16 %v70_v10, %v69_v9  ;;  %1647 = vmatpush3.bf16.msra.mxu0 %v1646_v7  ;;  %v1650_v17 = vpack.c.bf16 %v40_v15, %v39_v14  ;;  %v87_v18 = vld [vmem:[%s3005_s1 + $0x190] sm:$0xff]  ;;  %v88_v19 = vld [vmem:[%s3005_s1 + $0x198] sm:$0xff]  ;;  %v57_v23 = vld [vmem:[%s3005_s1 + $0xa0] sm:$0xff]  ;;  %v2213_v13 = vsub.s32 %v177_v63, %v2186_v0 }
   0x6   :  { %1677 = vmatprep.subr.bf16.mxu1 %v1676_v8  ;;  %v71_v20 = vld [vmem:[%s3005_s1 + $0x110] sm:$0xff]  ;;  %v1680_v21 = vpack.c.bf16 %v88_v19, %v87_v18  ;;  %v72_v22 = vld [vmem:[%s3005_s1 + $0x118] sm:$0xff]  ;;  %v58_v24 = vld [vmem:[%s3005_s1 + $0xa8] sm:$0xff]  ;;  %1649 = vmatprep.subr.bf16.mxu0 %v1648_v16 }
   0x7   :  { %1679 = vmatpush3.bf16.msra.mxu1 %v1678_v12  ;;  %v1682_v25 = vpack.c.bf16 %v72_v22, %v71_v20  ;;  %v1652_v26 = vpack.c.bf16 %v58_v24, %v57_v23  ;;  %v41_v27 = vld [vmem:[%s3005_s1 + $0x20] sm:$0xff]  ;;  %v42_v28 = vld [vmem:[%s3005_s1 + $0x28] sm:$0xff]  ;;  %v59_v35 = vld [vmem:[%s3005_s1 + $0xb0] sm:$0xff] }
   0x8   :  { %v89_v29 = vld [vmem:[%s3005_s1 + $0x1a0] sm:$0xff]  ;;  %1681 = vmatprep.subr.bf16.mxu1 %v1680_v21  ;;  %v90_v30 = vld [vmem:[%s3005_s1 + $0x1a8] sm:$0xff]  ;;  %v1654_v33 = vpack.c.bf16 %v42_v28, %v41_v27  ;;  %v60_v36 = vld [vmem:[%s3005_s1 + $0xb8] sm:$0xff] }
   0x9   :  { %v73_v31 = vld [vmem:[%s3005_s1 + $0x120] sm:$0xff]  ;;  %v74_v32 = vld [vmem:[%s3005_s1 + $0x128] sm:$0xff]  ;;  %1651 = vmatpush3.bf16.msra.mxu0 %v1650_v17  ;;  %v1684_v34 = vpack.c.bf16 %v90_v30, %v89_v29  ;;  %v43_v37 = vld [vmem:[%s3005_s1 + $0x30] sm:$0xff]  ;;  %v1656_v39 = vpack.c.bf16 %v60_v36, %v59_v35 }
   0xa   :  { %1653 = vmatprep.subr.bf16.mxu0 %v1652_v26  ;;  %v1686_v38 = vpack.c.bf16 %v74_v32, %v73_v31  ;;  %v44_v40 = vld [vmem:[%s3005_s1 + $0x38] sm:$0xff]  ;;  %v91_v41 = vld [vmem:[%s3005_s1 + $0x1b0] sm:$0xff]  ;;  %v61_v46 = vld [vmem:[%s3005_s1 + $0xc0] sm:$0xff] }
   0xb   :  { %1683 = vmatpush3.bf16.msra.mxu1 %v1682_v25  ;;  %v92_v42 = vld [vmem:[%s3005_s1 + $0x1b8] sm:$0xff]  ;;  %v75_v44 = vld [vmem:[%s3005_s1 + $0x130] sm:$0xff]  ;;  %v62_v50 = vld [vmem:[%s3005_s1 + $0xc8] sm:$0xff]  ;;  %v1658_v51 = vpack.c.bf16 %v44_v40, %v43_v37 }
   0xc   :  { %1685 = vmatprep.subr.bf16.mxu1 %v1684_v34  ;;  %v1688_v43 = vpack.c.bf16 %v92_v42, %v91_v41  ;;  %v76_v45 = vld [vmem:[%s3005_s1 + $0x138] sm:$0xff]  ;;  %v93_v52 = vld [vmem:[%s3005_s1 + $0x1c0] sm:$0xff]  ;;  %v94_v53 = vld [vmem:[%s3005_s1 + $0x1c8] sm:$0xff]  ;;  %v1660_v55 = vpack.c.bf16 %v62_v50, %v61_v46 }
   0xd   :  { %1655 = vmatpush3.bf16.msra.mxu0 %v1654_v33  ;;  %v1690_v54 = vpack.c.bf16 %v76_v45, %v75_v44  ;;  %v45_v56 = vld [vmem:[%s3005_s1 + $0x40] sm:$0xff]  ;;  %v46_v57 = vld [vmem:[%s3005_s1 + $0x48] sm:$0xff]  ;;  %v1692_v59 = vpack.c.bf16 %v94_v53, %v93_v52  ;;  %v63_v61 = vld [vmem:[%s3005_s1 + $0xd0] sm:$0xff] }
   0xe   :  { %1657 = vmatprep.subr.bf16.mxu0 %v1656_v39  ;;  %v77_v58 = vld [vmem:[%s3005_s1 + $0x140] sm:$0xff]  ;;  %v78_v60 = vld [vmem:[%s3005_s1 + $0x148] sm:$0xff]  ;;  %v64_v62 = vld [vmem:[%s3005_s1 + $0xd8] sm:$0xff]  ;;  %v1662_v3 = vpack.c.bf16 %v46_v57, %v45_v56 }
   0xf   :  { %1687 = vmatpush3.bf16.msra.mxu1 %v1686_v38  ;;  %v95_v1 = vld [vmem:[%s3005_s1 + $0x1d0] sm:$0xff]  ;;  %v96_v2 = vld [vmem:[%s3005_s1 + $0x1d8] sm:$0xff]  ;;  %v1694_v4 = vpack.c.bf16 %v78_v60, %v77_v58  ;;  %v1664_v5 = vpack.c.bf16 %v64_v62, %v63_v61  ;;  %v65_v11 = vld [vmem:[%s3005_s1 + $0xe0] sm:$0xff] }
  0x10   :  { %1689 = vmatprep.subr.bf16.mxu1 %v1688_v43  ;;  %v47_v6 = vld [vmem:[%s3005_s1 + $0x50] sm:$0xff]  ;;  %v48_v7 = vld [vmem:[%s3005_s1 + $0x58] sm:$0xff]  ;;  %v1696_v9 = vpack.c.bf16 %v96_v2, %v95_v1  ;;  %v66_v12 = vld [vmem:[%s3005_s1 + $0xe8] sm:$0xff] }
  0x11   :  { %1659 = vmatpush3.bf16.msra.mxu0 %v1658_v51  ;;  %v79_v8 = vld [vmem:[%s3005_s1 + $0x150] sm:$0xff]  ;;  %v80_v10 = vld [vmem:[%s3005_s1 + $0x158] sm:$0xff]  ;;  %v97_v14 = vld [vmem:[%s3005_s1 + $0x1e0] sm:$0xff]  ;;  %v1666_v16 = vpack.c.bf16 %v48_v7, %v47_v6  ;;  %v1668_v19 = vpack.c.bf16 %v66_v12, %v65_v11 }
  0x12   :  { %1661 = vmatprep.subr.bf16.mxu0 %v1660_v55  ;;  %v98_v15 = vld [vmem:[%s3005_s1 + $0x1e8] sm:$0xff]  ;;  %v49_v17 = vld [vmem:[%s3005_s1 + $0x60] sm:$0xff]  ;;  %v1698_v18 = vpack.c.bf16 %v80_v10, %v79_v8  ;;  %v67_v25 = vld [vmem:[%s3005_s1 + $0xf0] sm:$0xff] }
  0x13   :  { %1691 = vmatpush3.bf16.msra.mxu1 %v1690_v54  ;;  %v50_v20 = vld [vmem:[%s3005_s1 + $0x68] sm:$0xff]  ;;  %v81_v21 = vld [vmem:[%s3005_s1 + $0x160] sm:$0xff]  ;;  %v1700_v23 = vpack.c.bf16 %v98_v15, %v97_v14  ;;  %v68_v26 = vld [vmem:[%s3005_s1 + $0xf8] sm:$0xff] }
  0x14   :  { %1693 = vmatprep.subr.bf16.mxu1 %v1692_v59  ;;  %v35_v22 = vld [vmem:[%s3004_s0] sm:$0xff]  ;;  %v82_v24 = vld [vmem:[%s3005_s1 + $0x168] sm:$0xff]  ;;  %v99_v29 = vld [vmem:[%s3005_s1 + $0x1f0] sm:$0xff]  ;;  %v1670_v31 = vpack.c.bf16 %v50_v20, %v49_v17  ;;  %v1672_v35 = vpack.c.bf16 %v68_v26, %v67_v25 }
  0x15   :  { %1663 = vmatpush3.bf16.msra.mxu0 %v1662_v3  ;;  %v2243_v27 = vrot.slane %v35_v22, %v2213_v13  ;;  %v174_v28 = vcombine.high %v35_v22, %v35_v22  ;;  %v100_v30 = vld [vmem:[%s3005_s1 + $0x1f8] sm:$0xff]  ;;  %v1702_v34 = vpack.c.bf16 %v82_v24, %v81_v21  ;;  %v51_v36 = vld [vmem:[%s3005_s1 + $0x70] sm:$0xff]  ;;  %v117_v41 = vld [vmem:[%s3005_s1 + $0x280] sm:$0xff] }
  0x16   :  { %1665 = vmatprep.subr.bf16.mxu0 %v1664_v5  ;;  %v52_v37 = vld [vmem:[%s3005_s1 + $0x78] sm:$0xff]  ;;  %v83_v38 = vld [vmem:[%s3005_s1 + $0x170] sm:$0xff]  ;;  %v1704_v39 = vpack.c.bf16 %v100_v30, %v99_v29  ;;  %v118_v42 = vld [vmem:[%s3005_s1 + $0x288] sm:$0xff] }
  0x17   :  { %1695 = vmatpush3.bf16.msra.mxu1 %v1694_v4  ;;  %v2253_v32 = vcombine.high %v2243_v27, %v2243_v27  ;;  %v2256_v33 = vrot.slane %v174_v28, %v2213_v13  ;;  %v84_v40 = vld [vmem:[%s3005_s1 + $0x178] sm:$0xff]  ;;  %v149_v44 = vld [vmem:[%s3005_s1 + $0x380] sm:$0xff]  ;;  %v150_v45 = vld [vmem:[%s3005_s1 + $0x388] sm:$0xff]  ;;  %v1674_v46 = vpack.c.bf16 %v52_v37, %v51_v36  ;;  %v1708_v48 = vpack.c.bf16 %v118_v42, %v117_v41 }
  0x18   :  { %1697 = vmatprep.subr.bf16.mxu1 %v1696_v9  ;;  %v1706_v47 = vpack.c.bf16 %v84_v40, %v83_v38  ;;  %v101_v49 = vld [vmem:[%s3005_s1 + $0x200] sm:$0xff]  ;;  %v102_v50 = vld [vmem:[%s3005_s1 + $0x208] sm:$0xff]  ;;  %v1740_v52 = vpack.c.bf16 %v150_v45, %v149_v44  ;;  %v119_v54 = vld [vmem:[%s3005_s1 + $0x290] sm:$0xff] }
  0x19   :  { %1667 = vmatpush3.bf16.msra.mxu0 %v1666_v16  ;;  %280 = vmatprep.mubr.f32.mxu0 %v2253_v32  ;;  %v2279_v43 = vcombine.high %v2256_v33, %v2256_v33  ;;  %v133_v51 = vld [vmem:[%s3005_s1 + $0x300] sm:$0xff]  ;;  %v134_v53 = vld [vmem:[%s3005_s1 + $0x308] sm:$0xff]  ;;  %v120_v55 = vld [vmem:[%s3005_s1 + $0x298] sm:$0xff]  ;;  %v1710_v58 = vpack.c.bf16 %v102_v50, %v101_v49 }
  0x1a   :  { %1669 = vmatprep.subr.bf16.mxu0 %v1668_v19  ;;  %v151_v56 = vld [vmem:[%s3005_s1 + $0x390] sm:$0xff]  ;;  %v152_v57 = vld [vmem:[%s3005_s1 + $0x398] sm:$0xff]  ;;  %v1742_v59 = vpack.c.bf16 %v134_v53, %v133_v51  ;;  %v1712_v60 = vpack.c.bf16 %v120_v55, %v119_v54  ;;  %v121_v3 = vld [vmem:[%s3005_s1 + $0x2a0] sm:$0xff] }
  0x1b   :  { %1699 = vmatpush3.bf16.msra.mxu1 %v1698_v18  ;;  %350 = vmatprep.mubr.f32.mxu1 %v2279_v43  ;;  %v103_v61 = vld [vmem:[%s3005_s1 + $0x210] sm:$0xff]  ;;  %v104_v62 = vld [vmem:[%s3005_s1 + $0x218] sm:$0xff]  ;;  %v1744_v1 = vpack.c.bf16 %v152_v57, %v151_v56  ;;  %v122_v4 = vld [vmem:[%s3005_s1 + $0x2a8] sm:$0xff] }
  0x1c   :  { %1701 = vmatprep.subr.bf16.mxu1 %v1700_v23  ;;  %v135_v63 = vld [vmem:[%s3005_s1 + $0x310] sm:$0xff]  ;;  %v136_v2 = vld [vmem:[%s3005_s1 + $0x318] sm:$0xff]  ;;  %v153_v5 = vld [vmem:[%s3005_s1 + $0x3a0] sm:$0xff]  ;;  %v1714_v7 = vpack.c.bf16 %v104_v62, %v103_v61  ;;  %v1716_v9 = vpack.c.bf16 %v122_v4, %v121_v3 }
  0x1d   :  { %1671 = vmatpush3.bf16.msra.mxu0 %v1670_v31  ;;  %v154_v6 = vld [vmem:[%s3005_s1 + $0x3a8] sm:$0xff]  ;;  %v1746_v8 = vpack.c.bf16 %v136_v2, %v135_v63  ;;  %v105_v10 = vld [vmem:[%s3005_s1 + $0x220] sm:$0xff]  ;;  %v123_v16 = vld [vmem:[%s3005_s1 + $0x2b0] sm:$0xff] }
  0x1e   :  { %1673 = vmatprep.subr.bf16.mxu0 %v1672_v35  ;;  %v106_v11 = vld [vmem:[%s3005_s1 + $0x228] sm:$0xff]  ;;  %v137_v12 = vld [vmem:[%s3005_s1 + $0x320] sm:$0xff]  ;;  %v1748_v14 = vpack.c.bf16 %v154_v6, %v153_v5  ;;  %v124_v17 = vld [vmem:[%s3005_s1 + $0x2b8] sm:$0xff] }
  0x1f   :  { %1703 = vmatpush3.bf16.msra.mxu1 %v1702_v34  ;;  %v138_v15 = vld [vmem:[%s3005_s1 + $0x328] sm:$0xff]  ;;  %v155_v18 = vld [vmem:[%s3005_s1 + $0x3b0] sm:$0xff]  ;;  %v156_v19 = vld [vmem:[%s3005_s1 + $0x3b8] sm:$0xff]  ;;  %v1718_v20 = vpack.c.bf16 %v106_v11, %v105_v10  ;;  %v1720_v22 = vpack.c.bf16 %v124_v17, %v123_v16 }
  0x20   :  { %1705 = vmatprep.subr.bf16.mxu1 %v1704_v39  ;;  %v1750_v21 = vpack.c.bf16 %v138_v15, %v137_v12  ;;  %v107_v23 = vld [vmem:[%s3005_s1 + $0x230] sm:$0xff]  ;;  %v108_v24 = vld [vmem:[%s3005_s1 + $0x238] sm:$0xff]  ;;  %v1752_v26 = vpack.c.bf16 %v156_v19, %v155_v18  ;;  %v125_v29 = vld [vmem:[%s3005_s1 + $0x2c0] sm:$0xff] }
  0x21   :  { %1675 = vmatpush3.bf16.msra.mxu0 %v1674_v46  ;;  %v139_v25 = vld [vmem:[%s3005_s1 + $0x330] sm:$0xff]  ;;  %v140_v28 = vld [vmem:[%s3005_s1 + $0x338] sm:$0xff]  ;;  %v126_v30 = vld [vmem:[%s3005_s1 + $0x2c8] sm:$0xff]  ;;  %v1722_v36 = vpack.c.bf16 %v108_v24, %v107_v23 }
  0x22   :  { %1709 = vmatprep.subr.bf16.mxu0 %v1708_v48  ;;  %v157_v31 = vld [vmem:[%s3005_s1 + $0x3c0] sm:$0xff]  ;;  %v158_v34 = vld [vmem:[%s3005_s1 + $0x3c8] sm:$0xff]  ;;  %v1754_v39 = vpack.c.bf16 %v140_v28, %v139_v25  ;;  %v1724_v40 = vpack.c.bf16 %v126_v30, %v125_v29  ;;  %v128_v48 = vld [vmem:[%s3005_s1 + $0x2d8] sm:$0xff] }
  0x23   :  { %1707 = vmatpush3.bf16.msra.mxu1 %v1706_v47  ;;  %v36_v35 = vld [vmem:[%s3004_s0 + $0x8] sm:$0xff]  ;;  %v109_v41 = vld [vmem:[%s3005_s1 + $0x240] sm:$0xff]  ;;  %v1756_v45 = vpack.c.bf16 %v158_v34, %v157_v31  ;;  %v127_v47 = vld [vmem:[%s3005_s1 + $0x2d0] sm:$0xff] }
  0x24   :  { %1741 = vmatprep.subr.bf16.mxu1 %v1740_v52  ;;  %281 = vmatmul.mubr.f32.vlgmr.msra.gmra.mrb[0].mxu0 %v2243_v27  ;;  %v2390_v37 = vrot.slane %v36_v35, %v2213_v13  ;;  %v191_v38 = vcombine.high %v36_v35, %v36_v35  ;;  %v110_v42 = vld [vmem:[%s3005_s1 + $0x248] sm:$0xff]  ;;  %v141_v44 = vld [vmem:[%s3005_s1 + $0x340] sm:$0xff]  ;;  %v159_v51 = vld [vmem:[%s3005_s1 + $0x3d0] sm:$0xff]  ;;  %v1728_v56 = vpack.c.bf16 %v128_v48, %v127_v47 }
  0x25   :  { %1711 = vmatpush3.bf16.msra.mxu0 %v1710_v58  ;;  %v142_v46 = vld [vmem:[%s3005_s1 + $0x348] sm:$0xff]  ;;  %v160_v52 = vld [vmem:[%s3005_s1 + $0x3d8] sm:$0xff]  ;;  %v1726_v53 = vpack.c.bf16 %v110_v42, %v109_v41  ;;  %v111_v57 = vld [vmem:[%s3005_s1 + $0x250] sm:$0xff] }
  0x26   :  { %351 = vmatmul.mubr.f32.vlgmr.msra.gmra.mrb[0].mxu1 %v2256_v33  ;;  %1713 = vmatprep.subr.bf16.mxu0 %v1712_v60  ;;  %v2412_v49 = vcombine.high %v2390_v37, %v2390_v37  ;;  %v2415_v50 = vrot.slane %v191_v38, %v2213_v13  ;;  %v1758_v55 = vpack.c.bf16 %v142_v46, %v141_v44  ;;  %v112_v58 = vld [vmem:[%s3005_s1 + $0x258] sm:$0xff]  ;;  %v129_v62 = vld [vmem:[%s3005_s1 + $0x2e0] sm:$0xff]  ;;  %v130_v63 = vld [vmem:[%s3005_s1 + $0x2e8] sm:$0xff] }
  0x27   :  { %1743 = vmatpush3.bf16.msra.mxu1 %v1742_v59  ;;  %v143_v59 = vld [vmem:[%s3005_s1 + $0x350] sm:$0xff]  ;;  %v1760_v60 = vpack.c.bf16 %v160_v52, %v159_v51  ;;  %v144_v61 = vld [vmem:[%s3005_s1 + $0x358] sm:$0xff]  ;;  %v162_v2 = vld [vmem:[%s3005_s1 + $0x3e8] sm:$0xff]  ;;  %v1730_v3 = vpack.c.bf16 %v112_v58, %v111_v57  ;;  %v1732_v5 = vpack.c.bf16 %v130_v63, %v129_v62 }
  0x28   :  { %1745 = vmatprep.subr.bf16.mxu1 %v1744_v1  ;;  %420 = vmatprep.mubr.f32.mxu0 %v2412_v49  ;;  %v2426_v54 = vcombine.high %v2415_v50, %v2415_v50  ;;  %v161_v1 = vld [vmem:[%s3005_s1 + $0x3e0] sm:$0xff]  ;;  %v1762_v4 = vpack.c.bf16 %v144_v61, %v143_v59  ;;  %v146_v10 = vld [vmem:[%s3005_s1 + $0x368] sm:$0xff]  ;;  %v131_v11 = vld [vmem:[%s3005_s1 + $0x2f0] sm:$0xff] }
  0x29   :  { %1715 = vmatpush3.bf16.msra.mxu0 %v1714_v7  ;;  %v113_v6 = vld [vmem:[%s3005_s1 + $0x260] sm:$0xff]  ;;  %v114_v7 = vld [vmem:[%s3005_s1 + $0x268] sm:$0xff]  ;;  %v132_v12 = vld [vmem:[%s3005_s1 + $0x2f8] sm:$0xff] }
  0x2a   :  { %1717 = vmatprep.subr.bf16.mxu0 %v1716_v9  ;;  %490 = vmatprep.mubr.f32.mxu1 %v2426_v54  ;;  %v1764_v9 = vpack.c.bf16 %v162_v2, %v161_v1  ;;  %v164_v15 = vld [vmem:[%s3005_s1 + $0x3f8] sm:$0xff]  ;;  %v1734_v16 = vpack.c.bf16 %v114_v7, %v113_v6  ;;  %v1736_v18 = vpack.c.bf16 %v132_v12, %v131_v11  ;;  %v115_v19 = vld [vmem:[%s3005_s1 + $0x270] sm:$0xff]  ;;  %v512_v24 = vld [vmem:[%s3007_s3 + $0x80] sm:$0xff] }
  0x2b   :  { %1747 = vmatpush3.bf16.msra.mxu1 %v1746_v8  ;;  %v145_v8 = vld [vmem:[%s3005_s1 + $0x360] sm:$0xff]  ;;  %v148_v23 = vld [vmem:[%s3005_s1 + $0x378] sm:$0xff]  ;;  %v513_v25 = vld [vmem:[%s3007_s3 + $0x88] sm:$0xff] }
  0x2c   :  { %1749 = vmatprep.subr.bf16.mxu1 %v1748_v14  ;;  %v163_v14 = vld [vmem:[%s3005_s1 + $0x3f0] sm:$0xff]  ;;  %v1766_v17 = vpack.c.bf16 %v146_v10, %v145_v8  ;;  %v545_v28 = vld [vmem:[%s3007_s3 + $0x188] sm:$0xff]  ;;  %v1772_v31 = vpack.c.bf16 %v513_v25, %v512_v24  ;;  %v496_v34 = vld [vmem:[%s3007_s3] sm:$0xff] }
  0x2d   :  { %1719 = vmatpush3.bf16.msra.mxu0 %v1718_v20  ;;  %v116_v20 = vld [vmem:[%s3005_s1 + $0x278] sm:$0xff]  ;;  %v497_v35 = vld [vmem:[%s3007_s3 + $0x8] sm:$0xff]  ;;  %v546_v42 = vld [vmem:[%s3007_s3 + $0x190] sm:$0xff] }
  0x2e   :  { %1721 = vmatprep.subr.bf16.mxu0 %v1720_v22  ;;  %v1768_v22 = vpack.c.bf16 %v164_v15, %v163_v14  ;;  %v1738_v29 = vpack.c.bf16 %v116_v20, %v115_v19  ;;  %v515_v41 = vld [vmem:[%s3007_s3 + $0x98] sm:$0xff]  ;;  %v498_v48 = vld [vmem:[%s3007_s3 + $0x10] sm:$0xff]  ;;  %v517_v57 = vld [vmem:[%s3007_s3 + $0xa8] sm:$0xff] }
  0x2f   :  { %1751 = vmatpush3.bf16.msra.mxu1 %v1750_v21  ;;  %v147_v21 = vld [vmem:[%s3005_s1 + $0x370] sm:$0xff]  ;;  %v547_v44 = vld [vmem:[%s3007_s3 + $0x198] sm:$0xff]  ;;  %v548_v58 = vld [vmem:[%s3007_s3 + $0x1a0] sm:$0xff] }
  0x30   :  { %1753 = vmatprep.subr.bf16.mxu1 %v1752_v26  ;;  %v544_v26 = vld [vmem:[%s3007_s3 + $0x180] sm:$0xff]  ;;  %v1770_v30 = vpack.c.bf16 %v148_v23, %v147_v21  ;;  %v499_v51 = vld [vmem:[%s3007_s3 + $0x18] sm:$0xff]  ;;  %v530_v52 = vld [vmem:[%s3007_s3 + $0x110] sm:$0xff] }
  0x31   :  { %1723 = vmatpush3.bf16.msra.mxu0 %v1722_v36  ;;  %v528_v36 = vld [vmem:[%s3007_s3 + $0x100] sm:$0xff]  ;;  %v1804_v38 = vpack.c.bf16 %v545_v28, %v544_v26  ;;  %v549_v59 = vld [vmem:[%s3007_s3 + $0x1a8] sm:$0xff]  ;;  %v519_v6 = vld [vmem:[%s3007_s3 + $0xb8] sm:$0xff] }
  0x32   :  { %1725 = vmatprep.subr.bf16.mxu0 %v1724_v40  ;;  %v514_v40 = vld [vmem:[%s3007_s3 + $0x90] sm:$0xff]  ;;  %v500_v63 = vld [vmem:[%s3007_s3 + $0x20] sm:$0xff]  ;;  %v501_v1 = vld [vmem:[%s3007_s3 + $0x28] sm:$0xff] }
  0x33   :  { %1755 = vmatpush3.bf16.msra.mxu1 %v1754_v39  ;;  %v529_v39 = vld [vmem:[%s3007_s3 + $0x108] sm:$0xff]  ;;  %v1776_v47 = vpack.c.bf16 %v515_v41, %v514_v40  ;;  %v532_v2 = vld [vmem:[%s3007_s3 + $0x120] sm:$0xff]  ;;  %v550_v7 = vld [vmem:[%s3007_s3 + $0x1b0] sm:$0xff] }
  0x34   :  { %1757 = vmatprep.subr.bf16.mxu1 %v1756_v45  ;;  %v1774_v45 = vpack.c.bf16 %v497_v35, %v496_v34  ;;  %v1806_v46 = vpack.c.bf16 %v529_v39, %v528_v36  ;;  %v551_v8 = vld [vmem:[%s3007_s3 + $0x1b8] sm:$0xff]  ;;  %v534_v14 = vld [vmem:[%s3007_s3 + $0x130] sm:$0xff]  ;;  %v553_v19 = vld [vmem:[%s3007_s3 + $0x1c8] sm:$0xff] }
  0x35   :  { %1727 = vmatpush3.bf16.msra.mxu0 %v1726_v53  ;;  %v1808_v53 = vpack.c.bf16 %v547_v44, %v546_v42  ;;  %v503_v12 = vld [vmem:[%s3007_s3 + $0x38] sm:$0xff]  ;;  %v504_v23 = vld [vmem:[%s3007_s3 + $0x40] sm:$0xff]  ;;  %v505_v24 = vld [vmem:[%s3007_s3 + $0x48] sm:$0xff] }
  0x36   :  { %1729 = vmatprep.subr.bf16.mxu0 %v1728_v56  ;;  %v516_v56 = vld [vmem:[%s3007_s3 + $0xa0] sm:$0xff]  ;;  %v535_v15 = vld [vmem:[%s3007_s3 + $0x138] sm:$0xff]  ;;  %v537_v28 = vld [vmem:[%s3007_s3 + $0x148] sm:$0xff]  ;;  %v1790_v35 = vpack.c.bf16 %v505_v24, %v504_v23 }
  0x37   :  { %1759 = vmatpush3.bf16.msra.mxu1 %v1758_v55  ;;  %v531_v55 = vld [vmem:[%s3007_s3 + $0x118] sm:$0xff]  ;;  %v1780_v62 = vpack.c.bf16 %v517_v57, %v516_v56  ;;  %v1818_v21 = vpack.c.bf16 %v535_v15, %v534_v14  ;;  %v536_v25 = vld [vmem:[%s3007_s3 + $0x140] sm:$0xff]  ;;  %v506_v39 = vld [vmem:[%s3007_s3 + $0x50] sm:$0xff] }
  0x38   :  { %1761 = vmatprep.subr.bf16.mxu1 %v1760_v60  ;;  %v1778_v60 = vpack.c.bf16 %v499_v51, %v498_v48  ;;  %v1810_v61 = vpack.c.bf16 %v531_v55, %v530_v52  ;;  %v555_v34 = vld [vmem:[%s3007_s3 + $0x1d8] sm:$0xff]  ;;  %v1822_v36 = vpack.c.bf16 %v537_v28, %v536_v25  ;;  %v538_v41 = vld [vmem:[%s3007_s3 + $0x150] sm:$0xff]  ;;  %v557_v48 = vld [vmem:[%s3007_s3 + $0x1e8] sm:$0xff] }
  0x39   :  { %1731 = vmatpush3.bf16.msra.mxu0 %v1730_v3  ;;  %v1812_v3 = vpack.c.bf16 %v549_v59, %v548_v58  ;;  %v507_v40 = vld [vmem:[%s3007_s3 + $0x58] sm:$0xff]  ;;  %v508_v52 = vld [vmem:[%s3007_s3 + $0x60] sm:$0xff]  ;;  %v509_v56 = vld [vmem:[%s3007_s3 + $0x68] sm:$0xff] }
  0x3a   :  { %1733 = vmatprep.subr.bf16.mxu0 %v1732_v5  ;;  %v518_v5 = vld [vmem:[%s3007_s3 + $0xb0] sm:$0xff]  ;;  %v539_v44 = vld [vmem:[%s3007_s3 + $0x158] sm:$0xff]  ;;  %v1794_v51 = vpack.c.bf16 %v507_v40, %v506_v39  ;;  %v540_v57 = vld [vmem:[%s3007_s3 + $0x160] sm:$0xff] }
  0x3b   :  { %1763 = vmatpush3.bf16.msra.mxu1 %v1762_v4  ;;  %v533_v4 = vld [vmem:[%s3007_s3 + $0x128] sm:$0xff]  ;;  %v1784_v11 = vpack.c.bf16 %v519_v6, %v518_v5 }
  0x3c   :  { %1765 = vmatprep.subr.bf16.mxu1 %v1764_v9  ;;  %v1782_v9 = vpack.c.bf16 %v501_v1, %v500_v63  ;;  %v1814_v10 = vpack.c.bf16 %v533_v4, %v532_v2  ;;  %v541_v58 = vld [vmem:[%s3007_s3 + $0x168] sm:$0xff] }
  0x3d   :  { %1735 = vmatpush3.bf16.msra.mxu0 %v1734_v16  ;;  %v520_v16 = vld [vmem:[%s3007_s3 + $0xc0] sm:$0xff] }
  0x3e   :  { %1737 = vmatprep.subr.bf16.mxu0 %v1736_v18  ;;  %v552_v18 = vld [vmem:[%s3007_s3 + $0x1c0] sm:$0xff] }
  0x3f   :  { %1767 = vmatpush3.bf16.msra.mxu1 %v1766_v17  ;;  %v521_v17 = vld [vmem:[%s3007_s3 + $0xc8] sm:$0xff]  ;;  %v1820_v26 = vpack.c.bf16 %v553_v19, %v552_v18 }
  0x40   :  { %1769 = vmatprep.subr.bf16.mxu1 %v1768_v22  ;;  %v1788_v22 = vpack.c.bf16 %v521_v17, %v520_v16 }
  0x41   :  { %1739 = vmatpush3.bf16.msra.mxu0 %v1738_v29  ;;  %v522_v29 = vld [vmem:[%s3007_s3 + $0xd0] sm:$0xff] }
  0x42   :  { %1773 = vmatprep.subr.bf16.mxu0 %v1772_v31  ;;  %v554_v31 = vld [vmem:[%s3007_s3 + $0x1d0] sm:$0xff] }
  0x43   :  { %1771 = vmatpush3.bf16.msra.mxu1 %v1770_v30  ;;  %v523_v30 = vld [vmem:[%s3007_s3 + $0xd8] sm:$0xff]  ;;  %v1824_v42 = vpack.c.bf16 %v555_v34, %v554_v31 }
  0x44   :  { %1805 = vmatprep.subr.bf16.mxu1 %v1804_v38  ;;  %421 = vmatmul.mubr.f32.vlgmr.msra.gmra.mrb[2].mxu0 %v2390_v37  ;;  %v1792_v38 = vpack.c.bf16 %v523_v30, %v522_v29 }
  0x45   :  { %1775 = vmatpush3.bf16.msra.mxu0 %v1774_v45  ;;  %695 = vmatprep.mubr.f32.mxu0 %v2253_v32  ;;  %v502_v32 = vld [vmem:[%s3007_s3 + $0x30] sm:$0xff]  ;;  %v524_v45 = vld [vmem:[%s3007_s3 + $0xe0] sm:$0xff] }
  0x46   :  { %491 = vmatmul.mubr.f32.vlgmr.msra.gmra.mrb[2].mxu1 %v2415_v50  ;;  %1777 = vmatprep.subr.bf16.mxu0 %v1776_v47  ;;  %v1786_v20 = vpack.c.bf16 %v503_v12, %v502_v32  ;;  %v556_v47 = vld [vmem:[%s3007_s3 + $0x1e0] sm:$0xff] }
  0x47   :  { %1807 = vmatpush3.bf16.msra.mxu1 %v1806_v46  ;;  %765 = vmatprep.mubr.f32.mxu1 %v2279_v43  ;;  %v1816_v43 = vpack.c.bf16 %v551_v8, %v550_v7  ;;  %v525_v46 = vld [vmem:[%s3007_s3 + $0xe8] sm:$0xff]  ;;  %v1828_v59 = vpack.c.bf16 %v557_v48, %v556_v47 }
  0x48   :  { %1809 = vmatprep.subr.bf16.mxu1 %v1808_v53  ;;  %v1826_v53 = vpack.c.bf16 %v539_v44, %v538_v41  ;;  %v1796_v55 = vpack.c.bf16 %v525_v46, %v524_v45 }
  0x49   :  { %1779 = vmatpush3.bf16.msra.mxu0 %v1778_v60  ;;  %v526_v60 = vld [vmem:[%s3007_s3 + $0xf0] sm:$0xff] }
  0x4a   :  { %1781 = vmatprep.subr.bf16.mxu0 %v1780_v62 }
  0x4b   :  { %1811 = vmatpush3.bf16.msra.mxu1 %v1810_v61  ;;  %v527_v61 = vld [vmem:[%s3007_s3 + $0xf8] sm:$0xff] }
  0x4c   :  { %1813 = vmatprep.subr.bf16.mxu1 %v1812_v3 }
  0x4d   :  { %1783 = vmatpush3.bf16.msra.mxu0 %v1782_v9 }
  0x4e   :  { %1785 = vmatprep.subr.bf16.mxu0 %v1784_v11 }
  0x4f   :  { %1815 = vmatpush3.bf16.msra.mxu1 %v1814_v10 }
  0x50   :  { %1817 = vmatprep.subr.bf16.mxu1 %v1816_v43 }
  0x51   :  { %1787 = vmatpush3.bf16.msra.mxu0 %v1786_v20 }
  0x52   :  { %1789 = vmatprep.subr.bf16.mxu0 %v1788_v22 }
  0x53   :  { %1819 = vmatpush3.bf16.msra.mxu1 %v1818_v21 }
  0x54   :  { %1821 = vmatprep.subr.bf16.mxu1 %v1820_v26 }
  0x55   :  { %1791 = vmatpush3.bf16.msra.mxu0 %v1790_v35 }
  0x56   :  { %1793 = vmatprep.subr.bf16.mxu0 %v1792_v38 }
  0x57   :  { %1823 = vmatpush3.bf16.msra.mxu1 %v1822_v36 }
  0x58   :  { %1825 = vmatprep.subr.bf16.mxu1 %v1824_v42 }
  0x59   :  { %18 = vsyncpa [#allocation5], 0  ;;  %v558_v62 = vld [vmem:[%s3007_s3 + $0x1f0] sm:$0xff]  ;;  %v559_v63 = vld [vmem:[%s3007_s3 + $0x1f8] sm:$0xff]  ;;  %1795 = vmatpush3.bf16.msra.mxu0 %v1794_v51  ;;  %v1798_v1 = vpack.c.bf16 %v509_v56, %v508_v52  ;;  %v1830_v2 = vpack.c.bf16 %v541_v58, %v540_v57  ;;  %v1800_v3 = vpack.c.bf16 %v527_v61, %v526_v60  ;;  %vm1263_vm0 = vcmask 123904   ;;  %s1998_s23 = smov [#allocation2]  }
  0x5a   :  { %1797 = vmatprep.subr.bf16.mxu0 %v1796_v55  ;;  %v510_v4 = vld [vmem:[%s3007_s3 + $0x70] sm:$0xff]  ;;  %v511_v5 = vld [vmem:[%s3007_s3 + $0x78] sm:$0xff]  ;;  %v1832_v7 = vpack.c.bf16 %v559_v63, %v558_v62  ;;  %v576_v9 = vld [vmem:[%s3007_s3 + $0x280] sm:$0xff]  ;;  %vm975_vm1 = vcmask 130048   ;;  %s1319_s24 = sshll.u32 %s1998_s23, 4  ;;  %s1320_s24 = int_to_ptr.vmem [resolvable:$true] %s1319_s24 }
  0x5b   :  { %1827 = vmatpush3.bf16.msra.mxu1 %v1826_v53  ;;  %v542_v6 = vld [vmem:[%s3007_s3 + $0x170] sm:$0xff]  ;;  %v543_v8 = vld [vmem:[%s3007_s3 + $0x178] sm:$0xff]  ;;  %v577_v10 = vld [vmem:[%s3007_s3 + $0x288] sm:$0xff]  ;;  %v1802_v12 = vpack.c.bf16 %v511_v5, %v510_v4 }
  0x5c   :  { %1829 = vmatprep.subr.bf16.mxu1 %v1828_v59  ;;  %v608_v11 = vld [vmem:[%s3007_s3 + $0x380] sm:$0xff]  ;;  %v609_v32 = vld [vmem:[%s3007_s3 + $0x388] sm:$0xff]  ;;  %v1834_v14 = vpack.c.bf16 %v543_v8, %v542_v6  ;;  %v1836_v43 = vpack.c.bf16 %v577_v10, %v576_v9  ;;  %v578_v20 = vld [vmem:[%s3007_s3 + $0x290] sm:$0xff] }
  0x5d   :  { %1799 = vmatpush3.bf16.msra.mxu0 %v1798_v1  ;;  %v560_v15 = vld [vmem:[%s3007_s3 + $0x200] sm:$0xff]  ;;  %v561_v16 = vld [vmem:[%s3007_s3 + $0x208] sm:$0xff]  ;;  %v1868_v18 = vpack.c.bf16 %v609_v32, %v608_v11  ;;  %v579_v21 = vld [vmem:[%s3007_s3 + $0x298] sm:$0xff] }
  0x5e   :  { %1801 = vmatprep.subr.bf16.mxu0 %v1800_v3  ;;  %v592_v17 = vld [vmem:[%s3007_s3 + $0x300] sm:$0xff]  ;;  %v593_v19 = vld [vmem:[%s3007_s3 + $0x308] sm:$0xff]  ;;  %v610_v22 = vld [vmem:[%s3007_s3 + $0x390] sm:$0xff]  ;;  %v1838_v24 = vpack.c.bf16 %v561_v16, %v560_v15  ;;  %v1840_v26 = vpack.c.bf16 %v579_v21, %v578_v20 }
  0x5f   :  { %1831 = vmatpush3.bf16.msra.mxu1 %v1830_v2  ;;  %v611_v23 = vld [vmem:[%s3007_s3 + $0x398] sm:$0xff]  ;;  %v1870_v25 = vpack.c.bf16 %v593_v19, %v592_v17  ;;  %v562_v28 = vld [vmem:[%s3007_s3 + $0x210] sm:$0xff]  ;;  %v580_v35 = vld [vmem:[%s3007_s3 + $0x2a0] sm:$0xff] }
  0x60   :  { %1833 = vmatprep.subr.bf16.mxu1 %v1832_v7  ;;  %v563_v29 = vld [vmem:[%s3007_s3 + $0x218] sm:$0xff]  ;;  %v594_v30 = vld [vmem:[%s3007_s3 + $0x310] sm:$0xff]  ;;  %v1872_v31 = vpack.c.bf16 %v611_v23, %v610_v22  ;;  %v581_v36 = vld [vmem:[%s3007_s3 + $0x2a8] sm:$0xff] }
  0x61   :  { %1803 = vmatpush3.bf16.msra.mxu0 %v1802_v12  ;;  %v595_v34 = vld [vmem:[%s3007_s3 + $0x318] sm:$0xff]  ;;  %v612_v38 = vld [vmem:[%s3007_s3 + $0x3a0] sm:$0xff]  ;;  %v613_v39 = vld [vmem:[%s3007_s3 + $0x3a8] sm:$0xff]  ;;  %v1842_v40 = vpack.c.bf16 %v563_v29, %v562_v28  ;;  %v1844_v42 = vpack.c.bf16 %v581_v36, %v580_v35 }
  0x62   :  { %1837 = vmatprep.subr.bf16.mxu0 %v1836_v43  ;;  %v1874_v41 = vpack.c.bf16 %v595_v34, %v594_v30  ;;  %v565_v44 = vld [vmem:[%s3007_s3 + $0x228] sm:$0xff]  ;;  %v596_v45 = vld [vmem:[%s3007_s3 + $0x320] sm:$0xff]  ;;  %v1876_v46 = vpack.c.bf16 %v613_v39, %v612_v38  ;;  %v582_v47 = vld [vmem:[%s3007_s3 + $0x2b0] sm:$0xff] }
  0x63   :  { %1835 = vmatpush3.bf16.msra.mxu1 %v1834_v14  ;;  %v583_v48 = vld [vmem:[%s3007_s3 + $0x2b8] sm:$0xff]  ;;  %v614_v51 = vld [vmem:[%s3007_s3 + $0x3b0] sm:$0xff]  ;;  %v584_v60 = vld [vmem:[%s3007_s3 + $0x2c0] sm:$0xff] }
  0x64   :  { %1869 = vmatprep.subr.bf16.mxu1 %v1868_v18  ;;  %696 = vmatmul.mubr.f32.vlgmr.msra.gmra.mrb[4].mxu0 %v2243_v27  ;;  %v564_v27 = vld [vmem:[%s3007_s3 + $0x220] sm:$0xff]  ;;  %v615_v52 = vld [vmem:[%s3007_s3 + $0x3b8] sm:$0xff]  ;;  %v1848_v56 = vpack.c.bf16 %v583_v48, %v582_v47  ;;  %v598_v58 = vld [vmem:[%s3007_s3 + $0x330] sm:$0xff] }
  0x65   :  { %1839 = vmatpush3.bf16.msra.mxu0 %v1838_v24  ;;  %835 = vmatprep.mubr.f32.mxu0 %v2412_v49  ;;  %v1846_v53 = vpack.c.bf16 %v565_v44, %v564_v27  ;;  %v566_v49 = vld [vmem:[%s3007_s3 + $0x230] sm:$0xff]  ;;  %v567_v57 = vld [vmem:[%s3007_s3 + $0x238] sm:$0xff]  ;;  %v585_v61 = vld [vmem:[%s3007_s3 + $0x2c8] sm:$0xff] }
  0x66   :  { %766 = vmatmul.mubr.f32.vlgmr.msra.gmra.mrb[4].mxu1 %v2256_v33  ;;  %1841 = vmatprep.subr.bf16.mxu0 %v1840_v26  ;;  %v597_v33 = vld [vmem:[%s3007_s3 + $0x328] sm:$0xff]  ;;  %v599_v59 = vld [vmem:[%s3007_s3 + $0x338] sm:$0xff]  ;;  %v616_v62 = vld [vmem:[%s3007_s3 + $0x3c0] sm:$0xff]  ;;  %v1850_v1 = vpack.c.bf16 %v567_v57, %v566_v49  ;;  %v1852_v3 = vpack.c.bf16 %v585_v61, %v584_v60  ;;  %v1996_v49 = vmov 0.0  }
  0x67   :  { %1871 = vmatpush3.bf16.msra.mxu1 %v1870_v25  ;;  %905 = vmatprep.mubr.f32.mxu1 %v2426_v54  ;;  %v1878_v55 = vpack.c.bf16 %v597_v33, %v596_v45  ;;  %v1880_v54 = vpack.c.bf16 %v615_v52, %v614_v51  ;;  %v617_v63 = vld [vmem:[%s3007_s3 + $0x3c8] sm:$0xff]  ;;  %v1882_v2 = vpack.c.bf16 %v599_v59, %v598_v58  ;;  %v568_v4 = vld [vmem:[%s3007_s3 + $0x240] sm:$0xff]  ;;  %v586_v9 = vld [vmem:[%s3007_s3 + $0x2d0] sm:$0xff] }
  0x68   :  { %1873 = vmatprep.subr.bf16.mxu1 %v1872_v31  ;;  %v569_v5 = vld [vmem:[%s3007_s3 + $0x248] sm:$0xff]  ;;  %v600_v6 = vld [vmem:[%s3007_s3 + $0x340] sm:$0xff]  ;;  %v1884_v7 = vpack.c.bf16 %v617_v63, %v616_v62  ;;  %v587_v10 = vld [vmem:[%s3007_s3 + $0x2d8] sm:$0xff] }
  0x69   :  { %1843 = vmatpush3.bf16.msra.mxu0 %v1842_v40  ;;  %v601_v8 = vld [vmem:[%s3007_s3 + $0x348] sm:$0xff]  ;;  %v618_v11 = vld [vmem:[%s3007_s3 + $0x3d0] sm:$0xff]  ;;  %v619_v32 = vld [vmem:[%s3007_s3 + $0x3d8] sm:$0xff]  ;;  %v1854_v12 = vpack.c.bf16 %v569_v5, %v568_v4  ;;  %v1856_v43 = vpack.c.bf16 %v587_v10, %v586_v9 }
  0x6a   :  { %1845 = vmatprep.subr.bf16.mxu0 %v1844_v42  ;;  %v1886_v14 = vpack.c.bf16 %v601_v8, %v600_v6  ;;  %v570_v15 = vld [vmem:[%s3007_s3 + $0x250] sm:$0xff]  ;;  %v571_v16 = vld [vmem:[%s3007_s3 + $0x258] sm:$0xff]  ;;  %v1888_v18 = vpack.c.bf16 %v619_v32, %v618_v11  ;;  %v588_v20 = vld [vmem:[%s3007_s3 + $0x2e0] sm:$0xff] }
  0x6b   :  { %1875 = vmatpush3.bf16.msra.mxu1 %v1874_v41  ;;  %v602_v17 = vld [vmem:[%s3007_s3 + $0x350] sm:$0xff]  ;;  %v603_v19 = vld [vmem:[%s3007_s3 + $0x358] sm:$0xff]  ;;  %v589_v21 = vld [vmem:[%s3007_s3 + $0x2e8] sm:$0xff]  ;;  %v1858_v24 = vpack.c.bf16 %v571_v16, %v570_v15 }
  0x6c   :  { %1877 = vmatprep.subr.bf16.mxu1 %v1876_v46  ;;  %v620_v22 = vld [vmem:[%s3007_s3 + $0x3e0] sm:$0xff]  ;;  %v621_v23 = vld [vmem:[%s3007_s3 + $0x3e8] sm:$0xff]  ;;  %v1890_v25 = vpack.c.bf16 %v603_v19, %v602_v17  ;;  %v1860_v26 = vpack.c.bf16 %v589_v21, %v588_v20  ;;  %v590_v35 = vld [vmem:[%s3007_s3 + $0x2f0] sm:$0xff] }
  0x6d   :  { %1847 = vmatpush3.bf16.msra.mxu0 %v1846_v53  ;;  %v572_v28 = vld [vmem:[%s3007_s3 + $0x260] sm:$0xff]  ;;  %v573_v29 = vld [vmem:[%s3007_s3 + $0x268] sm:$0xff]  ;;  %v1892_v31 = vpack.c.bf16 %v621_v23, %v620_v22  ;;  %v591_v36 = vld [vmem:[%s3007_s3 + $0x2f8] sm:$0xff] }
  0x6e   :  { %1849 = vmatprep.subr.bf16.mxu0 %v1848_v56  ;;  %v604_v30 = vld [vmem:[%s3007_s3 + $0x360] sm:$0xff]  ;;  %v605_v34 = vld [vmem:[%s3007_s3 + $0x368] sm:$0xff]  ;;  %v622_v38 = vld [vmem:[%s3007_s3 + $0x3f0] sm:$0xff]  ;;  %v1862_v40 = vpack.c.bf16 %v573_v29, %v572_v28  ;;  %v1864_v42 = vpack.c.bf16 %v591_v36, %v590_v35 }
  0x6f   :  { %1879 = vmatpush3.bf16.msra.mxu1 %v1878_v55  ;;  %v623_v39 = vld [vmem:[%s3007_s3 + $0x3f8] sm:$0xff]  ;;  %v1894_v41 = vpack.c.bf16 %v605_v34, %v604_v30  ;;  %v574_v27 = vld [vmem:[%s3007_s3 + $0x270] sm:$0xff]  ;;  %v918_v51 = vld [vmem:[%s3010_s6 + $0x8] sm:$0xff] }
  0x70   :  { %1881 = vmatprep.subr.bf16.mxu1 %v1880_v54  ;;  %v575_v44 = vld [vmem:[%s3007_s3 + $0x278] sm:$0xff]  ;;  %v1896_v45 = vpack.c.bf16 %v623_v39, %v622_v38  ;;  %v606_v46 = vld [vmem:[%s3007_s3 + $0x370] sm:$0xff]  ;;  %v926_v52 = vld [vmem:[%s3010_s6 + $0x48] sm:$0xff] }
  0x71   :  { %1851 = vmatpush3.bf16.msra.mxu0 %v1850_v1  ;;  %v607_v33 = vld [vmem:[%s3007_s3 + $0x378] sm:$0xff]  ;;  %v1866_v47 = vpack.c.bf16 %v575_v44, %v574_v27  ;;  %v1900_v55 = vpack.c.bf16 %v926_v52, %v918_v51  ;;  %v919_v54 = vld [vmem:[%s3010_s6 + $0x10] sm:$0xff]  ;;  %v922_v60 = vld [vmem:[%s3010_s6 + $0x28] sm:$0xff] }
  0x72   :  { %1853 = vmatprep.subr.bf16.mxu0 %v1852_v3  ;;  %v1898_v48 = vpack.c.bf16 %v607_v33, %v606_v46  ;;  %v920_v53 = vld [vmem:[%s3010_s6 + $0x18] sm:$0xff]  ;;  %v927_v59 = vld [vmem:[%s3010_s6 + $0x50] sm:$0xff]  ;;  %v930_v62 = vld [vmem:[%s3010_s6 + $0x68] sm:$0xff] }
  0x73   :  { %1883 = vmatpush3.bf16.msra.mxu1 %v1882_v2  ;;  %v928_v56 = vld [vmem:[%s3010_s6 + $0x58] sm:$0xff]  ;;  %v1906_v61 = vpack.c.bf16 %v927_v59, %v919_v54  ;;  %v1908_v2 = vpack.c.bf16 %v930_v62, %v922_v60  ;;  %v1358_v5 = vld [vmem:[%s3006_s2] ss:$0 sm:$0xff]  ;;  %v923_v46 = vld [vmem:[%s3010_s6 + $0x30] sm:$0xff] }
  0x74   :  { %1885 = vmatprep.subr.bf16.mxu1 %v1884_v7  ;;  %v1904_v57 = vpack.c.bf16 %v928_v56, %v920_v53  ;;  %v924_v63 = vld [vmem:[%s3010_s6 + $0x38] sm:$0xff]  ;;  %v1359_v21 = vld [vmem:[%s3008_s4] ss:$0 sm:$0xff]  ;;  %v931_v33 = vld [vmem:[%s3010_s6 + $0x70] sm:$0xff] }
  0x75   :  { %1855 = vmatpush3.bf16.msra.mxu0 %v1854_v12  ;;  %v932_v1 = vld [vmem:[%s3010_s6 + $0x78] sm:$0xff]  ;;  %v911_v27 = vld [vmem:[%s3009_s5] sm:$0x3]  ;;  %v1914_v52 = vpack.c.bf16 %v931_v33, %v923_v46  ;;  %s1997_s5 = smov [#allocation4]  }
  0x76   :  { %1857 = vmatprep.subr.bf16.mxu0 %v1856_v43  ;;  %v1912_v3 = vpack.c.bf16 %v932_v1, %v924_v63  ;;  %v921_v44 = vld [vmem:[%s3010_s6 + $0x20] sm:$0xff] }
  0x77   :  { %1887 = vmatpush3.bf16.msra.mxu1 %v1886_v14 }
  0x78   :  { %1889 = vmatprep.subr.bf16.mxu1 %v1888_v18 }
  0x79   :  { %1859 = vmatpush3.bf16.msra.mxu0 %v1858_v24 }
  0x7a   :  { %1861 = vmatprep.subr.bf16.mxu0 %v1860_v26 }
  0x7b   :  { %1891 = vmatpush3.bf16.msra.mxu1 %v1890_v25 }
  0x7c   :  { %1893 = vmatprep.subr.bf16.mxu1 %v1892_v31 }
  0x7d   :  { %1863 = vmatpush3.bf16.msra.mxu0 %v1862_v40 }
  0x7e   :  { %1865 = vmatprep.subr.bf16.mxu0 %v1864_v42 }
  0x7f   :  { %1895 = vmatpush3.bf16.msra.mxu1 %v1894_v41 }
  0x80   :  { %1897 = vmatprep.subr.bf16.mxu1 %v1896_v45  ;;  %v929_v45 = vld [vmem:[%s3010_s6 + $0x60] sm:$0xff] }
  0x81   :  { %1867 = vmatpush3.bf16.msra.mxu0 %v1866_v47  ;;  %v1910_v51 = vpack.c.bf16 %v929_v45, %v921_v44 }
  0x82   :  { %1901 = vmatprep.subr.bf16.mxu0 %v1900_v55 }
  0x83   :  { %1899 = vmatpush3.bf16.msra.mxu1 %v1898_v48 }
  0x84   :  { %836 = vmatmul.mubr.f32.vlgmr.msra.gmra.mrb[6].mxu0 %v2390_v37  ;;  %v917_v37 = vld [vmem:[%s3010_s6] sm:$0xff]  ;;  %1905 = vmatprep.subr.bf16.mxu1 %v1904_v57 }
  0x85   :  { %1043 = vmatprep.mubr.f32.mxu0 %v1996_v49 }
  0x86   :  { %906 = vmatmul.mubr.f32.vlgmr.msra.gmra.mrb[6].mxu1 %v2415_v50  ;;  %v925_v50 = vld [vmem:[%s3010_s6 + $0x40] sm:$0xff]  ;;  %s1329_s6 = sshll.u32 %s1997_s5, 4  ;;  %s1330_s6 = int_to_ptr.vmem [resolvable:$true] %s1329_s6 }
  0x87   :  { %1114 = vmatprep.mubr.f32.mxu1 %v1996_v49  ;;  %v1902_v58 = vpack.c.bf16 %v925_v50, %v917_v37  ;;  %1907 = vmatpush1.bf16.msra.mxu1 %v1906_v61  ;;  %s1925_s25 = scalar_lea.vmem %s1330_s6, 32  ;;  %p1930_p1 = scmp.lt.s32.totalorder %s1330_s6, %s1330_s6 }
  0x88   :  { %1913 = vmatprep.subr.bf16.mxu1 %v1912_v3  ;;  %p1926_p0 = scmp.ne.s32.totalorder %s1330_s6, %s1925_s25  ;;  %p1931_p2 = scmp.lt.s32.totalorder %s1925_s25, %s1925_s25 }
  0x89   :  { %1903 = vmatpush1.bf16.msra.mxu0 %v1902_v58 }
  0x8a   :  { %1909 = vmatprep.subr.bf16.mxu0 %v1908_v2  ;;  %p1932_p3 = por %p1931_p2, %p1930_p1 }
  0x8c   :  { %p1933_p4 = pnand %p1932_p3, %p1926_p0 }
  0xf7   :  { %v1396_v4 = vpop.f32.mrb[0].mxu0 }
  0xf8   :  { %v1397_v6 = vpop.f32.mrb[1].mxu0 }
  0xf9   :  { %v1431_v7 = vpop.f32.mrb[0].mxu1  ;;  %v1398_v8 = vadd.f32 %v1397_v6, %v1396_v4 }
  0xfa   :  { %v1432_v9 = vpop.f32.mrb[1].mxu1 }
  0xfb   :  { %v1433_v10 = vadd.f32 %v1432_v9, %v1431_v7  ;;  %v283_v11 = vadd.f32 %v1398_v8, %v1358_v5 }
  0xfd   :  { %v353_v32 = vadd.f32 %v1433_v10, %v283_v11 }
 0x117   :  { %v1466_v12 = vpop.f32.mrb[2].mxu0 }
 0x118   :  { %v1467_v14 = vpop.f32.mrb[3].mxu0 }
 0x119   :  { %v1501_v43 = vpop.f32.mrb[2].mxu1  ;;  %v1468_v15 = vadd.f32 %v1467_v14, %v1466_v12 }
 0x11a   :  { %v1502_v16 = vpop.f32.mrb[3].mxu1 }
 0x11b   :  { %v1503_v17 = vadd.f32 %v1502_v16, %v1501_v43  ;;  %v423_v18 = vadd.f32 %v1468_v15, %v353_v32 }
 0x11d   :  { %v493_v19 = vadd.f32 %v1503_v17, %v423_v18 }
 0x11f   :  { %1264 = vst.msk [vmem:[#allocation2] sm:$0x3] %vm1263_vm0, %v493_v19 }
 0x137   :  { %v1536_v20 = vpop.f32.mrb[4].mxu0 }
 0x138   :  { %v1537_v22 = vpop.f32.mrb[5].mxu0 }
 0x139   :  { %v1571_v23 = vpop.f32.mrb[4].mxu1  ;;  %v1538_v24 = vadd.f32 %v1537_v22, %v1536_v20 }
 0x13a   :  { %v1572_v25 = vpop.f32.mrb[5].mxu1 }
 0x13b   :  { %v1573_v26 = vadd.f32 %v1572_v25, %v1571_v23  ;;  %v698_v28 = vadd.f32 %v1538_v24, %v1359_v21 }
 0x13d   :  { %v768_v29 = vadd.f32 %v1573_v26, %v698_v28 }
 0x157   :  { %v1606_v30 = vpop.f32.mrb[6].mxu0 }
 0x158   :  { %v1607_v31 = vpop.f32.mrb[7].mxu0 }
 0x159   :  { %v1641_v34 = vpop.f32.mrb[6].mxu1  ;;  %v1608_v35 = vadd.f32 %v1607_v31, %v1606_v30 }
 0x15a   :  { %v1642_v36 = vpop.f32.mrb[7].mxu1 }
 0x15b   :  { %v1643_v38 = vadd.f32 %v1642_v36, %v1641_v34  ;;  %v838_v39 = vadd.f32 %v1608_v35, %v768_v29 }
 0x15d   :  { %v908_v40 = vadd.f32 %v1643_v38, %v838_v39 }
 0x15f   :  { %v912_v41 = vmul.f32 0.5, %v908_v40  ;;  %1265 = vst.msk [vmem:[#allocation4] sm:$0x3] %vm1263_vm0, %v908_v40 }
 0x161   :  { %v913_v42 = vmul.f32 1.442695, %v912_v41 }
 0x163   :  { %1923 = vpow2.f32 %v913_v42 }
 0x16d   :  { %v1924_v47 = vpop.eup %1923 }
 0x16e   :  { %v915_v48 = vmul.f32 %v1924_v47, %v911_v27 }
 0x170   :  { %v916_v53 = vadd.f32 %v915_v48, %v493_v19 }
 0x172   :  { %1360 = vmatmul.mubr.msk.f32.vlgmr.msra.gmra.mrb[8].mxu0 %vm975_vm1, %v916_v53  ;;  %1361 = vmatmul.mubr.msk.f32.vlgmr.msra.gmra.mrb[8].mxu1 %vm975_vm1, %v916_v53  ;;  %1266 = vst.msk [vmem:[#allocation6] sm:$0x3] %vm1263_vm0, %v916_v53 }
 0x173   :  { %1911 = vmatpush1.bf16.msra.mxu0 %v1910_v51  ;;  %1915 = vmatpush1.bf16.msra.mxu1 %v1914_v52 }
 0x174   :  { %1185 = vmatprep.mubr.f32.mxu0 %v1996_v49  ;;  %1256 = vmatprep.mubr.f32.mxu1 %v1996_v49 }
 0x176   :  { %1362 = vmatmul.mubr.msk.f32.vlgmr.msra.gmra.mrb[10].mxu0 %vm975_vm1, %v916_v53  ;;  %1363 = vmatmul.mubr.msk.f32.vlgmr.msra.gmra.mrb[10].mxu1 %vm975_vm1, %v916_v53 }
 0x177   :  { %1936 = shalt.err (!%p1933_p4)
}
 0x178   :  { %s1937_s28 = scalar_lea.hbm %s3013_s9, 32 }
 0x179   :  { %p1938_p5 = scmp.ne.s32.totalorder %s3013_s9, %s1937_s28  ;;  %p1941_p6 = scmp.lt.u32.totalorder %s1937_s28, %s3013_s9 }
 0x17b   :  { %p1943_p7 = pnand %p1941_p6, %p1938_p5 }
 0x17d   :  { %1946 = shalt.err (!%p1943_p7)
}
 0x17e   :  { %1332 = dma.vmem_to_hbm [thread:$0]  %s1330_s6, 32, %s3013_s9, [#allocation5]  }
 0x17f   :  { %s1947_s2 = scalar_lea.vmem %s1320_s24, 32  ;;  %p1952_p9 = scmp.lt.s32.totalorder %s1320_s24, %s1320_s24 }
 0x180   :  { %p1948_p8 = scmp.ne.s32.totalorder %s1320_s24, %s1947_s2  ;;  %p1953_p10 = scmp.lt.s32.totalorder %s1947_s2, %s1947_s2 }
 0x182   :  { %p1954_p11 = por %p1953_p10, %p1952_p9 }
 0x184   :  { %p1955_p12 = pnand %p1954_p11, %p1948_p8 }
 0x186   :  { %1958 = shalt.err (!%p1955_p12)
}
 0x187   :  { %s1959_s1 = scalar_lea.hbm %s3012_s8, 32 }
 0x188   :  { %p1960_p13 = scmp.ne.s32.totalorder %s3012_s8, %s1959_s1  ;;  %p1963_p0 = scmp.lt.u32.totalorder %s1959_s1, %s3012_s8 }
 0x18a   :  { %p1965_p1 = pnand %p1963_p0, %p1960_p13 }
 0x18c   :  { %1968 = shalt.err (!%p1965_p1)
}
 0x18d   :  { %1322 = dma.vmem_to_hbm [thread:$0]  %s1320_s24, 32, %s3012_s8, [#allocation3]  }
 0x18e   :  { %s1999_s20 = smov [#allocation6]  }
 0x18f   :  { %s1339_s21 = sshll.u32 %s1999_s20, 4  ;;  %s1340_s21 = int_to_ptr.vmem [resolvable:$true] %s1339_s21 }
 0x190   :  { %s1969_s22 = scalar_lea.vmem %s1340_s21, 32  ;;  %p1974_p3 = scmp.lt.s32.totalorder %s1340_s21, %s1340_s21 }
 0x191   :  { %p1970_p2 = scmp.ne.s32.totalorder %s1340_s21, %s1969_s22  ;;  %p1975_p4 = scmp.lt.s32.totalorder %s1969_s22, %s1969_s22 }
 0x193   :  { %p1976_p5 = por %p1975_p4, %p1974_p3 }
 0x195   :  { %p1977_p6 = pnand %p1976_p5, %p1970_p2 }
 0x197   :  { %1980 = shalt.err (!%p1977_p6)
}
 0x198   :  { %s1981_s23 = scalar_lea.hbm %s3014_s10, 32 }
 0x199   :  { %p1982_p7 = scmp.ne.s32.totalorder %s3014_s10, %s1981_s23  ;;  %p1985_p8 = scmp.lt.u32.totalorder %s1981_s23, %s3014_s10 }
 0x19b   :  { %p1987_p9 = pnand %p1985_p8, %p1982_p7 }
 0x19d   :  { %1990 = shalt.err (!%p1987_p9)
}
 0x19e   :  { %1342 = dma.vmem_to_hbm [thread:$0]  %s1340_s21, 32, %s3014_s10, [#allocation5]   ;;  %v937_v55 = vsub.s32 0, %v2186_v0  ;;  %v945_v56 = vsub.s32 2, %v2186_v0  ;;  %v933_v37 = vld [vmem:[%s3011_s7] sm:$0xff]  ;;  %v941_v50 = vsub.s32 1, %v2186_v0 }
 0x19f   :  { %v949_v49 = vsub.s32 3, %v2186_v0  ;;  %v953_v54 = vsub.s32 4, %v2186_v0  ;;  %v961_v59 = vsub.s32 6, %v2186_v0  ;;  %v957_v62 = vsub.s32 5, %v2186_v0 }
 0x1a0   :  { %v938_v57 = vrot.slane %v933_v37, %v937_v55  ;;  %v946_v58 = vrot.slane %v933_v37, %v945_v56  ;;  %v942_v60 = vrot.slane %v933_v37, %v941_v50  ;;  %v965_v63 = vsub.s32 7, %v2186_v0 }
 0x1a1   :  { %v950_v61 = vrot.slane %v933_v37, %v949_v49  ;;  %v954_v7 = vrot.slane %v933_v37, %v953_v54  ;;  %v962_v8 = vrot.slane %v933_v37, %v961_v59  ;;  %v958_v11 = vrot.slane %v933_v37, %v957_v62 }
 0x1a2   :  { %v966_v32 = vrot.slane %v933_v37, %v965_v63 }
 0x245   :  { %v1045_v1 = vpop.f32.mrb[8].mxu0  ;;  %v1116_v2 = vpop.f32.mrb[8].mxu1 }
 0x246   :  { %v1046_v3 = vadd.f32 %v1045_v1, %v938_v57  ;;  %v1117_v4 = vadd.f32 %v1116_v2, %v946_v58  ;;  %v1047_v5 = vpop.f32.mrb[9].mxu0  ;;  %v1118_v6 = vpop.f32.mrb[9].mxu1 }
 0x247   :  { %v1048_v9 = vadd.f32 %v1047_v5, %v942_v60  ;;  %v1119_v10 = vadd.f32 %v1118_v6, %v950_v61 }
 0x249   :  { %v1275_v12 = vcombine.low %v1046_v3, %v1048_v9  ;;  %v1276_v14 = vcombine.low %v1117_v4, %v1119_v10  ;;  %v1187_v43 = vpop.f32.mrb[10].mxu0  ;;  %v1258_v15 = vpop.f32.mrb[10].mxu1 }
 0x24a   :  { %v1188_v16 = vadd.f32 %v1187_v43, %v954_v7  ;;  %v1259_v17 = vadd.f32 %v1258_v15, %v962_v8  ;;  %v1189_v18 = vpop.f32.mrb[11].mxu0  ;;  %v1260_v0 = vpop.f32.mrb[11].mxu1 }
 0x24b   :  { %v1283_v19 = vrot.slane %v1275_v12, %v2213_v13  ;;  %v1290_v20 = vrot.slane %v1276_v14, %v2213_v13  ;;  %v1190_v21 = vadd.f32 %v1189_v18, %v958_v11  ;;  %v1261_v22 = vadd.f32 %v1260_v0, %v966_v32 }
 0x24d   :  { %v1291_v23 = vcombine.low %v1283_v19, %v1290_v20  ;;  %v1292_v24 = vcombine.low %v1188_v16, %v1190_v21  ;;  %v1293_v25 = vcombine.low %v1259_v17, %v1261_v22 }
 0x24f   :  { %1311 = vst [vmem:[%s3015_s11] sm:$0xff] %v1291_v23  ;;  %v1300_v26 = vrot.slane %v1292_v24, %v2213_v13  ;;  %v1307_v28 = vrot.slane %v1293_v25, %v2213_v13 }
 0x251   :  { %v1308_v29 = vcombine.low %v1300_v26, %v1307_v28 }
 0x253   :  { %1312 = vst [vmem:[%s3015_s11 + $0x8] sm:$0xff] %v1308_v29 }
 0x254   :  { %1991 = dma.done.wait [#allocation3], 32  }
 0x255   :  { %1992 = vsyncadd [#allocation3], 4294967264 }
 0x256   :  { %1993 = dma.done.wait [#allocation5], 64  }
 0x257   :  { %1994 = vsyncadd [#allocation5], 4294967232 }
 0x258   :  { %1356 = vsyncpa [#allocation3], 1 }
 0x259   :  { %1357 = vsyncpa [#allocation5], 1 }

// kernel: cvae_forward.12
= control target key start
LH: loop header
LB: loop body
LE: loop exit
PB: predicated region body
PF: predicated region fallthrough
CT: control target
= control target key end

     0   :  { %s492_s9 = smov 0   ;;  %s619_s0 = inlined_call_operand.vmem [shape: f32[32,64], index: 0, kind: input, shape index: {}]   ;;  %s620_s1 = inlined_call_operand.vmem [shape: f32[64,512], index: 1, kind: input, shape index: {}]   ;;  %s621_s2 = inlined_call_operand.vmem [shape: f32[32,512], index: 2, kind: output, shape index: {}]  }
   0x1 LB: > { %s410_s10 = sadd.s32 4294967295, %s474_s9   ;;  %p414_p0 = scmp.ge.s32.totalorder %s474_s9, 1  ;;  %s474_s9 = sphi %s492_s9, %s12_s9  }
   0x2   : > { %p113_p1 = scmp.lt.s32.totalorder %s474_s9, 3 }
   0x4   : > { %p114_p2 = pnand %p414_p0, %p113_p1 }
   0x5   : > { %v152_v0 = vld [vmem:[%s620_s1 + $0x8] sm:$0xff] (!%p114_p2)  ;;  %v154_v2 = vld [vmem:[%s620_s1 + $0x18] sm:$0xff] (!%p114_p2)  ;;  %s509_s17 = sshll.u32 (!%p114_p2), %s410_s10, 1  ;;  %v151_v5 = vld [vmem:[%s620_s1] sm:$0xff] (!%p114_p2)  ;;  %v476_v7 = vmov (!%p114_p2), 0.0   ;;  %vm183_vm0 = vcmask (!%p114_p2), 523264  }
   0x6   : > { %117 = sbr.rel (%p114_p2) target bundleno = 244 (0xf4), region = 28  ;;  %v156_v1 = vld [vmem:[%s620_s1 + $0x28] sm:$0xff] (!%p114_p2)  ;;  %v158_v4 = vld [vmem:[%s620_s1 + $0x38] sm:$0xff] (!%p114_p2)  ;;  %v155_v6 = vld [vmem:[%s620_s1 + $0x20] sm:$0xff] (!%p114_p2)  ;;  %254 = vmatprep.mubr.f32.mxu0 (!%p114_p2), %v476_v7  ;;  %331 = vmatprep.mubr.f32.mxu1 (!%p114_p2), %v476_v7  ;;  %p137_p3 = scmp.lt.s32.totalorder (!%p114_p2), %s509_s17, 3 }
   0x7   : > { %v427_v3 = vpack.c.bf16 (!%p114_p2), %v156_v1, %v152_v0  ;;  %v443_v8 = vpack.c.bf16 (!%p114_p2), %v158_v4, %v154_v2  ;;  %v429_v9 = vpack.c.bf16 (!%p114_p2), %v155_v6, %v151_v5  ;;  %v153_v10 = vld [vmem:[%s620_s1 + $0x10] sm:$0xff] (!%p114_p2)  ;;  %v160_v12 = vld [vmem:[%s620_s1 + $0x48] sm:$0xff] (!%p114_p2)  ;;  %v162_v15 = vld [vmem:[%s620_s1 + $0x58] sm:$0xff] (!%p114_p2) }
   0x8   : > { %v157_v11 = vld [vmem:[%s620_s1 + $0x30] sm:$0xff] (!%p114_p2)  ;;  %v164_v14 = vld [vmem:[%s620_s1 + $0x68] sm:$0xff] (!%p114_p2)  ;;  %v166_v16 = vld [vmem:[%s620_s1 + $0x78] sm:$0xff] (!%p114_p2) }
   0x9   : > { %428 = vmatprep.subr.bf16.mxu0 (!%p114_p2), %v427_v3  ;;  %v445_v13 = vpack.c.bf16 (!%p114_p2), %v157_v11, %v153_v10  ;;  %444 = vmatprep.subr.bf16.mxu1 (!%p114_p2), %v443_v8  ;;  %v431_v17 = vpack.c.bf16 (!%p114_p2), %v164_v14, %v160_v12  ;;  %v447_v18 = vpack.c.bf16 (!%p114_p2), %v166_v16, %v162_v15  ;;  %v159_v19 = vld [vmem:[%s620_s1 + $0x40] sm:$0xff] (!%p114_p2)  ;;  %v161_v21 = vld [vmem:[%s620_s1 + $0x50] sm:$0xff] (!%p114_p2)  ;;  %v168_v24 = vld [vmem:[%s620_s1 + $0x88] sm:$0xff] (!%p114_p2) }
   0xa   : > { %430 = vmatpush1.bf16.msra.mxu0 (!%p114_p2), %v429_v9  ;;  %v163_v20 = vld [vmem:[%s620_s1 + $0x60] sm:$0xff] (!%p114_p2)  ;;  %v165_v23 = vld [vmem:[%s620_s1 + $0x70] sm:$0xff] (!%p114_p2)  ;;  %v172_v25 = vld [vmem:[%s620_s1 + $0xa8] sm:$0xff] (!%p114_p2) }
   0xb   : > { %446 = vmatpush1.bf16.msra.mxu1 (!%p114_p2), %v445_v13  ;;  %v433_v22 = vpack.c.bf16 (!%p114_p2), %v163_v20, %v159_v19  ;;  %432 = vmatprep.subr.bf16.mxu0 (!%p114_p2), %v431_v17  ;;  %v449_v26 = vpack.c.bf16 (!%p114_p2), %v165_v23, %v161_v21  ;;  %v435_v27 = vpack.c.bf16 (!%p114_p2), %v172_v25, %v168_v24  ;;  %v170_v28 = vld [vmem:[%s620_s1 + $0x98] sm:$0xff] (!%p114_p2)  ;;  %v167_v30 = vld [vmem:[%s620_s1 + $0x80] sm:$0xff] (!%p114_p2)  ;;  %v169_v33 = vld [vmem:[%s620_s1 + $0x90] sm:$0xff] (!%p114_p2) }
   0xc   : > { %448 = vmatprep.subr.bf16.mxu1 (!%p114_p2), %v447_v18  ;;  %v174_v29 = vld [vmem:[%s620_s1 + $0xb8] sm:$0xff] (!%p114_p2)  ;;  %v171_v32 = vld [vmem:[%s620_s1 + $0xa0] sm:$0xff] (!%p114_p2)  ;;  %v173_v34 = vld [vmem:[%s620_s1 + $0xb0] sm:$0xff] (!%p114_p2) }
   0xd   : > { %s623_s17 = smov (!%p137_p3, %s509_s17), 3  ;;  %v451_v31 = vpack.c.bf16 %v174_v29, %v170_v28  ;;  %v437_v35 = vpack.c.bf16 %v171_v32, %v167_v30  ;;  %v176_v36 = vld [vmem:[%s620_s1 + $0xc8] sm:$0xff]  ;;  %v178_v38 = vld [vmem:[%s620_s1 + $0xd8] sm:$0xff]  ;;  %v453_v39 = vpack.c.bf16 %v173_v34, %v169_v33  ;;  %v175_v42 = vld [vmem:[%s620_s1 + $0xc0] sm:$0xff] }
   0xe   : > { %434 = vmatpush1.bf16.msra.mxu0 %v433_v22  ;;  %v180_v37 = vld [vmem:[%s620_s1 + $0xe8] sm:$0xff]  ;;  %v182_v41 = vld [vmem:[%s620_s1 + $0xf8] sm:$0xff]  ;;  %v179_v43 = vld [vmem:[%s620_s1 + $0xe0] sm:$0xff]  ;;  %s416_s24 = sshll.u32 %s623_s17, 3  ;;  %s426_s28 = sshll.u32 %s623_s17, 5 }
   0xf   : > { %450 = vmatpush1.bf16.msra.mxu1 %v449_v26  ;;  %436 = vmatprep.subr.bf16.mxu0 %v435_v27  ;;  %v439_v40 = vpack.c.bf16 %v180_v37, %v176_v36  ;;  %v455_v44 = vpack.c.bf16 %v182_v41, %v178_v38  ;;  %v177_v45 = vld [vmem:[%s620_s1 + $0xd0] sm:$0xff]  ;;  %v441_v47 = vpack.c.bf16 %v179_v43, %v175_v42  ;;  %s140_s27 = scalar_lea.vmem %s619_s0, %s416_s24  ;;  %s147_s3 = scalar_lea.vmem %s621_s2, %s426_s28 }
  0x10   : > { %452 = vmatprep.subr.bf16.mxu1 %v451_v31  ;;  %v181_v46 = vld [vmem:[%s620_s1 + $0xf0] sm:$0xff]  ;;  %v149_v49 = vld [vmem:[%s140_s27] sm:$0xff]  ;;  %v150_v50 = vld [vmem:[%s140_s27 + $0x8] sm:$0xff] }
  0x11   : > { %v457_v48 = vpack.c.bf16 %v181_v46, %v177_v45 }
  0x12   : > { %438 = vmatpush1.bf16.msra.mxu0 %v437_v35 }
  0x13   : > { %454 = vmatpush1.bf16.msra.mxu1 %v453_v39  ;;  %440 = vmatprep.subr.bf16.mxu0 %v439_v40 }
  0x14   : > { %456 = vmatprep.subr.bf16.mxu1 %v455_v44 }
  0x16   : > { %442 = vmatpush1.bf16.msra.mxu0 %v441_v47 }
  0x17   : > { %458 = vmatpush1.bf16.msra.mxu1 %v457_v48 }
  0x19   : > { %420 = vmatmul.mubr.msk.f32.vlgmr.msra.gmra.mrb[0].mxu0 %vm183_vm0, %v149_v49 }
  0x1a   : > { %422 = vmatmul.mubr.msk.f32.vlgmr.msra.gmra.mrb[0].mxu1 %vm183_vm0, %v149_v49  ;;  %260 = vmatprep.mubr.f32.mxu0 %v476_v7 }
  0x1b   : > { %337 = vmatprep.mubr.f32.mxu1 %v476_v7 }
  0x1d   : > { %421 = vmatmul.mubr.msk.f32.gmra.mrb[2].mxu0 %vm183_vm0, %v150_v50 }
  0x1e   : > { %423 = vmatmul.mubr.msk.f32.gmra.mrb[2].mxu1 %vm183_vm0, %v150_v50 }
  0xec   : > { %v256_v51 = vpop.f32.mrb[0].mxu0 }
  0xed   : > { %344 = vst [vmem:[%s147_s3] sm:$0xff] %v256_v51  ;;  %v333_v52 = vpop.f32.mrb[0].mxu1  ;;  %v258_v53 = vpop.f32.mrb[1].mxu0 }
  0xee   : > { %346 = vst [vmem:[%s147_s3 + $0x10] sm:$0xff] %v333_v52  ;;  %345 = vst [vmem:[%s147_s3 + $0x8] sm:$0xff] %v258_v53  ;;  %v335_v54 = vpop.f32.mrb[1].mxu1 }
  0xef   : > { %347 = vst [vmem:[%s147_s3 + $0x18] sm:$0xff] %v335_v54 }
  0xf0   : > { %v262_v55 = vpop.f32.mrb[2].mxu0 }
  0xf1   : > { %348 = vst [vmem:[%s147_s3 + $0x20] sm:$0xff] %v262_v55  ;;  %v339_v56 = vpop.f32.mrb[2].mxu1  ;;  %v264_v57 = vpop.f32.mrb[3].mxu0 }
  0xf2   : > { %350 = vst [vmem:[%s147_s3 + $0x30] sm:$0xff] %v339_v56  ;;  %349 = vst [vmem:[%s147_s3 + $0x28] sm:$0xff] %v264_v57  ;;  %v341_v58 = vpop.f32.mrb[3].mxu1 }
  0xf3   : > { %351 = vst [vmem:[%s147_s3 + $0x38] sm:$0xff] %v341_v58 }
  0xf4 PF: > { %s12_s9 = sadd.s32 1, %s474_s9  }
  0xf5   : > { %p9_p4 = scmp.ge.s32.totalorder %s12_s9, 4  }
  0xf7   :  { %11 = sbr.rel (!%p9_p4) target bundleno = 1 (0x1), region = 58 }

// kernel: cvae_forward.13
= control target key start
LH: loop header
LB: loop body
LE: loop exit
PB: predicated region body
PF: predicated region fallthrough
CT: control target
= control target key end

     0   :  { %s529_s9 = smov 0   ;;  %s638_s0 = inlined_call_operand.vmem [shape: f32[288,32], index: 0, kind: input, shape index: {}]   ;;  %s639_s1 = inlined_call_operand.vmem [shape: f32[32,256], index: 1, kind: input, shape index: {}]   ;;  %s640_s2 = inlined_call_operand.vmem [shape: f32[288,256], index: 2, kind: output, shape index: {}]  }
   0x1 LB: > { %s461_s10 = sadd.s32 4294967295, %s511_s9   ;;  %p465_p0 = scmp.ge.s32.totalorder %s511_s9, 1  ;;  %s511_s9 = sphi %s529_s9, %s12_s9  }
   0x2   : > { %p113_p1 = scmp.lt.s32.totalorder %s511_s9, 4 }
   0x4   : > { %p114_p2 = pnand %p465_p0, %p113_p1 }
   0x5   : > { %v198_v0 = vld [vmem:[%s639_s1 + $0x8] sm:$0xff] (!%p114_p2)  ;;  %v200_v1 = vld [vmem:[%s639_s1 + $0x18] sm:$0xff] (!%p114_p2)  ;;  %v197_v2 = vld [vmem:[%s639_s1] sm:$0xff] (!%p114_p2)  ;;  %s136_s17 = smul.u32 (!%p114_p2), 12, %s461_s10  ;;  %v513_v7 = vmov (!%p114_p2), 0.0   ;;  %vm205_vm0 = vcmask (!%p114_p2), 261120  }
   0x6   : > { %117 = sbr.rel (%p114_p2) target bundleno = 254 (0xfe), region = 28  ;;  %v484_v3 = vpack.c.bf16 (!%p114_p2), %v200_v1, %v198_v0  ;;  %v199_v4 = vld [vmem:[%s639_s1 + $0x10] sm:$0xff] (!%p114_p2)  ;;  %v202_v5 = vld [vmem:[%s639_s1 + $0x28] sm:$0xff] (!%p114_p2)  ;;  %v204_v6 = vld [vmem:[%s639_s1 + $0x38] sm:$0xff] (!%p114_p2)  ;;  %306 = vmatprep.mubr.f32.mxu0 (!%p114_p2), %v513_v7  ;;  %342 = vmatprep.mubr.f32.mxu1 (!%p114_p2), %v513_v7 }
   0x7   : > { %v486_v8 = vpack.c.bf16 (!%p114_p2), %v199_v4, %v197_v2  ;;  %v488_v9 = vpack.c.bf16 (!%p114_p2), %v204_v6, %v202_v5  ;;  %v201_v10 = vld [vmem:[%s639_s1 + $0x20] sm:$0xff] (!%p114_p2)  ;;  %v203_v11 = vld [vmem:[%s639_s1 + $0x30] sm:$0xff] (!%p114_p2)  ;;  %p137_p3 = scmp.lt.s32.totalorder (!%p114_p2), %s136_s17, 35 }
   0x8   : > { %485 = vmatprep.subr.bf16.mxu0 (!%p114_p2), %v484_v3  ;;  %492 = vmatprep.subr.bf16.mxu1 (!%p114_p2), %v484_v3  ;;  %v490_v12 = vpack.c.bf16 (!%p114_p2), %v203_v11, %v201_v10 }
   0x9   : > { %487 = vmatpush1.bf16.msra.mxu0 (!%p114_p2), %v486_v8  ;;  %494 = vmatpush1.bf16.msra.mxu1 (!%p114_p2), %v486_v8 }
   0xa   : > { %489 = vmatprep.subr.bf16.mxu0 (!%p114_p2), %v488_v9  ;;  %493 = vmatprep.subr.bf16.mxu1 (!%p114_p2), %v488_v9 }
   0xd   : > { %s642_s17 = smov (!%p137_p3, %s136_s17), 35  ;;  %491 = vmatpush1.bf16.msra.mxu0 %v490_v12  ;;  %495 = vmatpush1.bf16.msra.mxu1 %v490_v12 }
   0xe   : > { %s466_s28 = sshll.u32 %s642_s17, 3  ;;  %s483_s4 = sshll.u32 %s642_s17, 4 }
   0xf   : > { %s569_s3 = scalar_lea.vmem %s638_s0, %s466_s28  ;;  %s609_s7 = scalar_lea.vmem %s640_s2, %s483_s4 }
  0x10   : > { %v149_v13 = vld [vmem:[%s569_s3] sm:$0xff]  ;;  %v155_v14 = vld [vmem:[%s569_s3 + $0x30] sm:$0xff]  ;;  %v150_v15 = vld [vmem:[%s569_s3 + $0x8] sm:$0xff] }
  0x11   : > { %vm161_vm1 = vcmp.ge.f32.partialorder %v149_v13, 0.0  ;;  %v173_v16 = vmul.f32 0.01, %v149_v13  ;;  %vm167_vm2 = vcmp.ge.f32.partialorder %v155_v14, 0.0  ;;  %v179_v17 = vmul.f32 0.01, %v155_v14 }
  0x12   : > { %vm162_vm3 = vcmp.ge.f32.partialorder %v150_v15, 0.0  ;;  %v174_v18 = vmul.f32 0.01, %v150_v15  ;;  %v156_v19 = vld [vmem:[%s569_s3 + $0x38] sm:$0xff]  ;;  %v151_v20 = vld [vmem:[%s569_s3 + $0x10] sm:$0xff]  ;;  %v157_v21 = vld [vmem:[%s569_s3 + $0x40] sm:$0xff] }
  0x13   : > { %v185_v22 = vsel %vm161_vm1, %v149_v13, %v173_v16  ;;  %v191_v23 = vsel %vm167_vm2, %v155_v14, %v179_v17  ;;  %vm168_vm4 = vcmp.ge.f32.partialorder %v156_v19, 0.0  ;;  %v180_v24 = vmul.f32 0.01, %v156_v19  ;;  %v152_v29 = vld [vmem:[%s569_s3 + $0x18] sm:$0xff]  ;;  %v158_v30 = vld [vmem:[%s569_s3 + $0x48] sm:$0xff]  ;;  %v153_v35 = vld [vmem:[%s569_s3 + $0x20] sm:$0xff] }
  0x14   : > { %469 = vmatmul.mubr.msk.f32.vlgmr.msra.gmra.mrb[0].mxu0 %vm205_vm0, %v185_v22  ;;  %475 = vmatmul.mubr.msk.f32.vlgmr.msra.gmra.mrb[0].mxu1 %vm205_vm0, %v191_v23  ;;  %v186_v25 = vsel %vm162_vm3, %v150_v15, %v174_v18  ;;  %v175_v27 = vmul.f32 0.01, %v151_v20  ;;  %v181_v28 = vmul.f32 0.01, %v157_v21  ;;  %vm163_vm5 = vcmp.ge.f32.partialorder %v151_v20, 0.0  ;;  %v159_v36 = vld [vmem:[%s569_s3 + $0x50] sm:$0xff] }
  0x15   : > { %312 = vmatprep.mubr.f32.mxu0 %v513_v7  ;;  %348 = vmatprep.mubr.f32.mxu1 %v513_v7  ;;  %v192_v26 = vsel %vm168_vm4, %v156_v19, %v180_v24  ;;  %vm169_vm6 = vcmp.ge.f32.partialorder %v157_v21, 0.0  ;;  %v176_v33 = vmul.f32 0.01, %v152_v29  ;;  %v182_v34 = vmul.f32 0.01, %v158_v30  ;;  %v154_v41 = vld [vmem:[%s569_s3 + $0x28] sm:$0xff] }
  0x16   : > { %v187_v31 = vsel %vm163_vm5, %v151_v20, %v175_v27  ;;  %v193_v32 = vsel %vm169_vm6, %v157_v21, %v181_v28  ;;  %vm164_vm7 = vcmp.ge.f32.partialorder %v152_v29, 0.0  ;;  %vm170_vm8 = vcmp.ge.f32.partialorder %v158_v30, 0.0  ;;  %v160_v42 = vld [vmem:[%s569_s3 + $0x58] sm:$0xff] }
  0x17   : > { %v188_v37 = vsel %vm164_vm7, %v152_v29, %v176_v33  ;;  %v194_v38 = vsel %vm170_vm8, %v158_v30, %v182_v34  ;;  %v177_v39 = vmul.f32 0.01, %v153_v35  ;;  %v183_v40 = vmul.f32 0.01, %v159_v36 }
  0x18   : > { %470 = vmatmul.mubr.msk.f32.gmra.mrb[2].mxu0 %vm205_vm0, %v186_v25  ;;  %476 = vmatmul.mubr.msk.f32.gmra.mrb[2].mxu1 %vm205_vm0, %v192_v26  ;;  %vm165_vm9 = vcmp.ge.f32.partialorder %v153_v35, 0.0  ;;  %vm171_vm10 = vcmp.ge.f32.partialorder %v159_v36, 0.0  ;;  %v178_v45 = vmul.f32 0.01, %v154_v41  ;;  %v184_v46 = vmul.f32 0.01, %v160_v42 }
  0x19   : > { %318 = vmatprep.mubr.f32.mxu0 %v513_v7  ;;  %354 = vmatprep.mubr.f32.mxu1 %v513_v7  ;;  %v189_v43 = vsel %vm165_vm9, %v153_v35, %v177_v39  ;;  %v195_v44 = vsel %vm171_vm10, %v159_v36, %v183_v40  ;;  %vm166_vm11 = vcmp.ge.f32.partialorder %v154_v41, 0.0  ;;  %vm172_vm12 = vcmp.ge.f32.partialorder %v160_v42, 0.0 }
  0x1a   : > { %v190_v47 = vsel %vm166_vm11, %v154_v41, %v178_v45  ;;  %v196_v48 = vsel %vm172_vm12, %v160_v42, %v184_v46 }
  0x1c   : > { %471 = vmatmul.mubr.msk.f32.gmra.mrb[4].mxu0 %vm205_vm0, %v187_v31  ;;  %477 = vmatmul.mubr.msk.f32.gmra.mrb[4].mxu1 %vm205_vm0, %v193_v32 }
  0x1d   : > { %324 = vmatprep.mubr.f32.mxu0 %v513_v7  ;;  %360 = vmatprep.mubr.f32.mxu1 %v513_v7 }
  0x20   : > { %472 = vmatmul.mubr.msk.f32.gmra.mrb[6].mxu0 %vm205_vm0, %v188_v37  ;;  %478 = vmatmul.mubr.msk.f32.gmra.mrb[6].mxu1 %vm205_vm0, %v194_v38 }
  0x21   : > { %330 = vmatprep.mubr.f32.mxu0 %v513_v7  ;;  %366 = vmatprep.mubr.f32.mxu1 %v513_v7 }
  0x24   : > { %473 = vmatmul.mubr.msk.f32.gmra.mrb[8].mxu0 %vm205_vm0, %v189_v43  ;;  %479 = vmatmul.mubr.msk.f32.gmra.mrb[8].mxu1 %vm205_vm0, %v195_v44 }
  0x25   : > { %336 = vmatprep.mubr.f32.mxu0 %v513_v7  ;;  %372 = vmatprep.mubr.f32.mxu1 %v513_v7 }
  0x28   : > { %474 = vmatmul.mubr.msk.f32.gmra.mrb[10].mxu0 %vm205_vm0, %v190_v47  ;;  %480 = vmatmul.mubr.msk.f32.gmra.mrb[10].mxu1 %vm205_vm0, %v196_v48 }
  0xe7   : > { %v308_v49 = vpop.f32.mrb[0].mxu0  ;;  %v344_v50 = vpop.f32.mrb[0].mxu1 }
  0xe8   : > { %379 = vst [vmem:[%s609_s7] sm:$0xff] %v308_v49  ;;  %391 = vst [vmem:[%s609_s7 + $0x60] sm:$0xff] %v344_v50  ;;  %v310_v51 = vpop.f32.mrb[1].mxu0  ;;  %v346_v52 = vpop.f32.mrb[1].mxu1 }
  0xe9   : > { %380 = vst [vmem:[%s609_s7 + $0x8] sm:$0xff] %v310_v51  ;;  %392 = vst [vmem:[%s609_s7 + $0x68] sm:$0xff] %v346_v52 }
  0xeb   : > { %v314_v53 = vpop.f32.mrb[2].mxu0  ;;  %v350_v54 = vpop.f32.mrb[2].mxu1 }
  0xec   : > { %381 = vst [vmem:[%s609_s7 + $0x10] sm:$0xff] %v314_v53  ;;  %393 = vst [vmem:[%s609_s7 + $0x70] sm:$0xff] %v350_v54  ;;  %v316_v55 = vpop.f32.mrb[3].mxu0  ;;  %v352_v56 = vpop.f32.mrb[3].mxu1 }
  0xed   : > { %382 = vst [vmem:[%s609_s7 + $0x18] sm:$0xff] %v316_v55  ;;  %394 = vst [vmem:[%s609_s7 + $0x78] sm:$0xff] %v352_v56 }
  0xef   : > { %v320_v57 = vpop.f32.mrb[4].mxu0  ;;  %v356_v58 = vpop.f32.mrb[4].mxu1 }
  0xf0   : > { %383 = vst [vmem:[%s609_s7 + $0x20] sm:$0xff] %v320_v57  ;;  %395 = vst [vmem:[%s609_s7 + $0x80] sm:$0xff] %v356_v58  ;;  %v322_v59 = vpop.f32.mrb[5].mxu0  ;;  %v358_v60 = vpop.f32.mrb[5].mxu1 }
  0xf1   : > { %384 = vst [vmem:[%s609_s7 + $0x28] sm:$0xff] %v322_v59  ;;  %396 = vst [vmem:[%s609_s7 + $0x88] sm:$0xff] %v358_v60 }
  0xf3   : > { %v326_v61 = vpop.f32.mrb[6].mxu0  ;;  %v362_v62 = vpop.f32.mrb[6].mxu1 }
  0xf4   : > { %385 = vst [vmem:[%s609_s7 + $0x30] sm:$0xff] %v326_v61  ;;  %397 = vst [vmem:[%s609_s7 + $0x90] sm:$0xff] %v362_v62  ;;  %v328_v63 = vpop.f32.mrb[7].mxu0  ;;  %v364_v0 = vpop.f32.mrb[7].mxu1 }
  0xf5   : > { %386 = vst [vmem:[%s609_s7 + $0x38] sm:$0xff] %v328_v63  ;;  %398 = vst [vmem:[%s609_s7 + $0x98] sm:$0xff] %v364_v0 }
  0xf7   : > { %v332_v1 = vpop.f32.mrb[8].mxu0  ;;  %v368_v2 = vpop.f32.mrb[8].mxu1 }
  0xf8   : > { %387 = vst [vmem:[%s609_s7 + $0x40] sm:$0xff] %v332_v1  ;;  %399 = vst [vmem:[%s609_s7 + $0xa0] sm:$0xff] %v368_v2  ;;  %v334_v3 = vpop.f32.mrb[9].mxu0  ;;  %v370_v4 = vpop.f32.mrb[9].mxu1 }
  0xf9   : > { %388 = vst [vmem:[%s609_s7 + $0x48] sm:$0xff] %v334_v3  ;;  %400 = vst [vmem:[%s609_s7 + $0xa8] sm:$0xff] %v370_v4 }
  0xfb   : > { %v338_v5 = vpop.f32.mrb[10].mxu0  ;;  %v374_v6 = vpop.f32.mrb[10].mxu1 }
  0xfc   : > { %389 = vst [vmem:[%s609_s7 + $0x50] sm:$0xff] %v338_v5  ;;  %401 = vst [vmem:[%s609_s7 + $0xb0] sm:$0xff] %v374_v6  ;;  %v340_v7 = vpop.f32.mrb[11].mxu0  ;;  %v376_v8 = vpop.f32.mrb[11].mxu1 }
  0xfd   : > { %390 = vst [vmem:[%s609_s7 + $0x58] sm:$0xff] %v340_v7  ;;  %402 = vst [vmem:[%s609_s7 + $0xb8] sm:$0xff] %v376_v8 }
  0xfe PF: > { %s12_s9 = sadd.s32 1, %s511_s9  }
  0xff   : > { %p9_p4 = scmp.ge.s32.totalorder %s12_s9, 5  }
 0x101   :  { %11 = sbr.rel (!%p9_p4) target bundleno = 1 (0x1), region = 58 }

// kernel: cvae_forward.14
= control target key start
LH: loop header
LB: loop body
LE: loop exit
PB: predicated region body
PF: predicated region fallthrough
CT: control target
= control target key end

     0   :  { %s555_s9 = smov 0   ;;  %s630_s0 = inlined_call_operand.vmem [shape: f32[1568,16], index: 0, kind: input, shape index: {}]   ;;  %s631_s1 = inlined_call_operand.vmem [shape: f32[16,108], index: 1, kind: input, shape index: {}]   ;;  %s632_s2 = inlined_call_operand.vmem [shape: f32[1568,108], index: 2, kind: output, shape index: {}]  }
   0x1 LB: > { %s454_s10 = sadd.s32 4294967295, %s538_s9   ;;  %p458_p0 = scmp.ge.s32.totalorder %s538_s9, 1  ;;  %s538_s9 = sphi %s555_s9, %s12_s9  }
   0x2   : > { %p113_p1 = scmp.lt.s32.totalorder %s538_s9, 15 }
   0x4   : > { %p114_p2 = pnand %p458_p0, %p113_p1 }
   0x5   : > { %v203_v0 = vld [vmem:[%s631_s1] sm:$0xff] (!%p114_p2)  ;;  %v204_v1 = vld [vmem:[%s631_s1 + $0x8] sm:$0xff] (!%p114_p2)  ;;  %s135_s15 = smul.u32 (!%p114_p2), 14, %s454_s10  ;;  %vm205_vm0 = vcmask (!%p114_p2), 130048   ;;  %vm383_vm15 = vcmask (!%p114_p2), 883712  }
   0x6   : > { %117 = sbr.rel (%p114_p2) target bundleno = 247 (0xf7), region = 28  ;;  %v518_v2 = vpack.c.bf16 (!%p114_p2), %v204_v1, %v203_v0 }
   0x7   : > { %p136_p3 = scmp.lt.s32.totalorder (!%p114_p2), %s135_s15, 195 }
   0x8   : > { %519 = vmatprep.subr.bf16.mxu0 (!%p114_p2), %v518_v2  ;;  %522 = vmatprep.subr.bf16.mxu1 (!%p114_p2), %v518_v2 }
   0x9   : > { %521 = vmatpush3.bf16.msra.mxu0 (!%p114_p2), %v518_v2  ;;  %523 = vmatpush3.bf16.msra.mxu1 (!%p114_p2), %v518_v2 }
   0xd   : > { %s634_s15 = smov (!%p136_p3, %s135_s15), 195 }
   0xe   : > { %s459_s16 = sshll.u32 %s634_s15, 3 }
   0xf   : > { %s577_s19 = scalar_lea.vmem %s630_s0, %s459_s16  ;;  %s145_s22 = scalar_lea.vmem %s632_s2, %s459_s16 }
  0x10   : > { %v147_v3 = vld [vmem:[%s577_s19] sm:$0xff]  ;;  %v148_v4 = vld [vmem:[%s577_s19 + $0x8] sm:$0xff]  ;;  %v149_v9 = vld [vmem:[%s577_s19 + $0x10] sm:$0xff] }
  0x11   : > { %v155_v5 = vld [vmem:[%s577_s19 + $0x40] sm:$0xff]  ;;  %vm161_vm1 = vcmp.ge.f32.partialorder %v147_v3, 0.0  ;;  %v175_v6 = vmul.f32 0.01, %v147_v3  ;;  %vm162_vm2 = vcmp.ge.f32.partialorder %v148_v4, 0.0  ;;  %v156_v10 = vld [vmem:[%s577_s19 + $0x48] sm:$0xff] }
  0x12   : > { %v176_v7 = vmul.f32 0.01, %v148_v4  ;;  %vm169_vm3 = vcmp.ge.f32.partialorder %v155_v5, 0.0  ;;  %v183_v8 = vmul.f32 0.01, %v155_v5  ;;  %v150_v11 = vld [vmem:[%s577_s19 + $0x18] sm:$0xff] }
  0x13   : > { %v189_v12 = vsel %vm161_vm1, %v147_v3, %v175_v6  ;;  %vm163_vm4 = vcmp.ge.f32.partialorder %v149_v9, 0.0  ;;  %v177_v14 = vmul.f32 0.01, %v149_v9  ;;  %v157_v15 = vld [vmem:[%s577_s19 + $0x50] sm:$0xff]  ;;  %v151_v16 = vld [vmem:[%s577_s19 + $0x20] sm:$0xff]  ;;  %v158_v17 = vld [vmem:[%s577_s19 + $0x58] sm:$0xff] }
  0x14   : > { %v190_v13 = vsel %vm162_vm2, %v148_v4, %v176_v7  ;;  %497 = vmatprep.mubr.msk.f32.mxu0 %vm205_vm0, %v189_v12  ;;  %v197_v18 = vsel %vm169_vm3, %v155_v5, %v183_v8  ;;  %vm170_vm5 = vcmp.ge.f32.partialorder %v156_v10, 0.0  ;;  %v184_v19 = vmul.f32 0.01, %v156_v10  ;;  %v152_v20 = vld [vmem:[%s577_s19 + $0x28] sm:$0xff]  ;;  %v159_v24 = vld [vmem:[%s577_s19 + $0x60] sm:$0xff]  ;;  %v153_v27 = vld [vmem:[%s577_s19 + $0x30] sm:$0xff] }
  0x15   : > { %vm164_vm6 = vcmp.ge.f32.partialorder %v150_v11, 0.0  ;;  %498 = vmatmul.mubr.msk.f32.vlgmr.msra.gmra.mrb[0].mxu0 %vm205_vm0, %v190_v13  ;;  %509 = vmatprep.mubr.msk.f32.mxu1 %vm205_vm0, %v197_v18  ;;  %v191_v21 = vsel %vm163_vm4, %v149_v9, %v177_v14  ;;  %v178_v22 = vmul.f32 0.01, %v150_v11  ;;  %vm171_vm7 = vcmp.ge.f32.partialorder %v157_v15, 0.0  ;;  %v160_v28 = vld [vmem:[%s577_s19 + $0x68] sm:$0xff]  ;;  %v154_v35 = vld [vmem:[%s577_s19 + $0x38] sm:$0xff] }
  0x16   : > { %v185_v23 = vmul.f32 0.01, %v157_v15  ;;  %500 = vmatprep.mubr.msk.f32.mxu0 %vm205_vm0, %v191_v21  ;;  %v198_v25 = vsel %vm170_vm5, %v156_v10, %v184_v19  ;;  %vm165_vm8 = vcmp.ge.f32.partialorder %v151_v16, 0.0  ;;  %v179_v26 = vmul.f32 0.01, %v151_v16 }
  0x17   : > { %vm172_vm9 = vcmp.ge.f32.partialorder %v158_v17, 0.0  ;;  %510 = vmatmul.mubr.msk.f32.vlgmr.msra.gmra.mrb[0].mxu1 %vm205_vm0, %v198_v25  ;;  %v192_v29 = vsel %vm164_vm6, %v150_v11, %v178_v22  ;;  %v186_v31 = vmul.f32 0.01, %v158_v17  ;;  %vm166_vm10 = vcmp.ge.f32.partialorder %v152_v20, 0.0 }
  0x18   : > { %v199_v30 = vsel %vm171_vm7, %v157_v15, %v185_v23  ;;  %v193_v32 = vsel %vm165_vm8, %v151_v16, %v179_v26  ;;  %v180_v33 = vmul.f32 0.01, %v152_v20  ;;  %vm173_vm11 = vcmp.ge.f32.partialorder %v159_v24, 0.0 }
  0x19   : > { %512 = vmatprep.mubr.msk.f32.mxu1 %vm205_vm0, %v199_v30  ;;  %v187_v34 = vmul.f32 0.01, %v159_v24  ;;  %501 = vmatmul.mubr.msk.f32.gmra.mrb[2].mxu0 %vm205_vm0, %v192_v29  ;;  %v200_v36 = vsel %vm172_vm9, %v158_v17, %v186_v31  ;;  %vm167_vm12 = vcmp.ge.f32.partialorder %v153_v27, 0.0  ;;  %v181_v37 = vmul.f32 0.01, %v153_v27 }
  0x1a   : > { %vm174_vm13 = vcmp.ge.f32.partialorder %v160_v28, 0.0  ;;  %503 = vmatprep.mubr.msk.f32.mxu0 %vm205_vm0, %v193_v32  ;;  %v194_v38 = vsel %vm166_vm10, %v152_v20, %v180_v33  ;;  %v188_v40 = vmul.f32 0.01, %v160_v28  ;;  %vm168_vm14 = vcmp.ge.f32.partialorder %v154_v35, 0.0 }
  0x1b   : > { %v201_v39 = vsel %vm173_vm11, %v159_v24, %v187_v34  ;;  %513 = vmatmul.mubr.msk.f32.gmra.mrb[2].mxu1 %vm205_vm0, %v200_v36  ;;  %v195_v41 = vsel %vm167_vm12, %v153_v27, %v181_v37  ;;  %v182_v42 = vmul.f32 0.01, %v154_v35 }
  0x1c   : > { %515 = vmatprep.mubr.msk.f32.mxu1 %vm205_vm0, %v201_v39  ;;  %v202_v43 = vsel %vm174_vm13, %v160_v28, %v188_v40 }
  0x1d   : > { %504 = vmatmul.mubr.msk.f32.gmra.mrb[4].mxu0 %vm205_vm0, %v194_v38  ;;  %v196_v44 = vsel %vm168_vm14, %v154_v35, %v182_v42 }
  0x1e   : > { %506 = vmatprep.mubr.msk.f32.mxu0 %vm205_vm0, %v195_v41 }
  0x1f   : > { %516 = vmatmul.mubr.msk.f32.gmra.mrb[4].mxu1 %vm205_vm0, %v202_v43 }
  0x21   : > { %507 = vmatmul.mubr.msk.f32.gmra.mrb[6].mxu0 %vm205_vm0, %v196_v44 }
  0xe8   : > { %v499_v45 = vpop.f32.mrb[0].mxu0 }
  0xe9   : > { %385 = vst.msk [vmem:[%s145_s22 + $0x8] sm:$0xff] %vm383_vm15, %v499_v45  ;;  %v314_v46 = vpop.f32.mrb[1].mxu0 }
  0xea   : > { %384 = vst.msk [vmem:[%s145_s22] sm:$0xff] %vm383_vm15, %v314_v46  ;;  %v511_v47 = vpop.f32.mrb[0].mxu1 }
  0xeb   : > { %393 = vst.msk [vmem:[%s145_s22 + $0x48] sm:$0xff] %vm383_vm15, %v511_v47  ;;  %v354_v48 = vpop.f32.mrb[1].mxu1 }
  0xec   : > { %v502_v49 = vpop.f32.mrb[2].mxu0  ;;  %392 = vst.msk [vmem:[%s145_s22 + $0x40] sm:$0xff] %vm383_vm15, %v354_v48 }
  0xed   : > { %387 = vst.msk [vmem:[%s145_s22 + $0x18] sm:$0xff] %vm383_vm15, %v502_v49  ;;  %v324_v50 = vpop.f32.mrb[3].mxu0 }
  0xee   : > { %386 = vst.msk [vmem:[%s145_s22 + $0x10] sm:$0xff] %vm383_vm15, %v324_v50  ;;  %v514_v51 = vpop.f32.mrb[2].mxu1 }
  0xef   : > { %395 = vst.msk [vmem:[%s145_s22 + $0x58] sm:$0xff] %vm383_vm15, %v514_v51  ;;  %v364_v52 = vpop.f32.mrb[3].mxu1 }
  0xf0   : > { %v505_v53 = vpop.f32.mrb[4].mxu0  ;;  %394 = vst.msk [vmem:[%s145_s22 + $0x50] sm:$0xff] %vm383_vm15, %v364_v52 }
  0xf1   : > { %389 = vst.msk [vmem:[%s145_s22 + $0x28] sm:$0xff] %vm383_vm15, %v505_v53  ;;  %v334_v54 = vpop.f32.mrb[5].mxu0 }
  0xf2   : > { %388 = vst.msk [vmem:[%s145_s22 + $0x20] sm:$0xff] %vm383_vm15, %v334_v54  ;;  %v517_v55 = vpop.f32.mrb[4].mxu1 }
  0xf3   : > { %397 = vst.msk [vmem:[%s145_s22 + $0x68] sm:$0xff] %vm383_vm15, %v517_v55  ;;  %v374_v56 = vpop.f32.mrb[5].mxu1 }
  0xf4   : > { %v508_v57 = vpop.f32.mrb[6].mxu0  ;;  %396 = vst.msk [vmem:[%s145_s22 + $0x60] sm:$0xff] %vm383_vm15, %v374_v56 }
  0xf5   : > { %391 = vst.msk [vmem:[%s145_s22 + $0x38] sm:$0xff] %vm383_vm15, %v508_v57  ;;  %v344_v58 = vpop.f32.mrb[7].mxu0 }
  0xf6   : > { %390 = vst.msk [vmem:[%s145_s22 + $0x30] sm:$0xff] %vm383_vm15, %v344_v58 }
  0xf7 PF: > { %s12_s9 = sadd.s32 1, %s538_s9  }
  0xf8   : > { %p9_p4 = scmp.ge.s32.totalorder %s12_s9, 16  }
  0xfa   :  { %11 = sbr.rel (!%p9_p4) target bundleno = 1 (0x1), region = 58 }

// kernel: cvae_forward.15
= control target key start
LH: loop header
LB: loop body
LE: loop exit
PB: predicated region body
PF: predicated region fallthrough
CT: control target
= control target key end

     0   :  { %s403_s6 = smov 0   ;;  %s455_s0 = inlined_call_operand.vmem [shape: f32[192,128], index: 0, kind: input, shape index: {}]   ;;  %s456_s1 = inlined_call_operand.vmem [shape: f32[192,128], index: 1, kind: output, shape index: {}]  }
   0x1 LB: > { %s308_s7 = sadd.s32 4294967295, %s391_s6   ;;  %p312_p0 = scmp.ge.s32.totalorder %s391_s6, 1  ;;  %s391_s6 = sphi %s403_s6, %s11_s6  }
   0x2   : > { %p88_p1 = scmp.lt.s32.totalorder %s391_s6, 3 }
   0x4   : > { %p89_p2 = pnand %p312_p0, %p88_p1 }
   0x5   : > { %s108_s8 = smul.u32 (!%p89_p2), 12, %s308_s7 }
   0x6   : > { %92 = sbr.rel (%p89_p2) target bundleno = 68 (0x44), region = 24 }
   0x7   : > { %p109_p3 = scmp.lt.s32.totalorder (!%p89_p2), %s108_s8, 23 }
   0xd   : > { %s458_s8 = smov (!%p109_p3, %s108_s8), 23 }
   0xe   : > { %s313_s9 = sshll.u32 %s458_s8, 3 }
   0xf   : > { %s419_s12 = scalar_lea.vmem %s455_s0, %s313_s9  ;;  %s438_s15 = scalar_lea.vmem %s456_s1, %s313_s9 }
  0x10   : > { %v120_v0 = vld [vmem:[%s419_s12] sm:$0xff]  ;;  %v121_v1 = vld [vmem:[%s419_s12 + $0x8] sm:$0xff]  ;;  %v122_v2 = vld [vmem:[%s419_s12 + $0x10] sm:$0xff] }
  0x11   : > { %vm132_vm0 = vcmp.ge.f32.partialorder %v120_v0, 0.0  ;;  %v144_v3 = vmul.f32 0.01, %v120_v0  ;;  %vm133_vm1 = vcmp.ge.f32.partialorder %v121_v1, 0.0  ;;  %v145_v4 = vmul.f32 0.01, %v121_v1 }
  0x12   : > { %vm134_vm2 = vcmp.ge.f32.partialorder %v122_v2, 0.0  ;;  %v146_v5 = vmul.f32 0.01, %v122_v2  ;;  %v123_v6 = vld [vmem:[%s419_s12 + $0x18] sm:$0xff]  ;;  %v124_v7 = vld [vmem:[%s419_s12 + $0x20] sm:$0xff]  ;;  %v125_v8 = vld [vmem:[%s419_s12 + $0x28] sm:$0xff] }
  0x13   : > { %v156_v9 = vsel %vm132_vm0, %v120_v0, %v144_v3  ;;  %v157_v10 = vsel %vm133_vm1, %v121_v1, %v145_v4  ;;  %vm135_vm3 = vcmp.ge.f32.partialorder %v123_v6, 0.0  ;;  %v147_v11 = vmul.f32 0.01, %v123_v6  ;;  %v126_v12 = vld [vmem:[%s419_s12 + $0x30] sm:$0xff]  ;;  %v127_v16 = vld [vmem:[%s419_s12 + $0x38] sm:$0xff]  ;;  %v128_v22 = vld [vmem:[%s419_s12 + $0x40] sm:$0xff] }
  0x14   : > { %v315_v13 = vmul.f32 -1.442695, %v156_v9  ;;  %v316_v14 = vmul.f32 -1.442695, %v157_v10  ;;  %v158_v15 = vsel %vm134_vm2, %v122_v2, %v146_v5  ;;  %vm136_vm4 = vcmp.ge.f32.partialorder %v124_v7, 0.0  ;;  %v129_v28 = vld [vmem:[%s419_s12 + $0x48] sm:$0xff] }
  0x15   : > { %v317_v17 = vmul.f32 -1.442695, %v158_v15  ;;  %v159_v18 = vsel %vm135_vm3, %v123_v6, %v147_v11  ;;  %v148_v19 = vmul.f32 0.01, %v124_v7  ;;  %vm137_vm5 = vcmp.ge.f32.partialorder %v125_v8, 0.0  ;;  %v130_v31 = vld [vmem:[%s419_s12 + $0x50] sm:$0xff] }
  0x16   : > { %337 = vpow2.f32 %v315_v13  ;;  %v318_v20 = vmul.f32 -1.442695, %v159_v18  ;;  %v149_v21 = vmul.f32 0.01, %v125_v8  ;;  %vm138_vm6 = vcmp.ge.f32.partialorder %v126_v12, 0.0  ;;  %v131_v41 = vld [vmem:[%s419_s12 + $0x58] sm:$0xff] }
  0x17   : > { %339 = vpow2.f32 %v316_v14  ;;  %v160_v23 = vsel %vm136_vm4, %v124_v7, %v148_v19  ;;  %v150_v24 = vmul.f32 0.01, %v126_v12  ;;  %vm139_vm7 = vcmp.ge.f32.partialorder %v127_v16, 0.0 }
  0x18   : > { %341 = vpow2.f32 %v317_v17  ;;  %v319_v25 = vmul.f32 -1.442695, %v160_v23  ;;  %v161_v26 = vsel %vm137_vm5, %v125_v8, %v149_v21  ;;  %v151_v27 = vmul.f32 0.01, %v127_v16 }
  0x19   : > { %343 = vpow2.f32 %v318_v20  ;;  %v320_v29 = vmul.f32 -1.442695, %v161_v26  ;;  %v162_v30 = vsel %vm138_vm6, %v126_v12, %v150_v24  ;;  %vm140_vm8 = vcmp.ge.f32.partialorder %v128_v22, 0.0 }
  0x1a   : > { %345 = vpow2.f32 %v319_v25  ;;  %v321_v32 = vmul.f32 -1.442695, %v162_v30  ;;  %v163_v33 = vsel %vm139_vm7, %v127_v16, %v151_v27  ;;  %v152_v34 = vmul.f32 0.01, %v128_v22 }
  0x1b   : > { %347 = vpow2.f32 %v320_v29  ;;  %v322_v35 = vmul.f32 -1.442695, %v163_v33  ;;  %vm141_vm9 = vcmp.ge.f32.partialorder %v129_v28, 0.0  ;;  %v153_v36 = vmul.f32 0.01, %v129_v28 }
  0x1c   : > { %349 = vpow2.f32 %v321_v32  ;;  %v164_v37 = vsel %vm140_vm8, %v128_v22, %v152_v34  ;;  %vm142_vm10 = vcmp.ge.f32.partialorder %v130_v31, 0.0  ;;  %v154_v38 = vmul.f32 0.01, %v130_v31 }
  0x1d   : > { %351 = vpow2.f32 %v322_v35  ;;  %v323_v39 = vmul.f32 -1.442695, %v164_v37  ;;  %v165_v40 = vsel %vm141_vm9, %v129_v28, %v153_v36  ;;  %v155_v46 = vmul.f32 0.01, %v131_v41 }
  0x1e   : > { %v324_v42 = vmul.f32 -1.442695, %v165_v40  ;;  %v166_v43 = vsel %vm142_vm10, %v130_v31, %v154_v38  ;;  %vm143_vm11 = vcmp.ge.f32.partialorder %v131_v41, 0.0 }
  0x1f   : > { %353 = vpow2.f32 %v323_v39  ;;  %v325_v44 = vmul.f32 -1.442695, %v166_v43  ;;  %v167_v55 = vsel %vm143_vm11, %v131_v41, %v155_v46 }
  0x20   : > { %v338_v45 = vpop.eup %337  ;;  %355 = vpow2.f32 %v324_v42  ;;  %v326_v62 = vmul.f32 -1.442695, %v167_v55 }
  0x21   : > { %v340_v47 = vpop.eup %339  ;;  %v204_v48 = vadd.f32 1.0, %v338_v45  ;;  %357 = vpow2.f32 %v325_v44 }
  0x22   : > { %v342_v49 = vpop.eup %341  ;;  %v205_v50 = vadd.f32 1.0, %v340_v47 }
  0x23   : > { %v344_v51 = vpop.eup %343  ;;  %359 = vrcp.f32 %v204_v48  ;;  %v206_v52 = vadd.f32 1.0, %v342_v49 }
  0x24   : > { %v346_v53 = vpop.eup %345  ;;  %361 = vrcp.f32 %v205_v50  ;;  %v207_v54 = vadd.f32 1.0, %v344_v51 }
  0x25   : > { %v348_v56 = vpop.eup %347  ;;  %363 = vrcp.f32 %v206_v52  ;;  %v208_v57 = vadd.f32 1.0, %v346_v53 }
  0x26   : > { %v350_v58 = vpop.eup %349  ;;  %365 = vrcp.f32 %v207_v54  ;;  %v209_v59 = vadd.f32 1.0, %v348_v56 }
  0x27   : > { %v352_v60 = vpop.eup %351  ;;  %367 = vrcp.f32 %v208_v57  ;;  %v210_v61 = vadd.f32 1.0, %v350_v58 }
  0x28   : > { %369 = vrcp.f32 %v209_v59  ;;  %v211_v63 = vadd.f32 1.0, %v352_v60 }
  0x29   : > { %v354_v0 = vpop.eup %353  ;;  %371 = vrcp.f32 %v210_v61 }
  0x2a   : > { %v356_v1 = vpop.eup %355  ;;  %373 = vrcp.f32 %v211_v63  ;;  %v212_v2 = vadd.f32 1.0, %v354_v0 }
  0x2b   : > { %v358_v3 = vpop.eup %357  ;;  %v213_v4 = vadd.f32 1.0, %v356_v1  ;;  %375 = vpow2.f32 %v326_v62 }
  0x2c   : > { %377 = vrcp.f32 %v212_v2  ;;  %v214_v5 = vadd.f32 1.0, %v358_v3 }
  0x2d   : > { %v360_v6 = vpop.eup %359  ;;  %379 = vrcp.f32 %v213_v4 }
  0x2e   : > { %v362_v7 = vpop.eup %361  ;;  %240 = vst [vmem:[%s438_s15] sm:$0xff] %v360_v6  ;;  %381 = vrcp.f32 %v214_v5 }
  0x2f   : > { %v364_v8 = vpop.eup %363  ;;  %241 = vst [vmem:[%s438_s15 + $0x8] sm:$0xff] %v362_v7 }
  0x30   : > { %v366_v9 = vpop.eup %365  ;;  %242 = vst [vmem:[%s438_s15 + $0x10] sm:$0xff] %v364_v8 }
  0x31   : > { %v368_v10 = vpop.eup %367  ;;  %243 = vst [vmem:[%s438_s15 + $0x18] sm:$0xff] %v366_v9 }
  0x32   : > { %v370_v11 = vpop.eup %369  ;;  %244 = vst [vmem:[%s438_s15 + $0x20] sm:$0xff] %v368_v10 }
  0x33   : > { %v372_v12 = vpop.eup %371  ;;  %245 = vst [vmem:[%s438_s15 + $0x28] sm:$0xff] %v370_v11 }
  0x34   : > { %v374_v13 = vpop.eup %373  ;;  %246 = vst [vmem:[%s438_s15 + $0x30] sm:$0xff] %v372_v12 }
  0x35   : > { %v376_v14 = vpop.eup %375  ;;  %247 = vst [vmem:[%s438_s15 + $0x38] sm:$0xff] %v374_v13 }
  0x36   : > { %v378_v15 = vpop.eup %377  ;;  %v215_v16 = vadd.f32 1.0, %v376_v14 }
  0x37   : > { %v380_v17 = vpop.eup %379  ;;  %248 = vst [vmem:[%s438_s15 + $0x40] sm:$0xff] %v378_v15 }
  0x38   : > { %v382_v18 = vpop.eup %381  ;;  %249 = vst [vmem:[%s438_s15 + $0x48] sm:$0xff] %v380_v17  ;;  %383 = vrcp.f32 %v215_v16 }
  0x39   : > { %250 = vst [vmem:[%s438_s15 + $0x50] sm:$0xff] %v382_v18 }
  0x42   : > { %v384_v19 = vpop.eup %383 }
  0x43   : > { %251 = vst [vmem:[%s438_s15 + $0x58] sm:$0xff] %v384_v19 }
  0x44 PF: > { %s11_s6 = sadd.s32 1, %s391_s6  }
  0x45   : > { %p8_p4 = scmp.ge.s32.totalorder %s11_s6, 4  }
  0x47   :  { %10 = sbr.rel (!%p8_p4) target bundleno = 1 (0x1), region = 54 }

</bundles_post_ra>
